<compile_context>
chip_gen: v6e
topology: v6e:2x2x1
jax: 0.10.0
libtpu: 0.0.40
codegen_flags: <defaults>
</compile_context>

<pallas_src>
import functools

import jax
import jax.numpy as jnp
from jax.experimental import pallas as pl
from jax.experimental.pallas import tpu as pltpu

EPS = 1e-5
NEG_SLOPE = 0.2
_VMEM_LIMIT = 32 * 1024 * 1024  # safe on v5e/v6e/v7x, >> our tile footprint


# --------------------------------------------------------------------------
# Kernels (all tiles are (feature, TS) with TS on the 128-lane axis)
# --------------------------------------------------------------------------
def _x_stats_kernel(x_ref, sum_ref, sq_ref):
    """Per-channel sum / sum-of-squares of x, accumulated over spatial tiles."""
    @pl.when(pl.program_id(1) == 0)
    def _init():
        sum_ref[...] = jnp.zeros_like(sum_ref)
        sq_ref[...] = jnp.zeros_like(sq_ref)

    x = x_ref[...].astype(jnp.float32)            # (C, TS)
    sum_ref[...] += jnp.sum(x, axis=1, keepdims=True)
    sq_ref[...] += jnp.sum(x * x, axis=1, keepdims=True)


def _alpha_stats_kernel(x_ref, nda_ref, fb_ref, asum_ref, gram_ref,
                        *, s_valid, tile_s):
    """Hard-gate statistics: sum(alpha) and Gram(alpha) for bn_6 batch stats."""
    @pl.when(pl.program_id(1) == 0)
    def _init():
        asum_ref[...] = jnp.zeros_like(asum_ref)
        gram_ref[...] = jnp.zeros_like(gram_ref)

    x = x_ref[...].astype(jnp.float32)                                  # (C, TS)
    f = jnp.dot(nda_ref[...], x, preferred_element_type=jnp.float32)    # (K, TS)
    f = f + fb_ref[...]
    # GumbelSigmoid (deterministic) + hard 0.5 threshold  ==  (f > 0).
    alpha = (f > 0.0).astype(jnp.float32)
    # Mask columns that belong to the zero-padded tail of the spatial axis.
    col = pl.program_id(1) * tile_s + jax.lax.broadcasted_iota(
        jnp.int32, (1, tile_s), 1)
    alpha = jnp.where(col < s_valid, alpha, 0.0)

    asum_ref[...] += jnp.sum(alpha, axis=1, keepdims=True)
    # alpha is exactly 0/1 -> bf16 operands are lossless, single-pass MXU.
    ab = alpha.astype(jnp.bfloat16)
    gram_ref[...] += jax.lax.dot_general(
        ab, ab, (((1,), (1,)), ((), ())), preferred_element_type=jnp.float32)


def _apply_kernel(x_ref, nda_ref, fb_ref, nd6t_ref, sh6_ref, y_ref):
    """Recompute alpha per tile and apply: y = bn6(alpha @ nd3) -> LeakyReLU."""
    x = x_ref[...].astype(jnp.float32)                                  # (C, TS)
    f = jnp.dot(nda_ref[...], x, preferred_element_type=jnp.float32)    # (K, TS)
    f = f + fb_ref[...]
    alpha = (f > 0.0).astype(jnp.float32)
    y = jnp.dot(nd6t_ref[...], alpha, preferred_element_type=jnp.float32)
    y = y + sh6_ref[...]                                                # (C, TS)
    y_ref[...] = jnp.where(y > 0.0, y, NEG_SLOPE * y).astype(y_ref.dtype)


# --------------------------------------------------------------------------
# Wrapper
# --------------------------------------------------------------------------
def _pick_tile_s(S, C, K):
    """Largest lane tile (multiple of 128) that keeps the working set small."""
    budget = 8 * 1024 * 1024                      # per-call VMEM working budget
    bytes_per_lane = 4 * (4 * C + 3 * K)          # 2x x, 2x y tiles + f temps
    ts = budget // max(bytes_per_lane, 1)
    ts = max(128, min(2048, (ts // 128) * 128))
    s_cap = ((S + 127) // 128) * 128
    return int(min(ts, s_cap))


def node_attention_forward(x, nodes, params, *, tile_s=None):
    """x: (N, C, T, H, W) float32, nodes: (K, C) float32 -> y (N, C, T, H, W)."""
    N, C, T, H, W = x.shape
    K, node_dim = nodes.shape
    assert node_dim == C
    S = T * H * W
    M = N * S
    f32 = jnp.float32
    hp = jax.lax.Precision.HIGHEST

    x3 = x.reshape(N, C, S).astype(f32)           # no-copy reshape

    if tile_s is None:
        tile_s = _pick_tile_s(S, C, K)
    ts = int(tile_s)
    n_s = pl.cdiv(S, ts)
    S_pad = n_s * ts
    if S_pad != S:
        x3 = jnp.pad(x3, ((0, 0), (0, 0), (0, S_pad - S)))
    grid = (N, n_s)

    x_spec = pl.BlockSpec((None, C, ts), lambda n, s: (n, 0, s))

    def _const(shape):
        return pl.BlockSpec(shape, lambda n, s: (0,) * len(shape))

    def _per_n(shape):
        return pl.BlockSpec((None,) + shape, lambda n, s: (n,) + (0,) * len(shape))

    acc_cp = pltpu.CompilerParams(
        dimension_semantics=("parallel", "arbitrary"),
        vmem_limit_bytes=_VMEM_LIMIT)
    par_cp = pltpu.CompilerParams(
        dimension_semantics=("parallel", "parallel"),
        vmem_limit_bytes=_VMEM_LIMIT)

    # ---- pass 1: bn_1 batch statistics of x --------------------------------
    sum_p, sq_p = pl.pallas_call(
        _x_stats_kernel,
        grid=grid,
        in_specs=[x_spec],
        out_specs=(_per_n((C, 1)), _per_n((C, 1))),
        out_shape=(jax.ShapeDtypeStruct((N, C, 1), f32),
                   jax.ShapeDtypeStruct((N, C, 1), f32)),
        compiler_params=acc_cp,
    )(x3)
    sum_x = jnp.sum(sum_p, axis=0)[:, 0]
    sq_x = jnp.sum(sq_p, axis=0)[:, 0]
    mu1 = sum_x / M
    var1 = jnp.maximum(sq_x / M - mu1 * mu1, 0.0)
    a1 = params["g1"] * jax.lax.rsqrt(var1 + EPS)          # bn_1 scale (C,)
    d1 = params["be1"] - mu1 * a1                          # bn_1 shift (C,)

    # ---- node branch (tiny, hoisted to the wrapper): bn_2 -> linear_1 -> bn_3
    nd = nodes.astype(f32)
    mu2 = jnp.mean(nd, axis=0)
    var2 = jnp.mean((nd - mu2) ** 2, axis=0)
    nd = (nd - mu2) * jax.lax.rsqrt(var2 + EPS) * params["g2"] + params["be2"]
    nd = jnp.dot(nd, params["w_t"], precision=hp) + params["b"]
    mu3 = jnp.mean(nd, axis=1, keepdims=True)
    var3 = jnp.mean((nd - mu3) ** 2, axis=1, keepdims=True)
    nd3 = ((nd - mu3) * jax.lax.rsqrt(var3 + EPS) * params["g3"][:, None]
           + params["be3"][:, None])                       # (K, C)

    # fold bn_1 into tensor_product_1:  bn1(x) @ nd3^T == x @ (a1*nd3)^T + nd3@d1
    nd3a = nd3 * a1[None, :]                               # (K, C)
    f_bias = jnp.dot(nd3, d1, precision=hp)[:, None]       # (K, 1)

    # ---- pass 2: alpha statistics (sum + Gram) ------------------------------
    kern2 = functools.partial(_alpha_stats_kernel, s_valid=S, tile_s=ts)
    asum_p, gram_p = pl.pallas_call(
        kern2,
        grid=grid,
        in_specs=[x_spec, _const((K, C)), _const((K, 1))],
        out_specs=(_per_n((K, 1)), _per_n((K, K))),
        out_shape=(jax.ShapeDtypeStruct((N, K, 1), f32),
                   jax.ShapeDtypeStruct((N, K, K), f32)),
        compiler_params=acc_cp,
    )(x3, nd3a, f_bias)
    asum = jnp.sum(asum_p, axis=0)[:, 0]                   # (K,)
    gram = jnp.sum(gram_p, axis=0)                         # (K, K)

    # bn_6 batch statistics of y_raw = alpha @ nd3, reconstructed analytically
    mu6 = jnp.dot(asum, nd3, precision=hp) / M
    ey2 = jnp.sum(nd3 * jnp.dot(gram, nd3, precision=hp), axis=0) / M
    var6 = jnp.maximum(ey2 - mu6 * mu6, 0.0)
    a6 = params["g6"] * jax.lax.rsqrt(var6 + EPS)
    nd6_t = jnp.transpose(nd3 * a6[None, :])               # (C, K), bn_6 folded
    sh6 = (params["be6"] - mu6 * a6)[:, None]              # (C, 1)

    # ---- pass 3: apply (fully parallel) -------------------------------------
    y3 = pl.pallas_call(
        _apply_kernel,
        grid=grid,
        in_specs=[x_spec, _const((K, C)), _const((K, 1)),
                  _const((C, K)), _const((C, 1))],
        out_specs=pl.BlockSpec((None, C, ts), lambda n, s: (n, 0, s)),
        out_shape=jax.ShapeDtypeStruct((N, C, S_pad), x.dtype),
        compiler_params=par_cp,
    )(x3, nd3a, f_bias, nd6_t, sh6)
    if S_pad != S:
        y3 = y3[:, :, :S]
    return y3.reshape(N, C, T, H, W)


# --------------------------------------------------------------------------
# Pure-JAX reference mirroring the PyTorch module forward
# --------------------------------------------------------------------------
def _reference(x, nodes, params):
    N, C, T, H, W = x.shape
    M = N * T * H * W
    hp = jax.lax.Precision.HIGHEST
    xf = jnp.transpose(x, (0, 2, 3, 4, 1)).reshape(M, C)

    def bn(a, g, b, axis):
        mu = a.mean(axis, keepdims=True)
        var = ((a - mu) ** 2).mean(axis, keepdims=True)
        return (a - mu) / jnp.sqrt(var + EPS) * g + b

    xf = bn(xf, params["g1"], params["be1"], 0)
    nd = bn(nodes, params["g2"], params["be2"], 0)
    nd = jnp.dot(nd, params["w_t"], precision=hp) + params["b"]
    nd3 = bn(nd, params["g3"][:, None], params["be3"][:, None], 1)
    f = jnp.dot(xf, nd3.T, precision=hp)                   # (M, K)
    alpha = (jax.nn.sigmoid(f) > 0.5).astype(jnp.float32)
    y = jnp.dot(alpha, nd3, precision=hp)                  # (M, C)
    y = bn(y, params["g6"], params["be6"], 0)
    y = jnp.where(y > 0, y, NEG_SLOPE * y)
    y = jnp.transpose(y.reshape(N, T, H, W, C), (0, 4, 1, 2, 3))
    return y, f


if __name__ == "__main__":
    # Small but TPU-friendly shapes: lane axis comes from T*H*W, so C/K are free.
    N, C, T, H, W = 2, 128, 4, 15, 16        # S = 960 (exercises padded tiles)
    K = 128

    key = jax.random.PRNGKey(0)
    kx, kn, kw, kb = jax.random.split(key, 4)
    x = jax.random.normal(kx, (N, C, T, H, W), dtype=jnp.float32)
    nodes = jax.random.normal(kn, (K, C), dtype=jnp.float32)

    bound = 1.0 / (C ** 0.5)
    params = {
        "w_t": jax.random.uniform(kw, (C, C), jnp.float32, -bound, bound),  # W^T
        "b": jax.random.uniform(kb, (C,), jnp.float32, -bound, bound),
        "g1": jnp.ones((C,), jnp.float32), "be1": jnp.zeros((C,), jnp.float32),
        "g2": jnp.ones((C,), jnp.float32), "be2": jnp.zeros((C,), jnp.float32),
        "g3": jnp.ones((K,), jnp.float32), "be3": jnp.zeros((K,), jnp.float32),
        "g6": jnp.ones((C,), jnp.float32), "be6": jnp.zeros((C,), jnp.float32),
    }

    fwd = jax.jit(node_attention_forward, static_argnames=("tile_s",))
    y = jax.block_until_ready(fwd(x, nodes, params, tile_s=256))

    y_exp, f_exp = _reference(x, nodes, params)
    assert y.shape == (N, C, T, H, W)
    assert bool(jnp.all(jnp.isfinite(y)))

    # Flip-tolerant comparison: rows whose hard-threshold decision is
    # numerically borderline (|f| ~ 0) may legitimately differ between two
    # f32 evaluation orders; exclude them (they must stay a tiny fraction).
    yk = jnp.transpose(y, (0, 2, 3, 4, 1)).reshape(-1, C)
    yr = jnp.transpose(y_exp, (0, 2, 3, 4, 1)).reshape(-1, C)
    row_err = jnp.max(jnp.abs(yk - yr), axis=1)
    borderline = jnp.min(jnp.abs(f_exp), axis=1) < 1e-3
    n_border = int(jnp.sum(borderline))
    n_rows = int(f_exp.shape[0])
    assert n_border < max(4, n_rows // 20), n_border
    tol = 2e-3 if n_border == 0 else 1e-2
    ok_rows = jnp.where(borderline, True, row_err <= tol)
    assert bool(jnp.all(ok_rows)), float(
        jnp.max(jnp.where(borderline, 0.0, row_err)))

    print("KERNEL_OK")
</pallas_src>

<mosaic_0001>
module attributes {stable_mosaic.version = 11 : i64} {
  func.func @_x_stats_kernel(%arg0: i32, %arg1: i32, %arg2: memref<1x128x256xf32, #tpu.memory_space<vmem>>, %arg3: memref<1x128x1xf32, #tpu.memory_space<vmem>>, %arg4: memref<1x128x1xf32, #tpu.memory_space<vmem>>) attributes {dimension_semantics = [#tpu.dimension_semantics<parallel>, #tpu.dimension_semantics<arbitrary>], iteration_bounds = array<i64: 2, 4>, scalar_prefetch = 0 : i64, scratch_operands = 0 : i64, tpu.core_type = #tpu.core_type<tc>, window_params = [{transform_indices = @transform_0, window_bounds = array<i64: 1, 128, 256>}, {transform_indices = @transform_1, window_bounds = array<i64: 1, 128, 1>}, {transform_indices = @transform_2, window_bounds = array<i64: 1, 128, 1>}]} {
    %c0_i32 = arith.constant 0 : i32
    %0 = arith.cmpi eq, %arg1, %c0_i32 : i32
    %1 = arith.extui %0 : i1 to i32
    %c0_i32_0 = arith.constant 0 : i32
    %2 = arith.cmpi ne, %1, %c0_i32_0 : i32
    scf.if %2 {
      %cst_16 = arith.constant 0.000000e+00 : f32
      %22 = vector.broadcast %cst_16 : f32 to vector<128x1xf32>
      %c0_17 = arith.constant 0 : index
      %c0_18 = arith.constant 0 : index
      %c0_19 = arith.constant 0 : index
      %23 = vector.load %arg3[%c0_17, %c0_18, %c0_19] : memref<1x128x1xf32, #tpu.memory_space<vmem>>, vector<1x128x1xf32>
      %24 = vector.shape_cast %23 : vector<1x128x1xf32> to vector<128x1xf32>
      %25 = vector.shape_cast %22 : vector<128x1xf32> to vector<1x128x1xf32>
      tpu.vector_store %arg3[%c0_17, %c0_18, %c0_19], %25 {strides = array<i32>} : memref<1x128x1xf32, #tpu.memory_space<vmem>>, vector<1x128x1xf32>,
      %cst_20 = arith.constant 0.000000e+00 : f32
      %26 = vector.broadcast %cst_20 : f32 to vector<128x1xf32>
      %c0_21 = arith.constant 0 : index
      %c0_22 = arith.constant 0 : index
      %c0_23 = arith.constant 0 : index
      %27 = vector.load %arg4[%c0_21, %c0_22, %c0_23] : memref<1x128x1xf32, #tpu.memory_space<vmem>>, vector<1x128x1xf32>
      %28 = vector.shape_cast %27 : vector<1x128x1xf32> to vector<128x1xf32>
      %29 = vector.shape_cast %26 : vector<128x1xf32> to vector<1x128x1xf32>
      tpu.vector_store %arg4[%c0_21, %c0_22, %c0_23], %29 {strides = array<i32>} : memref<1x128x1xf32, #tpu.memory_space<vmem>>, vector<1x128x1xf32>,
    } else {
    }
    %c0 = arith.constant 0 : index
    %c0_1 = arith.constant 0 : index
    %c0_2 = arith.constant 0 : index
    %3 = vector.load %arg2[%c0, %c0_1, %c0_2] : memref<1x128x256xf32, #tpu.memory_space<vmem>>, vector<1x128x256xf32>
    %4 = vector.shape_cast %3 : vector<1x128x256xf32> to vector<128x256xf32>
    %c0_3 = arith.constant 0 : index
    %c0_4 = arith.constant 0 : index
    %c0_5 = arith.constant 0 : index
    %5 = vector.load %arg3[%c0_3, %c0_4, %c0_5] : memref<1x128x1xf32, #tpu.memory_space<vmem>>, vector<1x128x1xf32>
    %6 = vector.shape_cast %5 : vector<1x128x1xf32> to vector<128x1xf32>
    %cst = arith.constant dense<0.000000e+00> : vector<128xf32>
    %7 = vector.multi_reduction <add>, %4, %cst [1] : vector<128x256xf32> to vector<128xf32>
    %8 = vector.shape_cast %7 : vector<128xf32> to vector<128x1xf32>
    %9 = arith.addf %6, %8 : vector<128x1xf32>
    %c0_6 = arith.constant 0 : index
    %c0_7 = arith.constant 0 : index
    %c0_8 = arith.constant 0 : index
    %10 = vector.load %arg3[%c0_6, %c0_7, %c0_8] : memref<1x128x1xf32, #tpu.memory_space<vmem>>, vector<1x128x1xf32>
    %11 = vector.shape_cast %10 : vector<1x128x1xf32> to vector<128x1xf32>
    %12 = vector.shape_cast %9 : vector<128x1xf32> to vector<1x128x1xf32>
    tpu.vector_store %arg3[%c0_6, %c0_7, %c0_8], %12 {strides = array<i32>} : memref<1x128x1xf32, #tpu.memory_space<vmem>>, vector<1x128x1xf32>,
    %c0_9 = arith.constant 0 : index
    %c0_10 = arith.constant 0 : index
    %c0_11 = arith.constant 0 : index
    %13 = vector.load %arg4[%c0_9, %c0_10, %c0_11] : memref<1x128x1xf32, #tpu.memory_space<vmem>>, vector<1x128x1xf32>
    %14 = vector.shape_cast %13 : vector<1x128x1xf32> to vector<128x1xf32>
    %15 = arith.mulf %4, %4 : vector<128x256xf32>
    %cst_12 = arith.constant dense<0.000000e+00> : vector<128xf32>
    %16 = vector.multi_reduction <add>, %15, %cst_12 [1] : vector<128x256xf32> to vector<128xf32>
    %17 = vector.shape_cast %16 : vector<128xf32> to vector<128x1xf32>
    %18 = arith.addf %14, %17 : vector<128x1xf32>
    %c0_13 = arith.constant 0 : index
    %c0_14 = arith.constant 0 : index
    %c0_15 = arith.constant 0 : index
    %19 = vector.load %arg4[%c0_13, %c0_14, %c0_15] : memref<1x128x1xf32, #tpu.memory_space<vmem>>, vector<1x128x1xf32>
    %20 = vector.shape_cast %19 : vector<1x128x1xf32> to vector<128x1xf32>
    %21 = vector.shape_cast %18 : vector<128x1xf32> to vector<1x128x1xf32>
    tpu.vector_store %arg4[%c0_13, %c0_14, %c0_15], %21 {strides = array<i32>} : memref<1x128x1xf32, #tpu.memory_space<vmem>>, vector<1x128x1xf32>,
    return
  }
  func.func @transform_0(%arg0: i32, %arg1: i32) -> (i32, i32, i32) {
    %c0_i32 = arith.constant 0 : i32
    %c0_i32_0 = arith.constant 0 : i32
    return %arg0, %c0_i32, %arg1 : i32, i32, i32
  }
  func.func @transform_1(%arg0: i32, %arg1: i32) -> (i32, i32, i32) {
    %c0_i32 = arith.constant 0 : i32
    %c0_i32_0 = arith.constant 0 : i32
    %c0_i32_1 = arith.constant 0 : i32
    return %arg0, %c0_i32, %c0_i32_0 : i32, i32, i32
  }
  func.func @transform_2(%arg0: i32, %arg1: i32) -> (i32, i32, i32) {
    %c0_i32 = arith.constant 0 : i32
    %c0_i32_0 = arith.constant 0 : i32
    %c0_i32_1 = arith.constant 0 : i32
    return %arg0, %c0_i32, %c0_i32_0 : i32, i32, i32
  }
}

module attributes {stable_mosaic.version = 11 : i64} {
  func.func @_alpha_stats_kernel(%arg0: i32, %arg1: i32, %arg2: memref<1x128x256xf32, #tpu.memory_space<vmem>>, %arg3: memref<128x128xf32, #tpu.memory_space<vmem>>, %arg4: memref<128x1xf32, #tpu.memory_space<vmem>>, %arg5: memref<1x128x1xf32, #tpu.memory_space<vmem>>, %arg6: memref<1x128x128xf32, #tpu.memory_space<vmem>>) attributes {dimension_semantics = [#tpu.dimension_semantics<parallel>, #tpu.dimension_semantics<arbitrary>], iteration_bounds = array<i64: 2, 4>, scalar_prefetch = 0 : i64, scratch_operands = 0 : i64, tpu.core_type = #tpu.core_type<tc>, window_params = [{transform_indices = @transform_0, window_bounds = array<i64: 1, 128, 256>}, {pipeline_mode = #tpu.pipeline_mode<synchronous>, transform_indices = @transform_1, window_bounds = array<i64: 128, 128>}, {pipeline_mode = #tpu.pipeline_mode<synchronous>, transform_indices = @transform_2, window_bounds = array<i64: 128, 1>}, {transform_indices = @transform_3, window_bounds = array<i64: 1, 128, 1>}, {transform_indices = @transform_4, window_bounds = array<i64: 1, 128, 128>}]} {
    %c0_i32 = arith.constant 0 : i32
    %0 = arith.cmpi eq, %arg1, %c0_i32 : i32
    %1 = arith.extui %0 : i1 to i32
    %c0_i32_0 = arith.constant 0 : i32
    %2 = arith.cmpi ne, %1, %c0_i32_0 : i32
    scf.if %2 {
      %cst_23 = arith.constant 0.000000e+00 : f32
      %40 = vector.broadcast %cst_23 : f32 to vector<128x1xf32>
      %c0_24 = arith.constant 0 : index
      %c0_25 = arith.constant 0 : index
      %c0_26 = arith.constant 0 : index
      %41 = vector.load %arg5[%c0_24, %c0_25, %c0_26] : memref<1x128x1xf32, #tpu.memory_space<vmem>>, vector<1x128x1xf32>
      %42 = vector.shape_cast %41 : vector<1x128x1xf32> to vector<128x1xf32>
      %43 = vector.shape_cast %40 : vector<128x1xf32> to vector<1x128x1xf32>
      tpu.vector_store %arg5[%c0_24, %c0_25, %c0_26], %43 {strides = array<i32>} : memref<1x128x1xf32, #tpu.memory_space<vmem>>, vector<1x128x1xf32>,
      %cst_27 = arith.constant 0.000000e+00 : f32
      %44 = vector.broadcast %cst_27 : f32 to vector<128x128xf32>
      %c0_28 = arith.constant 0 : index
      %c0_29 = arith.constant 0 : index
      %c0_30 = arith.constant 0 : index
      %45 = vector.load %arg6[%c0_28, %c0_29, %c0_30] : memref<1x128x128xf32, #tpu.memory_space<vmem>>, vector<1x128x128xf32>
      %46 = vector.shape_cast %45 : vector<1x128x128xf32> to vector<128x128xf32>
      %47 = vector.shape_cast %44 : vector<128x128xf32> to vector<1x128x128xf32>
      tpu.vector_store %arg6[%c0_28, %c0_29, %c0_30], %47 {strides = array<i32>} : memref<1x128x128xf32, #tpu.memory_space<vmem>>, vector<1x128x128xf32>,
    } else {
    }
    %c0 = arith.constant 0 : index
    %c0_1 = arith.constant 0 : index
    %c0_2 = arith.constant 0 : index
    %3 = vector.load %arg2[%c0, %c0_1, %c0_2] : memref<1x128x256xf32, #tpu.memory_space<vmem>>, vector<1x128x256xf32>
    %4 = vector.shape_cast %3 : vector<1x128x256xf32> to vector<128x256xf32>
    %c0_3 = arith.constant 0 : index
    %c0_4 = arith.constant 0 : index
    %5 = vector.load %arg3[%c0_3, %c0_4] : memref<128x128xf32, #tpu.memory_space<vmem>>, vector<128x128xf32>
    %cst = arith.constant dense<0.000000e+00> : vector<128x256xf32>
    %6 = tpu.matmul %5, %4, %cst {dimension_numbers = #tpu.dot_dimension_numbers<[1], [0], [0], [1], [0, 0, 1, 1], [], []>} : vector<128x128xf32>, vector<128x256xf32>, vector<128x256xf32> -> vector<128x256xf32>
    %c0_5 = arith.constant 0 : index
    %c0_6 = arith.constant 0 : index
    %7 = vector.load %arg4[%c0_5, %c0_6] : memref<128x1xf32, #tpu.memory_space<vmem>>, vector<128x1xf32>
    %8 = vector.broadcast %7 : vector<128x1xf32> to vector<128x256xf32>
    %9 = arith.addf %6, %8 : vector<128x256xf32>
    %cst_7 = arith.constant 0.000000e+00 : f32
    %10 = vector.broadcast %cst_7 : f32 to vector<128x256xf32>
    %11 = arith.cmpf ogt, %9, %10 : vector<128x256xf32>
    %12 = arith.extui %11 : vector<128x256xi1> to vector<128x256xi32>
    %13 = arith.sitofp %12 : vector<128x256xi32> to vector<128x256xf32>
    %c256_i32 = arith.constant 256 : i32
    %14 = arith.muli %arg1, %c256_i32 : i32
    %15 = tpu.iota {dimensions = array<i32: 1>} : vector<1x256xi32>
    %16 = vector.broadcast %14 : i32 to vector<1x256xi32>
    %17 = arith.addi %16, %15 : vector<1x256xi32>
    %c960_i32 = arith.constant 960 : i32
    %18 = vector.broadcast %c960_i32 : i32 to vector<1x256xi32>
    %19 = arith.cmpi slt, %17, %18 : vector<1x256xi32>
    %cst_8 = arith.constant 0.000000e+00 : f32
    %20 = vector.shape_cast %19 : vector<1x256xi1> to vector<1x256xi1>
    %21 = vector.broadcast %20 : vector<1x256xi1> to vector<128x256xi1>
    %22 = vector.broadcast %cst_8 : f32 to vector<128x256xf32>
    %23 = arith.select %21, %13, %22 : vector<128x256xi1>, vector<128x256xf32>
    %c0_9 = arith.constant 0 : index
    %c0_10 = arith.constant 0 : index
    %c0_11 = arith.constant 0 : index
    %24 = vector.load %arg5[%c0_9, %c0_10, %c0_11] : memref<1x128x1xf32, #tpu.memory_space<vmem>>, vector<1x128x1xf32>
    %25 = vector.shape_cast %24 : vector<1x128x1xf32> to vector<128x1xf32>
    %cst_12 = arith.constant dense<0.000000e+00> : vector<128xf32>
    %26 = vector.multi_reduction <add>, %23, %cst_12 [1] : vector<128x256xf32> to vector<128xf32>
    %27 = vector.shape_cast %26 : vector<128xf32> to vector<128x1xf32>
    %28 = arith.addf %25, %27 : vector<128x1xf32>
    %c0_13 = arith.constant 0 : index
    %c0_14 = arith.constant 0 : index
    %c0_15 = arith.constant 0 : index
    %29 = vector.load %arg5[%c0_13, %c0_14, %c0_15] : memref<1x128x1xf32, #tpu.memory_space<vmem>>, vector<1x128x1xf32>
    %30 = vector.shape_cast %29 : vector<1x128x1xf32> to vector<128x1xf32>
    %31 = vector.shape_cast %28 : vector<128x1xf32> to vector<1x128x1xf32>
    tpu.vector_store %arg5[%c0_13, %c0_14, %c0_15], %31 {strides = array<i32>} : memref<1x128x1xf32, #tpu.memory_space<vmem>>, vector<1x128x1xf32>,
    %32 = arith.truncf %23 : vector<128x256xf32> to vector<128x256xbf16>
    %c0_16 = arith.constant 0 : index
    %c0_17 = arith.constant 0 : index
    %c0_18 = arith.constant 0 : index
    %33 = vector.load %arg6[%c0_16, %c0_17, %c0_18] : memref<1x128x128xf32, #tpu.memory_space<vmem>>, vector<1x128x128xf32>
    %34 = vector.shape_cast %33 : vector<1x128x128xf32> to vector<128x128xf32>
    %cst_19 = arith.constant dense<0.000000e+00> : vector<128x128xf32>
    %35 = tpu.matmul %32, %32, %cst_19 {dimension_numbers = #tpu.dot_dimension_numbers<[1], [1], [0], [0], [0, 0, 1, 0], [], []>} : vector<128x256xbf16>, vector<128x256xbf16>, vector<128x128xf32> -> vector<128x128xf32>
    %36 = arith.addf %34, %35 : vector<128x128xf32>
    %c0_20 = arith.constant 0 : index
    %c0_21 = arith.constant 0 : index
    %c0_22 = arith.constant 0 : index
    %37 = vector.load %arg6[%c0_20, %c0_21, %c0_22] : memref<1x128x128xf32, #tpu.memory_space<vmem>>, vector<1x128x128xf32>
    %38 = vector.shape_cast %37 : vector<1x128x128xf32> to vector<128x128xf32>
    %39 = vector.shape_cast %36 : vector<128x128xf32> to vector<1x128x128xf32>
    tpu.vector_store %arg6[%c0_20, %c0_21, %c0_22], %39 {strides = array<i32>} : memref<1x128x128xf32, #tpu.memory_space<vmem>>, vector<1x128x128xf32>,
    return
  }
  func.func @transform_0(%arg0: i32, %arg1: i32) -> (i32, i32, i32) {
    %c0_i32 = arith.constant 0 : i32
    %c0_i32_0 = arith.constant 0 : i32
    return %arg0, %c0_i32, %arg1 : i32, i32, i32
  }
  func.func @transform_1(%arg0: i32, %arg1: i32) -> (i32, i32) {
    %c0_i32 = arith.constant 0 : i32
    %c0_i32_0 = arith.constant 0 : i32
    %c0_i32_1 = arith.constant 0 : i32
    return %c0_i32, %c0_i32_0 : i32, i32
  }
  func.func @transform_2(%arg0: i32, %arg1: i32) -> (i32, i32) {
    %c0_i32 = arith.constant 0 : i32
    %c0_i32_0 = arith.constant 0 : i32
    %c0_i32_1 = arith.constant 0 : i32
    return %c0_i32, %c0_i32_0 : i32, i32
  }
  func.func @transform_3(%arg0: i32, %arg1: i32) -> (i32, i32, i32) {
    %c0_i32 = arith.constant 0 : i32
    %c0_i32_0 = arith.constant 0 : i32
    %c0_i32_1 = arith.constant 0 : i32
    return %arg0, %c0_i32, %c0_i32_0 : i32, i32, i32
  }
  func.func @transform_4(%arg0: i32, %arg1: i32) -> (i32, i32, i32) {
    %c0_i32 = arith.constant 0 : i32
    %c0_i32_0 = arith.constant 0 : i32
    %c0_i32_1 = arith.constant 0 : i32
    return %arg0, %c0_i32, %c0_i32_0 : i32, i32, i32
  }
}

module attributes {stable_mosaic.version = 11 : i64} {
  func.func @_apply_kernel(%arg0: i32, %arg1: i32, %arg2: memref<1x128x256xf32, #tpu.memory_space<vmem>>, %arg3: memref<128x128xf32, #tpu.memory_space<vmem>>, %arg4: memref<128x1xf32, #tpu.memory_space<vmem>>, %arg5: memref<128x128xf32, #tpu.memory_space<vmem>>, %arg6: memref<128x1xf32, #tpu.memory_space<vmem>>, %arg7: memref<1x128x256xf32, #tpu.memory_space<vmem>>) attributes {dimension_semantics = [#tpu.dimension_semantics<parallel>, #tpu.dimension_semantics<parallel>], iteration_bounds = array<i64: 2, 4>, scalar_prefetch = 0 : i64, scratch_operands = 0 : i64, tpu.core_type = #tpu.core_type<tc>, window_params = [{transform_indices = @transform_0, window_bounds = array<i64: 1, 128, 256>}, {pipeline_mode = #tpu.pipeline_mode<synchronous>, transform_indices = @transform_1, window_bounds = array<i64: 128, 128>}, {pipeline_mode = #tpu.pipeline_mode<synchronous>, transform_indices = @transform_2, window_bounds = array<i64: 128, 1>}, {pipeline_mode = #tpu.pipeline_mode<synchronous>, transform_indices = @transform_3, window_bounds = array<i64: 128, 128>}, {pipeline_mode = #tpu.pipeline_mode<synchronous>, transform_indices = @transform_4, window_bounds = array<i64: 128, 1>}, {transform_indices = @transform_5, window_bounds = array<i64: 1, 128, 256>}]} {
    %c0 = arith.constant 0 : index
    %c0_0 = arith.constant 0 : index
    %c0_1 = arith.constant 0 : index
    %0 = vector.load %arg2[%c0, %c0_0, %c0_1] : memref<1x128x256xf32, #tpu.memory_space<vmem>>, vector<1x128x256xf32>
    %1 = vector.shape_cast %0 : vector<1x128x256xf32> to vector<128x256xf32>
    %c0_2 = arith.constant 0 : index
    %c0_3 = arith.constant 0 : index
    %2 = vector.load %arg3[%c0_2, %c0_3] : memref<128x128xf32, #tpu.memory_space<vmem>>, vector<128x128xf32>
    %cst = arith.constant dense<0.000000e+00> : vector<128x256xf32>
    %3 = tpu.matmul %2, %1, %cst {dimension_numbers = #tpu.dot_dimension_numbers<[1], [0], [0], [1], [0, 0, 1, 1], [], []>} : vector<128x128xf32>, vector<128x256xf32>, vector<128x256xf32> -> vector<128x256xf32>
    %c0_4 = arith.constant 0 : index
    %c0_5 = arith.constant 0 : index
    %4 = vector.load %arg4[%c0_4, %c0_5] : memref<128x1xf32, #tpu.memory_space<vmem>>, vector<128x1xf32>
    %5 = vector.broadcast %4 : vector<128x1xf32> to vector<128x256xf32>
    %6 = arith.addf %3, %5 : vector<128x256xf32>
    %cst_6 = arith.constant 0.000000e+00 : f32
    %7 = vector.broadcast %cst_6 : f32 to vector<128x256xf32>
    %8 = arith.cmpf ogt, %6, %7 : vector<128x256xf32>
    %9 = arith.extui %8 : vector<128x256xi1> to vector<128x256xi32>
    %10 = arith.sitofp %9 : vector<128x256xi32> to vector<128x256xf32>
    %c0_7 = arith.constant 0 : index
    %c0_8 = arith.constant 0 : index
    %11 = vector.load %arg5[%c0_7, %c0_8] : memref<128x128xf32, #tpu.memory_space<vmem>>, vector<128x128xf32>
    %cst_9 = arith.constant dense<0.000000e+00> : vector<128x256xf32>
    %12 = tpu.matmul %11, %10, %cst_9 {dimension_numbers = #tpu.dot_dimension_numbers<[1], [0], [0], [1], [0, 0, 1, 1], [], []>} : vector<128x128xf32>, vector<128x256xf32>, vector<128x256xf32> -> vector<128x256xf32>
    %c0_10 = arith.constant 0 : index
    %c0_11 = arith.constant 0 : index
    %13 = vector.load %arg6[%c0_10, %c0_11] : memref<128x1xf32, #tpu.memory_space<vmem>>, vector<128x1xf32>
    %14 = vector.broadcast %13 : vector<128x1xf32> to vector<128x256xf32>
    %15 = arith.addf %12, %14 : vector<128x256xf32>
    %cst_12 = arith.constant 0.000000e+00 : f32
    %16 = vector.broadcast %cst_12 : f32 to vector<128x256xf32>
    %17 = arith.cmpf ogt, %15, %16 : vector<128x256xf32>
    %cst_13 = arith.constant 2.000000e-01 : f32
    %18 = vector.broadcast %cst_13 : f32 to vector<128x256xf32>
    %19 = arith.mulf %18, %15 : vector<128x256xf32>
    %20 = arith.select %17, %15, %19 : vector<128x256xi1>, vector<128x256xf32>
    %c0_14 = arith.constant 0 : index
    %c0_15 = arith.constant 0 : index
    %c0_16 = arith.constant 0 : index
    %21 = vector.load %arg7[%c0_14, %c0_15, %c0_16] : memref<1x128x256xf32, #tpu.memory_space<vmem>>, vector<1x128x256xf32>
    %22 = vector.shape_cast %21 : vector<1x128x256xf32> to vector<128x256xf32>
    %23 = vector.shape_cast %20 : vector<128x256xf32> to vector<1x128x256xf32>
    tpu.vector_store %arg7[%c0_14, %c0_15, %c0_16], %23 {strides = array<i32>} : memref<1x128x256xf32, #tpu.memory_space<vmem>>, vector<1x128x256xf32>,
    return
  }
  func.func @transform_0(%arg0: i32, %arg1: i32) -> (i32, i32, i32) {
    %c0_i32 = arith.constant 0 : i32
    %c0_i32_0 = arith.constant 0 : i32
    return %arg0, %c0_i32, %arg1 : i32, i32, i32
  }
  func.func @transform_1(%arg0: i32, %arg1: i32) -> (i32, i32) {
    %c0_i32 = arith.constant 0 : i32
    %c0_i32_0 = arith.constant 0 : i32
    %c0_i32_1 = arith.constant 0 : i32
    return %c0_i32, %c0_i32_0 : i32, i32
  }
  func.func @transform_2(%arg0: i32, %arg1: i32) -> (i32, i32) {
    %c0_i32 = arith.constant 0 : i32
    %c0_i32_0 = arith.constant 0 : i32
    %c0_i32_1 = arith.constant 0 : i32
    return %c0_i32, %c0_i32_0 : i32, i32
  }
  func.func @transform_3(%arg0: i32, %arg1: i32) -> (i32, i32) {
    %c0_i32 = arith.constant 0 : i32
    %c0_i32_0 = arith.constant 0 : i32
    %c0_i32_1 = arith.constant 0 : i32
    return %c0_i32, %c0_i32_0 : i32, i32
  }
  func.func @transform_4(%arg0: i32, %arg1: i32) -> (i32, i32) {
    %c0_i32 = arith.constant 0 : i32
    %c0_i32_0 = arith.constant 0 : i32
    %c0_i32_1 = arith.constant 0 : i32
    return %c0_i32, %c0_i32_0 : i32, i32
  }
  func.func @transform_5(%arg0: i32, %arg1: i32) -> (i32, i32, i32) {
    %c0_i32 = arith.constant 0 : i32
    %c0_i32_0 = arith.constant 0 : i32
    return %arg0, %c0_i32, %arg1 : i32, i32, i32
  }
}

</mosaic_0001>

<bundles_post_ra>
// kernel: node_attention_forward.3
= control target key start
LH: loop header
LB: loop body
LE: loop exit
PB: predicated region body
PF: predicated region fallthrough
CT: control target
= control target key end

     0   :  { %s806_s9 = smov 0   ;;  %s808_s10 = smov 0   ;;  %s1245_s0 = inlined_call_operand.vmem [shape: f32[2,128,1024], index: 0, kind: input, shape index: {}]   ;;  %s1246_s1 = inlined_call_operand.vmem [shape: f32[2,128,1], index: 1, kind: output, shape index: {0}]   ;;  %s1247_s2 = inlined_call_operand.vmem [shape: f32[2,128,1], index: 2, kind: output, shape index: {1}]  }
   0x1   :  { %s810_s11 = smov 0   ;;  %s812_s12 = smov 0  }
   0x2   :  { %s814_s13 = smov 0   ;;  %s816_s14 = smov 0  }
   0x3   :  { %s818_s15 = smov 0  }
   0x4 LB: > { %s22_s16 = sadd.s32 1, %s780_s13  ;;  %s25_s17 = sadd.s32 1, %s784_s14  ;;  %s788_s15 = sphi %s818_s15, %s13_s15   ;;  %s784_s14 = sphi %s816_s14, %s1253_s14   ;;  %s780_s13 = sphi %s814_s13, %s1252_s13   ;;  %s776_s12 = sphi %s812_s12, %s1251_s12   ;;  %s772_s11 = sphi %s810_s11, %s1250_s11   ;;  %s768_s10 = sphi %s808_s10, %s1249_s10   ;;  %s764_s9 = sphi %s806_s9, %s1248_s9  }
   0x5   : > { %p23_p0 = scmp.ge.s32.totalorder %s22_s16, 4  ;;  %p41_p1 = scmp.ne.s32.totalorder %s768_s10, %s764_s9 }
   0x6   : > { %p42_p2 = scmp.eq.s32.totalorder %s788_s15, 0  ;;  %s34_s21 = sadd.s32 1, %s768_s10 }
   0x7   : > { %s1255_s16 = smov (%p23_p0, %s22_s16), 0  ;;  %s1257_s17 = smov (!%p23_p0, %s25_s17), %s784_s14 }
   0x8   : > { %p43_p3 = por %p42_p2, %p41_p1  ;;  %p27_p4 = scmp.ge.s32.totalorder %s1257_s17, 2 }
   0x9   : > { %s30_s18 = ssub.s32 %s780_s13, %s1255_s16  ;;  %p661_p6 = scmp.ge.s32.totalorder %s788_s15, 8 }
   0xa   : > { %s1259_s17 = smov (%p27_p4, %s1257_s17), 0 }
   0xb   : > { %s29_s19 = ssub.s32 %s784_s14, %s1259_s17  ;;  %119 = sbr.rel (%p661_p6) target bundleno = 39 (0x27), region = 16 }
   0xc   : > { %s31_s20 = sor.u32 %s30_s18, %s29_s19 }
   0xd   : > { %p32_p5 = scmp.eq.s32.totalorder %s31_s20, 0 }
   0xf   : > { %s857_s22 = scalar_select %p32_p5, %s768_s10, %s34_s21  }
  0x10   : > { %122 = sbr.rel (!%p43_p3) target bundleno = 39 (0x27), region = 20  ;;  %s124_s23 = sand.u32 (%p43_p3), 1, %s768_s10  }
  0x11   : > { %s663_s24 = sshll.u32 (%p43_p3), %s780_s13, 1  ;;  %s662_s25 = sshll.u32 (%p43_p3), %s124_s23, 8 }
  0x12   : > { %s664_s26 = sshll.u32 (%p43_p3), %s784_s14, 7  ;;  %s871_s4 = scalar_lea.vmem (%p43_p3), [#allocation2], %s662_s25 }
  0x13   : > { %s129_s27 = sadd.s32 (%p43_p3), %s664_s26, %s663_s24 }
  0x14   : > { %s665_s28 = sshll.u32 (%p43_p3), %s129_s27, 3 }
  0x15   : > { %s866_s3 = scalar_lea.vmem %s1245_s0, %s665_s28 }
  0x16   : > { %v144_v0 = vld [vmem:[%s866_s3] sm:$0xff]  ;;  %v146_v1 = vld [vmem:[%s866_s3 + $0x8] sm:$0xff] }
  0x17   : > { %v148_v2 = vld [vmem:[%s866_s3 + $0x40] sm:$0xff]  ;;  %145 = vst [vmem:[%s871_s4] sm:$0xff] %v144_v0  ;;  %147 = vst [vmem:[%s871_s4 + $0x8] sm:$0xff] %v146_v1  ;;  %v150_v3 = vld [vmem:[%s866_s3 + $0x48] sm:$0xff] }
  0x18   : > { %149 = vst [vmem:[%s871_s4 + $0x10] sm:$0xff] %v148_v2  ;;  %v152_v4 = vld [vmem:[%s866_s3 + $0x80] sm:$0xff]  ;;  %v154_v5 = vld [vmem:[%s866_s3 + $0x88] sm:$0xff]  ;;  %151 = vst [vmem:[%s871_s4 + $0x18] sm:$0xff] %v150_v3 }
  0x19   : > { %153 = vst [vmem:[%s871_s4 + $0x20] sm:$0xff] %v152_v4  ;;  %155 = vst [vmem:[%s871_s4 + $0x28] sm:$0xff] %v154_v5  ;;  %v156_v6 = vld [vmem:[%s866_s3 + $0xc0] sm:$0xff]  ;;  %v158_v7 = vld [vmem:[%s866_s3 + $0xc8] sm:$0xff] }
  0x1a   : > { %v160_v8 = vld [vmem:[%s866_s3 + $0x100] sm:$0xff]  ;;  %157 = vst [vmem:[%s871_s4 + $0x30] sm:$0xff] %v156_v6  ;;  %159 = vst [vmem:[%s871_s4 + $0x38] sm:$0xff] %v158_v7  ;;  %v162_v9 = vld [vmem:[%s866_s3 + $0x108] sm:$0xff] }
  0x1b   : > { %161 = vst [vmem:[%s871_s4 + $0x40] sm:$0xff] %v160_v8  ;;  %v164_v10 = vld [vmem:[%s866_s3 + $0x140] sm:$0xff]  ;;  %v166_v11 = vld [vmem:[%s866_s3 + $0x148] sm:$0xff]  ;;  %163 = vst [vmem:[%s871_s4 + $0x48] sm:$0xff] %v162_v9 }
  0x1c   : > { %165 = vst [vmem:[%s871_s4 + $0x50] sm:$0xff] %v164_v10  ;;  %167 = vst [vmem:[%s871_s4 + $0x58] sm:$0xff] %v166_v11  ;;  %v168_v12 = vld [vmem:[%s866_s3 + $0x180] sm:$0xff]  ;;  %v170_v13 = vld [vmem:[%s866_s3 + $0x188] sm:$0xff] }
  0x1d   : > { %v172_v14 = vld [vmem:[%s866_s3 + $0x1c0] sm:$0xff]  ;;  %169 = vst [vmem:[%s871_s4 + $0x60] sm:$0xff] %v168_v12  ;;  %171 = vst [vmem:[%s871_s4 + $0x68] sm:$0xff] %v170_v13  ;;  %v174_v15 = vld [vmem:[%s866_s3 + $0x1c8] sm:$0xff] }
  0x1e   : > { %173 = vst [vmem:[%s871_s4 + $0x70] sm:$0xff] %v172_v14  ;;  %v176_v16 = vld [vmem:[%s866_s3 + $0x200] sm:$0xff]  ;;  %v178_v17 = vld [vmem:[%s866_s3 + $0x208] sm:$0xff]  ;;  %175 = vst [vmem:[%s871_s4 + $0x78] sm:$0xff] %v174_v15 }
  0x1f   : > { %177 = vst [vmem:[%s871_s4 + $0x80] sm:$0xff] %v176_v16  ;;  %179 = vst [vmem:[%s871_s4 + $0x88] sm:$0xff] %v178_v17  ;;  %v180_v18 = vld [vmem:[%s866_s3 + $0x240] sm:$0xff]  ;;  %v182_v19 = vld [vmem:[%s866_s3 + $0x248] sm:$0xff] }
  0x20   : > { %v184_v20 = vld [vmem:[%s866_s3 + $0x280] sm:$0xff]  ;;  %181 = vst [vmem:[%s871_s4 + $0x90] sm:$0xff] %v180_v18  ;;  %183 = vst [vmem:[%s871_s4 + $0x98] sm:$0xff] %v182_v19  ;;  %v186_v21 = vld [vmem:[%s866_s3 + $0x288] sm:$0xff] }
  0x21   : > { %185 = vst [vmem:[%s871_s4 + $0xa0] sm:$0xff] %v184_v20  ;;  %v188_v22 = vld [vmem:[%s866_s3 + $0x2c0] sm:$0xff]  ;;  %v190_v23 = vld [vmem:[%s866_s3 + $0x2c8] sm:$0xff]  ;;  %187 = vst [vmem:[%s871_s4 + $0xa8] sm:$0xff] %v186_v21 }
  0x22   : > { %189 = vst [vmem:[%s871_s4 + $0xb0] sm:$0xff] %v188_v22  ;;  %191 = vst [vmem:[%s871_s4 + $0xb8] sm:$0xff] %v190_v23  ;;  %v192_v24 = vld [vmem:[%s866_s3 + $0x300] sm:$0xff]  ;;  %v194_v25 = vld [vmem:[%s866_s3 + $0x308] sm:$0xff] }
  0x23   : > { %v196_v26 = vld [vmem:[%s866_s3 + $0x340] sm:$0xff]  ;;  %193 = vst [vmem:[%s871_s4 + $0xc0] sm:$0xff] %v192_v24  ;;  %195 = vst [vmem:[%s871_s4 + $0xc8] sm:$0xff] %v194_v25  ;;  %v198_v27 = vld [vmem:[%s866_s3 + $0x348] sm:$0xff] }
  0x24   : > { %197 = vst [vmem:[%s871_s4 + $0xd0] sm:$0xff] %v196_v26  ;;  %v200_v28 = vld [vmem:[%s866_s3 + $0x380] sm:$0xff]  ;;  %v202_v29 = vld [vmem:[%s866_s3 + $0x388] sm:$0xff]  ;;  %199 = vst [vmem:[%s871_s4 + $0xd8] sm:$0xff] %v198_v27 }
  0x25   : > { %201 = vst [vmem:[%s871_s4 + $0xe0] sm:$0xff] %v200_v28  ;;  %203 = vst [vmem:[%s871_s4 + $0xe8] sm:$0xff] %v202_v29  ;;  %v204_v30 = vld [vmem:[%s866_s3 + $0x3c0] sm:$0xff]  ;;  %v206_v31 = vld [vmem:[%s866_s3 + $0x3c8] sm:$0xff] }
  0x26   : > { %205 = vst [vmem:[%s871_s4 + $0xf0] sm:$0xff] %v204_v30  ;;  %207 = vst [vmem:[%s871_s4 + $0xf8] sm:$0xff] %v206_v31 }
  0x27 PF: > { %p666_p7 = scmp.ge.s32.totalorder %s788_s15, 1  ;;  %p212_p8 = scmp.lt.s32.totalorder %s788_s15, 9 }
  0x29   : > { %p213_p9 = pnand %p666_p7, %p212_p8 }
  0x2a   : > { %s219_s5 = sand.u32 (!%p213_p9), 1, %s764_s9   ;;  %p246_p10 = scmp.lt.s32.totalorder (!%p213_p9), %s776_s12, 1 }
  0x2b   : > { %216 = sbr.rel (%p213_p9) target bundleno = 275 (0x113), region = 43  ;;  %s667_s6 = sshll.u32 (!%p213_p9), %s219_s5, 8 }
  0x2c   : > { %s949_s24 = scalar_lea.vmem (!%p213_p9), [#allocation2], %s667_s6  ;;  %p672_p11 = scmp.ne.s32.totalorder (!%p213_p9), %s772_s11, 0 }
  0x30   : > { %s1261_s12 = smov (!%p246_p10, %s776_s12), 1  ;;  %259 = sbr.rel (%p672_p11) target bundleno = 70 (0x46), region = 51 }
  0x31   : > { %s675_s7 = sshll.u32 %s1261_s12, 7 }
  0x32   : > { %s942_s19 = scalar_lea.vmem %s1246_s1, %s675_s7  ;;  %s947_s23 = scalar_lea.vmem %s1247_s2, %s675_s7 }
  0x35   : > { %vm260_vm0 = vcmask 7168   ;;  %v790_v32 = vmov 0.0  }
  0x36   : > { %261 = vst.msk [vmem:[%s942_s19] sm:$0xff] %vm260_vm0, %v790_v32  ;;  %262 = vst.msk [vmem:[%s942_s19 + $0x8] sm:$0xff] %vm260_vm0, %v790_v32 }
  0x37   : > { %263 = vst.msk [vmem:[%s942_s19 + $0x10] sm:$0xff] %vm260_vm0, %v790_v32  ;;  %264 = vst.msk [vmem:[%s942_s19 + $0x18] sm:$0xff] %vm260_vm0, %v790_v32 }
  0x38   : > { %265 = vst.msk [vmem:[%s942_s19 + $0x20] sm:$0xff] %vm260_vm0, %v790_v32  ;;  %266 = vst.msk [vmem:[%s942_s19 + $0x28] sm:$0xff] %vm260_vm0, %v790_v32 }
  0x39   : > { %267 = vst.msk [vmem:[%s942_s19 + $0x30] sm:$0xff] %vm260_vm0, %v790_v32  ;;  %268 = vst.msk [vmem:[%s942_s19 + $0x38] sm:$0xff] %vm260_vm0, %v790_v32 }
  0x3a   : > { %269 = vst.msk [vmem:[%s942_s19 + $0x40] sm:$0xff] %vm260_vm0, %v790_v32  ;;  %270 = vst.msk [vmem:[%s942_s19 + $0x48] sm:$0xff] %vm260_vm0, %v790_v32 }
  0x3b   : > { %271 = vst.msk [vmem:[%s942_s19 + $0x50] sm:$0xff] %vm260_vm0, %v790_v32  ;;  %272 = vst.msk [vmem:[%s942_s19 + $0x58] sm:$0xff] %vm260_vm0, %v790_v32 }
  0x3c   : > { %273 = vst.msk [vmem:[%s942_s19 + $0x60] sm:$0xff] %vm260_vm0, %v790_v32  ;;  %274 = vst.msk [vmem:[%s942_s19 + $0x68] sm:$0xff] %vm260_vm0, %v790_v32 }
  0x3d   : > { %275 = vst.msk [vmem:[%s942_s19 + $0x70] sm:$0xff] %vm260_vm0, %v790_v32  ;;  %276 = vst.msk [vmem:[%s942_s19 + $0x78] sm:$0xff] %vm260_vm0, %v790_v32 }
  0x3e   : > { %277 = vst.msk [vmem:[%s947_s23] sm:$0xff] %vm260_vm0, %v790_v32  ;;  %278 = vst.msk [vmem:[%s947_s23 + $0x8] sm:$0xff] %vm260_vm0, %v790_v32 }
  0x3f   : > { %279 = vst.msk [vmem:[%s947_s23 + $0x10] sm:$0xff] %vm260_vm0, %v790_v32  ;;  %280 = vst.msk [vmem:[%s947_s23 + $0x18] sm:$0xff] %vm260_vm0, %v790_v32 }
  0x40   : > { %281 = vst.msk [vmem:[%s947_s23 + $0x20] sm:$0xff] %vm260_vm0, %v790_v32  ;;  %282 = vst.msk [vmem:[%s947_s23 + $0x28] sm:$0xff] %vm260_vm0, %v790_v32 }
  0x41   : > { %283 = vst.msk [vmem:[%s947_s23 + $0x30] sm:$0xff] %vm260_vm0, %v790_v32  ;;  %284 = vst.msk [vmem:[%s947_s23 + $0x38] sm:$0xff] %vm260_vm0, %v790_v32 }
  0x42   : > { %285 = vst.msk [vmem:[%s947_s23 + $0x40] sm:$0xff] %vm260_vm0, %v790_v32  ;;  %286 = vst.msk [vmem:[%s947_s23 + $0x48] sm:$0xff] %vm260_vm0, %v790_v32 }
  0x43   : > { %287 = vst.msk [vmem:[%s947_s23 + $0x50] sm:$0xff] %vm260_vm0, %v790_v32  ;;  %288 = vst.msk [vmem:[%s947_s23 + $0x58] sm:$0xff] %vm260_vm0, %v790_v32 }
  0x44   : > { %289 = vst.msk [vmem:[%s947_s23 + $0x60] sm:$0xff] %vm260_vm0, %v790_v32  ;;  %290 = vst.msk [vmem:[%s947_s23 + $0x68] sm:$0xff] %vm260_vm0, %v790_v32 }
  0x45   : > { %291 = vst.msk [vmem:[%s947_s23 + $0x70] sm:$0xff] %vm260_vm0, %v790_v32  ;;  %292 = vst.msk [vmem:[%s947_s23 + $0x78] sm:$0xff] %vm260_vm0, %v790_v32 }
  0x46 PF: > { %v1017_v33 = vld [vmem:[%s949_s24 + $0x20] sm:$0xff]  ;;  %v1020_v34 = vld [vmem:[%s949_s24 + $0x28] sm:$0xff]  ;;  %v1027_v38 = vld [vmem:[%s949_s24 + $0x30] sm:$0xff]  ;;  %vm405_vm1 = vcmask 7168  }
  0x47   : > { %v293_v35 = vld [vmem:[%s949_s24] sm:$0xff]  ;;  %v347_v36 = vadd.f32 %v1020_v34, %v1017_v33  ;;  %v294_v37 = vld [vmem:[%s949_s24 + $0x8] sm:$0xff]  ;;  %v1030_v39 = vld [vmem:[%s949_s24 + $0x38] sm:$0xff]  ;;  %v444_v22 = vmul.f32 %v1027_v38, %v1027_v38  ;;  %v442_v24 = vmul.f32 %v1017_v33, %v1017_v33  ;;  %v443_v25 = vmul.f32 %v1020_v34, %v1020_v34 }
  0x48   : > { %v341_v40 = vadd.f32 %v294_v37, %v293_v35  ;;  %v295_v41 = vld [vmem:[%s949_s24 + $0x10] sm:$0xff]  ;;  %v296_v42 = vld [vmem:[%s949_s24 + $0x18] sm:$0xff]  ;;  %v350_v43 = vadd.f32 %v1030_v39, %v1027_v38  ;;  %v1039_v47 = vld [vmem:[%s949_s24 + $0x40] sm:$0xff]  ;;  %v438_v18 = vmul.f32 %v293_v35, %v293_v35  ;;  %v439_v19 = vmul.f32 %v294_v37, %v294_v37 }
  0x49   : > { %348 = vadd.xlane.f32.xlu1 %v347_v36  ;;  %v344_v44 = vadd.f32 %v296_v42, %v295_v41  ;;  %v303_v45 = vld [vmem:[%s949_s24 + $0x50] sm:$0xff]  ;;  %v304_v46 = vld [vmem:[%s949_s24 + $0x58] sm:$0xff]  ;;  %v1042_v48 = vld [vmem:[%s949_s24 + $0x48] sm:$0xff]  ;;  %v440_v16 = vmul.f32 %v295_v41, %v295_v41  ;;  %v441_v17 = vmul.f32 %v296_v42, %v296_v42  ;;  %v445_v23 = vmul.f32 %v1030_v39, %v1030_v39 }
  0x4a   : > { %342 = vadd.xlane.f32.xlu0 %v341_v40  ;;  %v356_v49 = vadd.f32 %v304_v46, %v303_v45  ;;  %v353_v50 = vadd.f32 %v1042_v48, %v1039_v47  ;;  %v307_v51 = vld [vmem:[%s949_s24 + $0x70] sm:$0xff]  ;;  %v308_v52 = vld [vmem:[%s949_s24 + $0x78] sm:$0xff]  ;;  %v1049_v53 = vld [vmem:[%s949_s24 + $0x60] sm:$0xff]  ;;  %v470_v26 = vadd.f32 %v439_v19, %v438_v18  ;;  %v448_v28 = vmul.f32 %v303_v45, %v303_v45 }
  0x4b   : > { %v1052_v54 = vld [vmem:[%s949_s24 + $0x68] sm:$0xff]  ;;  %v362_v55 = vadd.f32 %v308_v52, %v307_v51  ;;  %v311_v57 = vld [vmem:[%s949_s24 + $0x90] sm:$0xff]  ;;  %v312_v58 = vld [vmem:[%s949_s24 + $0x98] sm:$0xff]  ;;  %v473_v21 = vadd.f32 %v441_v17, %v440_v16  ;;  %v479_v27 = vadd.f32 %v445_v23, %v444_v22  ;;  %v449_v29 = vmul.f32 %v304_v46, %v304_v46 }
  0x4c   : > { %v359_v56 = vadd.f32 %v1052_v54, %v1049_v53  ;;  %v1059_v59 = vld [vmem:[%s949_s24 + $0x80] sm:$0xff]  ;;  %v1062_v60 = vld [vmem:[%s949_s24 + $0x88] sm:$0xff]  ;;  %v368_v61 = vadd.f32 %v312_v58, %v311_v57  ;;  %v315_v63 = vld [vmem:[%s949_s24 + $0xb0] sm:$0xff]  ;;  %v476_v30 = vadd.f32 %v443_v25, %v442_v24  ;;  %v446_v31 = vmul.f32 %v1039_v47, %v1039_v47 }
  0x4d   : > { %351 = vadd.xlane.f32.xlu1 %v350_v43  ;;  %v365_v62 = vadd.f32 %v1062_v60, %v1059_v59  ;;  %v316_v0 = vld [vmem:[%s949_s24 + $0xb8] sm:$0xff]  ;;  %v1069_v1 = vld [vmem:[%s949_s24 + $0xa0] sm:$0xff]  ;;  %v1072_v2 = vld [vmem:[%s949_s24 + $0xa8] sm:$0xff]  ;;  %v447_v32 = vmul.f32 %v1042_v48, %v1042_v48  ;;  %v485_v35 = vadd.f32 %v449_v29, %v448_v28  ;;  %v452_v33 = vmul.f32 %v307_v51, %v307_v51 }
  0x4e   : > { %345 = vadd.xlane.f32.xlu0 %v344_v44  ;;  %v374_v3 = vadd.f32 %v316_v0, %v315_v63  ;;  %v371_v4 = vadd.f32 %v1072_v2, %v1069_v1  ;;  %v319_v5 = vld [vmem:[%s949_s24 + $0xd0] sm:$0xff]  ;;  %v320_v6 = vld [vmem:[%s949_s24 + $0xd8] sm:$0xff]  ;;  %v1079_v7 = vld [vmem:[%s949_s24 + $0xc0] sm:$0xff]  ;;  %v453_v36 = vmul.f32 %v308_v52, %v308_v52  ;;  %v450_v37 = vmul.f32 %v1049_v53, %v1049_v53 }
  0x4f   : > { %v1082_v8 = vld [vmem:[%s949_s24 + $0xc8] sm:$0xff]  ;;  %v380_v9 = vadd.f32 %v320_v6, %v319_v5  ;;  %v323_v11 = vld [vmem:[%s949_s24 + $0xf0] sm:$0xff]  ;;  %v324_v12 = vld [vmem:[%s949_s24 + $0xf8] sm:$0xff]  ;;  %v482_v34 = vadd.f32 %v447_v32, %v446_v31  ;;  %v451_v38 = vmul.f32 %v1052_v54, %v1052_v54  ;;  %v456_v40 = vmul.f32 %v311_v57, %v311_v57 }
  0x50   : > { %v377_v10 = vadd.f32 %v1082_v8, %v1079_v7  ;;  %v1089_v13 = vld [vmem:[%s949_s24 + $0xe0] sm:$0xff]  ;;  %v1092_v14 = vld [vmem:[%s949_s24 + $0xe8] sm:$0xff]  ;;  %v386_v15 = vadd.f32 %v324_v12, %v323_v11  ;;  %v491_v39 = vadd.f32 %v453_v36, %v452_v33  ;;  %v457_v41 = vmul.f32 %v312_v58, %v312_v58  ;;  %v332_v19 = vld [vmem:[%s942_s19 + $0x38] sm:$0xff] }
  0x51   : > { %357 = vadd.xlane.f32.xlu1 %v356_v49  ;;  %v383_v20 = vadd.f32 %v1092_v14, %v1089_v13  ;;  %v488_v42 = vadd.f32 %v451_v38, %v450_v37  ;;  %v454_v43 = vmul.f32 %v1059_v59, %v1059_v59  ;;  %v455_v44 = vmul.f32 %v1062_v60, %v1062_v60  ;;  %v334_v25 = vld [vmem:[%s942_s19 + $0x48] sm:$0xff]  ;;  %v336_v31 = vld [vmem:[%s942_s19 + $0x58] sm:$0xff]  ;;  %v335_v32 = vld [vmem:[%s942_s19 + $0x50] sm:$0xff] }
  0x52   : > { %354 = vadd.xlane.f32.xlu0 %v353_v50  ;;  %v497_v45 = vadd.f32 %v457_v41, %v456_v40  ;;  %v460_v46 = vmul.f32 %v315_v63, %v315_v63  ;;  %v461_v47 = vmul.f32 %v316_v0, %v316_v0  ;;  %v458_v49 = vmul.f32 %v1069_v1, %v1069_v1  ;;  %v327_v1 = vld [vmem:[%s942_s19 + $0x10] sm:$0xff]  ;;  %v338_v37 = vld [vmem:[%s942_s19 + $0x68] sm:$0xff]  ;;  %v337_v38 = vld [vmem:[%s942_s19 + $0x60] sm:$0xff] }
  0x53   : > { %v494_v48 = vadd.f32 %v455_v44, %v454_v43  ;;  %v459_v50 = vmul.f32 %v1072_v2, %v1072_v2  ;;  %v464_v52 = vmul.f32 %v319_v5, %v319_v5  ;;  %v465_v53 = vmul.f32 %v320_v6, %v320_v6  ;;  %v325_v2 = vld [vmem:[%s942_s19] sm:$0xff]  ;;  %v340_v43 = vld [vmem:[%s942_s19 + $0x78] sm:$0xff]  ;;  %v339_v44 = vld [vmem:[%s942_s19 + $0x70] sm:$0xff] }
  0x54   : > { %v503_v51 = vadd.f32 %v461_v47, %v460_v46  ;;  %v468_v58 = vmul.f32 %v323_v11, %v323_v11  ;;  %v469_v59 = vmul.f32 %v324_v12, %v324_v12 }
  0x55   : > { %363 = vadd.xlane.f32.xlu1 %v362_v55  ;;  %v500_v54 = vadd.f32 %v459_v50, %v458_v49  ;;  %v462_v55 = vmul.f32 %v1079_v7, %v1079_v7  ;;  %v509_v57 = vadd.f32 %v465_v53, %v464_v52  ;;  %v328_v7 = vld [vmem:[%s942_s19 + $0x18] sm:$0xff]  ;;  %v423_v49 = vld [vmem:[%s947_s23 + $0x8] sm:$0xff]  ;;  %v422_v50 = vld [vmem:[%s947_s23] sm:$0xff] }
  0x56   : > { %360 = vadd.xlane.f32.xlu0 %v359_v56  ;;  %v463_v56 = vmul.f32 %v1082_v8, %v1082_v8  ;;  %v515_v63 = vadd.f32 %v469_v59, %v468_v58  ;;  %v326_v8 = vld [vmem:[%s942_s19 + $0x8] sm:$0xff] }
  0x58   : > { %v506_v60 = vadd.f32 %v463_v56, %v462_v55  ;;  %v425_v55 = vld [vmem:[%s947_s23 + $0x18] sm:$0xff]  ;;  %v424_v56 = vld [vmem:[%s947_s23 + $0x10] sm:$0xff] }
  0x59   : > { %369 = vadd.xlane.f32.xlu1 %v368_v61  ;;  %v466_v61 = vmul.f32 %v1089_v13, %v1089_v13  ;;  %v330_v13 = vld [vmem:[%s942_s19 + $0x28] sm:$0xff] }
  0x5a   : > { %366 = vadd.xlane.f32.xlu0 %v365_v62  ;;  %v467_v62 = vmul.f32 %v1092_v14, %v1092_v14  ;;  %v329_v14 = vld [vmem:[%s942_s19 + $0x20] sm:$0xff] }
  0x5c   : > { %v512_v0 = vadd.f32 %v467_v62, %v466_v61  ;;  %v427_v61 = vld [vmem:[%s947_s23 + $0x28] sm:$0xff]  ;;  %v426_v62 = vld [vmem:[%s947_s23 + $0x20] sm:$0xff] }
  0x5d   : > { %375 = vadd.xlane.f32.xlu1 %v374_v3 }
  0x5e   : > { %372 = vadd.xlane.f32.xlu0 %v371_v4 }
  0x61   : > { %381 = vadd.xlane.f32.xlu1 %v380_v9 }
  0x62   : > { %378 = vadd.xlane.f32.xlu0 %v377_v10 }
  0x65   : > { %387 = vadd.xlane.f32.xlu1 %v386_v15 }
  0x66   : > { %384 = vadd.xlane.f32.xlu0 %v383_v20  ;;  %v331_v20 = vld [vmem:[%s942_s19 + $0x30] sm:$0xff] }
  0x69   : > { %474 = vadd.xlane.f32.xlu1 %v473_v21 }
  0x6a   : > { %471 = vadd.xlane.f32.xlu0 %v470_v26  ;;  %v333_v26 = vld [vmem:[%s942_s19 + $0x40] sm:$0xff] }
  0x6d   : > { %480 = vadd.xlane.f32.xlu1 %v479_v27 }
  0x6e   : > { %477 = vadd.xlane.f32.xlu0 %v476_v30 }
  0x71   : > { %486 = vadd.xlane.f32.xlu1 %v485_v35 }
  0x72   : > { %483 = vadd.xlane.f32.xlu0 %v482_v34 }
  0x75   : > { %492 = vadd.xlane.f32.xlu1 %v491_v39 }
  0x76   : > { %489 = vadd.xlane.f32.xlu0 %v488_v42 }
  0x79   : > { %498 = vadd.xlane.f32.xlu1 %v497_v45 }
  0x7a   : > { %495 = vadd.xlane.f32.xlu0 %v494_v48 }
  0x7d   : > { %504 = vadd.xlane.f32.xlu1 %v503_v51 }
  0x7e   : > { %501 = vadd.xlane.f32.xlu0 %v500_v54 }
  0x81   : > { %510 = vadd.xlane.f32.xlu1 %v509_v57 }
  0x82   : > { %507 = vadd.xlane.f32.xlu0 %v506_v60 }
  0x85   : > { %516 = vadd.xlane.f32.xlu1 %v515_v63 }
  0x86   : > { %513 = vadd.xlane.f32.xlu0 %v512_v0 }
  0xd2   : > { %v349_v3 = vpop.xlane.xlu1 %348 }
  0xd3   : > { %v391_v4 = vadd.f32 %v349_v3, %v327_v1  ;;  %v343_v5 = vpop.xlane.xlu0 %342  ;;  %v429_v3 = vld [vmem:[%s947_s23 + $0x38] sm:$0xff] }
  0xd4   : > { %v389_v6 = vadd.f32 %v343_v5, %v325_v2 }
  0xd5   : > { %408 = vst.msk [vmem:[%s942_s19 + $0x10] sm:$0xff] %vm405_vm1, %v391_v4  ;;  %v428_v4 = vld [vmem:[%s947_s23 + $0x30] sm:$0xff] }
  0xd6   : > { %406 = vst.msk [vmem:[%s942_s19] sm:$0xff] %vm405_vm1, %v389_v6  ;;  %v352_v9 = vpop.xlane.xlu1 %351 }
  0xd7   : > { %v392_v10 = vadd.f32 %v352_v9, %v328_v7  ;;  %v346_v11 = vpop.xlane.xlu0 %345  ;;  %v431_v9 = vld [vmem:[%s947_s23 + $0x48] sm:$0xff] }
  0xd8   : > { %v390_v12 = vadd.f32 %v346_v11, %v326_v8 }
  0xd9   : > { %409 = vst.msk [vmem:[%s942_s19 + $0x18] sm:$0xff] %vm405_vm1, %v392_v10  ;;  %v430_v10 = vld [vmem:[%s947_s23 + $0x40] sm:$0xff] }
  0xda   : > { %407 = vst.msk [vmem:[%s942_s19 + $0x8] sm:$0xff] %vm405_vm1, %v390_v12  ;;  %v358_v15 = vpop.xlane.xlu1 %357 }
  0xdb   : > { %v394_v16 = vadd.f32 %v358_v15, %v330_v13  ;;  %v355_v17 = vpop.xlane.xlu0 %354  ;;  %v433_v15 = vld [vmem:[%s947_s23 + $0x58] sm:$0xff] }
  0xdc   : > { %v393_v18 = vadd.f32 %v355_v17, %v329_v14 }
  0xdd   : > { %411 = vst.msk [vmem:[%s942_s19 + $0x28] sm:$0xff] %vm405_vm1, %v394_v16  ;;  %v432_v16 = vld [vmem:[%s947_s23 + $0x50] sm:$0xff] }
  0xde   : > { %410 = vst.msk [vmem:[%s942_s19 + $0x20] sm:$0xff] %vm405_vm1, %v393_v18  ;;  %v364_v21 = vpop.xlane.xlu1 %363 }
  0xdf   : > { %v396_v22 = vadd.f32 %v364_v21, %v332_v19  ;;  %v361_v23 = vpop.xlane.xlu0 %360  ;;  %v435_v21 = vld [vmem:[%s947_s23 + $0x68] sm:$0xff] }
  0xe0   : > { %v395_v24 = vadd.f32 %v361_v23, %v331_v20 }
  0xe1   : > { %413 = vst.msk [vmem:[%s942_s19 + $0x38] sm:$0xff] %vm405_vm1, %v396_v22  ;;  %v434_v22 = vld [vmem:[%s947_s23 + $0x60] sm:$0xff] }
  0xe2   : > { %412 = vst.msk [vmem:[%s942_s19 + $0x30] sm:$0xff] %vm405_vm1, %v395_v24  ;;  %v370_v27 = vpop.xlane.xlu1 %369 }
  0xe3   : > { %v398_v28 = vadd.f32 %v370_v27, %v334_v25  ;;  %v367_v29 = vpop.xlane.xlu0 %366  ;;  %v437_v27 = vld [vmem:[%s947_s23 + $0x78] sm:$0xff] }
  0xe4   : > { %v397_v30 = vadd.f32 %v367_v29, %v333_v26 }
  0xe5   : > { %415 = vst.msk [vmem:[%s942_s19 + $0x48] sm:$0xff] %vm405_vm1, %v398_v28  ;;  %v436_v28 = vld [vmem:[%s947_s23 + $0x70] sm:$0xff] }
  0xe6   : > { %414 = vst.msk [vmem:[%s942_s19 + $0x40] sm:$0xff] %vm405_vm1, %v397_v30  ;;  %v376_v35 = vpop.xlane.xlu1 %375 }
  0xe7   : > { %v400_v33 = vadd.f32 %v376_v35, %v336_v31  ;;  %v373_v36 = vpop.xlane.xlu0 %372 }
  0xe8   : > { %v399_v34 = vadd.f32 %v373_v36, %v335_v32 }
  0xe9   : > { %417 = vst.msk [vmem:[%s942_s19 + $0x58] sm:$0xff] %vm405_vm1, %v400_v33 }
  0xea   : > { %416 = vst.msk [vmem:[%s942_s19 + $0x50] sm:$0xff] %vm405_vm1, %v399_v34  ;;  %v382_v39 = vpop.xlane.xlu1 %381 }
  0xeb   : > { %v402_v40 = vadd.f32 %v382_v39, %v338_v37  ;;  %v379_v41 = vpop.xlane.xlu0 %378 }
  0xec   : > { %v401_v42 = vadd.f32 %v379_v41, %v337_v38 }
  0xed   : > { %419 = vst.msk [vmem:[%s942_s19 + $0x68] sm:$0xff] %vm405_vm1, %v402_v40 }
  0xee   : > { %418 = vst.msk [vmem:[%s942_s19 + $0x60] sm:$0xff] %vm405_vm1, %v401_v42  ;;  %v388_v45 = vpop.xlane.xlu1 %387 }
  0xef   : > { %v404_v46 = vadd.f32 %v388_v45, %v340_v43  ;;  %v385_v47 = vpop.xlane.xlu0 %384 }
  0xf0   : > { %v403_v48 = vadd.f32 %v385_v47, %v339_v44 }
  0xf1   : > { %421 = vst.msk [vmem:[%s942_s19 + $0x78] sm:$0xff] %vm405_vm1, %v404_v46 }
  0xf2   : > { %420 = vst.msk [vmem:[%s942_s19 + $0x70] sm:$0xff] %vm405_vm1, %v403_v48  ;;  %v475_v51 = vpop.xlane.xlu1 %474 }
  0xf3   : > { %v519_v52 = vadd.f32 %v475_v51, %v423_v49  ;;  %v472_v53 = vpop.xlane.xlu0 %471 }
  0xf4   : > { %v518_v54 = vadd.f32 %v472_v53, %v422_v50 }
  0xf5   : > { %535 = vst.msk [vmem:[%s947_s23 + $0x8] sm:$0xff] %vm405_vm1, %v519_v52 }
  0xf6   : > { %534 = vst.msk [vmem:[%s947_s23] sm:$0xff] %vm405_vm1, %v518_v54  ;;  %v481_v57 = vpop.xlane.xlu1 %480 }
  0xf7   : > { %v521_v58 = vadd.f32 %v481_v57, %v425_v55  ;;  %v478_v59 = vpop.xlane.xlu0 %477 }
  0xf8   : > { %v520_v60 = vadd.f32 %v478_v59, %v424_v56 }
  0xf9   : > { %537 = vst.msk [vmem:[%s947_s23 + $0x18] sm:$0xff] %vm405_vm1, %v521_v58 }
  0xfa   : > { %536 = vst.msk [vmem:[%s947_s23 + $0x10] sm:$0xff] %vm405_vm1, %v520_v60  ;;  %v487_v63 = vpop.xlane.xlu1 %486 }
  0xfb   : > { %v523_v0 = vadd.f32 %v487_v63, %v427_v61  ;;  %v484_v1 = vpop.xlane.xlu0 %483 }
  0xfc   : > { %v522_v2 = vadd.f32 %v484_v1, %v426_v62 }
  0xfd   : > { %539 = vst.msk [vmem:[%s947_s23 + $0x28] sm:$0xff] %vm405_vm1, %v523_v0 }
  0xfe   : > { %538 = vst.msk [vmem:[%s947_s23 + $0x20] sm:$0xff] %vm405_vm1, %v522_v2  ;;  %v493_v5 = vpop.xlane.xlu1 %492 }
  0xff   : > { %v525_v6 = vadd.f32 %v493_v5, %v429_v3  ;;  %v490_v7 = vpop.xlane.xlu0 %489 }
 0x100   : > { %v524_v8 = vadd.f32 %v490_v7, %v428_v4 }
 0x101   : > { %541 = vst.msk [vmem:[%s947_s23 + $0x38] sm:$0xff] %vm405_vm1, %v525_v6 }
 0x102   : > { %540 = vst.msk [vmem:[%s947_s23 + $0x30] sm:$0xff] %vm405_vm1, %v524_v8  ;;  %v499_v11 = vpop.xlane.xlu1 %498 }
 0x103   : > { %v527_v12 = vadd.f32 %v499_v11, %v431_v9  ;;  %v496_v13 = vpop.xlane.xlu0 %495 }
 0x104   : > { %v526_v14 = vadd.f32 %v496_v13, %v430_v10 }
 0x105   : > { %543 = vst.msk [vmem:[%s947_s23 + $0x48] sm:$0xff] %vm405_vm1, %v527_v12 }
 0x106   : > { %542 = vst.msk [vmem:[%s947_s23 + $0x40] sm:$0xff] %vm405_vm1, %v526_v14  ;;  %v505_v17 = vpop.xlane.xlu1 %504 }
 0x107   : > { %v529_v18 = vadd.f32 %v505_v17, %v433_v15  ;;  %v502_v19 = vpop.xlane.xlu0 %501 }
 0x108   : > { %v528_v20 = vadd.f32 %v502_v19, %v432_v16 }
 0x109   : > { %545 = vst.msk [vmem:[%s947_s23 + $0x58] sm:$0xff] %vm405_vm1, %v529_v18 }
 0x10a   : > { %544 = vst.msk [vmem:[%s947_s23 + $0x50] sm:$0xff] %vm405_vm1, %v528_v20  ;;  %v511_v23 = vpop.xlane.xlu1 %510 }
 0x10b   : > { %v531_v24 = vadd.f32 %v511_v23, %v435_v21  ;;  %v508_v25 = vpop.xlane.xlu0 %507 }
 0x10c   : > { %v530_v26 = vadd.f32 %v508_v25, %v434_v22 }
 0x10d   : > { %547 = vst.msk [vmem:[%s947_s23 + $0x68] sm:$0xff] %vm405_vm1, %v531_v24 }
 0x10e   : > { %546 = vst.msk [vmem:[%s947_s23 + $0x60] sm:$0xff] %vm405_vm1, %v530_v26  ;;  %v517_v29 = vpop.xlane.xlu1 %516 }
 0x10f   : > { %v533_v30 = vadd.f32 %v517_v29, %v437_v27  ;;  %v514_v31 = vpop.xlane.xlu0 %513 }
 0x110   : > { %v532_v32 = vadd.f32 %v514_v31, %v436_v28 }
 0x111   : > { %549 = vst.msk [vmem:[%s947_s23 + $0x78] sm:$0xff] %vm405_vm1, %v533_v30 }
 0x112   : > { %548 = vst.msk [vmem:[%s947_s23 + $0x70] sm:$0xff] %vm405_vm1, %v532_v32 }
 0x113 PF: > { %s13_s15 = sadd.s32 1, %s788_s15   ;;  %s1248_s9 = smov %s768_s10 }
 0x114   : > { %p10_p12 = scmp.ge.s32.totalorder %s13_s15, 10   ;;  %s1249_s10 = smov %s857_s22 }
 0x115   : > { %s1250_s11 = smov %s780_s13  ;;  %s1251_s12 = smov %s784_s14 }
 0x116   : > { %s1252_s13 = smov %s1255_s16  ;;  %s1253_s14 = smov %s1259_s17 }
 0x117   :  { %12 = sbr.rel (!%p10_p12) target bundleno = 4 (0x4), region = 98 }

// kernel: node_attention_forward.5
= control target key start
LH: loop header
LB: loop body
LE: loop exit
PB: predicated region body
PF: predicated region fallthrough
CT: control target
= control target key end

     0   :  { %s1519_s18 = smov 0   ;;  %s1521_s19 = smov 0   ;;  %s2128_s0 = inlined_call_operand.vmem [shape: f32[2,128,1024], index: 0, kind: input, shape index: {}]   ;;  %s2129_s1 = inlined_call_operand.vmem [shape: f32[128,128], index: 1, kind: input, shape index: {}]   ;;  %s2130_s2 = inlined_call_operand.vmem [shape: f32[128,1], index: 2, kind: input, shape index: {}]   ;;  %s2131_s3 = inlined_call_operand.vmem [shape: f32[128,128], index: 3, kind: input, shape index: {}]   ;;  %s2132_s4 = inlined_call_operand.vmem [shape: f32[128,1], index: 4, kind: input, shape index: {}]   ;;  %s2133_s5 = inlined_call_operand.vmem [shape: f32[2,128,1024], index: 5, kind: output, shape index: {}]  }
   0x1   :  { %s1523_s20 = smov 0   ;;  %s1525_s21 = smov 0  }
   0x2   :  { %s1527_s22 = smov 0   ;;  %s1529_s23 = smov 0  }
   0x3   :  { %s1531_s24 = smov 0  }
   0x4 LB: > { %s24_s25 = sadd.s32 1, %s1476_s22  ;;  %s27_s26 = sadd.s32 1, %s1480_s23  ;;  %s1484_s24 = sphi %s1531_s24, %s15_s24   ;;  %s1480_s23 = sphi %s1529_s23, %s2140_s23   ;;  %s1476_s22 = sphi %s1527_s22, %s2139_s22   ;;  %s1472_s21 = sphi %s1525_s21, %s2138_s21   ;;  %s1468_s20 = sphi %s1523_s20, %s2137_s20   ;;  %s1464_s19 = sphi %s1521_s19, %s2136_s19   ;;  %s1460_s18 = sphi %s1519_s18, %s2135_s18  }
   0x5   : > { %p25_p0 = scmp.ge.s32.totalorder %s24_s25, 4  ;;  %s1288_s27 = sadd.s32 4294967295, %s1484_s24  }
   0x6   : > { %p43_p1 = scmp.ne.s32.totalorder %s1464_s19, %s1460_s18  ;;  %p44_p2 = scmp.eq.s32.totalorder %s1484_s24, 0 }
   0x7   : > { %s2142_s25 = smov (%p25_p0, %s24_s25), 0  ;;  %s2144_s26 = smov (!%p25_p0, %s27_s26), %s1480_s23 }
   0x8   : > { %p29_p3 = scmp.ge.s32.totalorder %s2144_s26, 2  ;;  %p159_p4 = scmp.eq.s32.totalorder %s1288_s27, 7 }
   0x9   : > { %s32_s28 = ssub.s32 %s1476_s22, %s2142_s25  ;;  %p45_p5 = por %p44_p2, %p43_p1 }
   0xa   : > { %s2146_s26 = smov (%p29_p3, %s2144_s26), 0  ;;  %p1567_p6 = por %p159_p4, %p43_p1 }
   0xb   : > { %s31_s30 = ssub.s32 %s1480_s23, %s2146_s26  ;;  %s36_s7 = sadd.s32 1, %s1464_s19 }
   0xc   : > { %s33_s6 = sor.u32 %s32_s28, %s31_s30  ;;  %p1291_p8 = scmp.ge.s32.totalorder %s1484_s24, 8 }
   0xd   : > { %p34_p7 = scmp.eq.s32.totalorder %s33_s6, 0 }
   0xe   : > { %193 = sbr.rel (%p1291_p8) target bundleno = 42 (0x2a), region = 32 }
   0xf   : > { %s1575_s8 = scalar_select %p34_p7, %s1464_s19, %s36_s7  }
  0x13   : > { %196 = sbr.rel (!%p45_p5) target bundleno = 42 (0x2a), region = 36  ;;  %s198_s9 = sand.u32 (%p45_p5), 1, %s1464_s19  }
  0x14   : > { %s1293_s10 = sshll.u32 (%p45_p5), %s1476_s22, 1  ;;  %s1292_s11 = sshll.u32 (%p45_p5), %s198_s9, 8 }
  0x15   : > { %s1294_s12 = sshll.u32 (%p45_p5), %s1480_s23, 7  ;;  %s1589_s27 = scalar_lea.vmem (%p45_p5), [#allocation2], %s1292_s11 }
  0x16   : > { %s203_s13 = sadd.s32 (%p45_p5), %s1294_s12, %s1293_s10 }
  0x17   : > { %s1295_s14 = sshll.u32 (%p45_p5), %s203_s13, 3 }
  0x18   : > { %s1584_s17 = scalar_lea.vmem %s2128_s0, %s1295_s14 }
  0x19   : > { %v218_v0 = vld [vmem:[%s1584_s17] sm:$0xff]  ;;  %v220_v1 = vld [vmem:[%s1584_s17 + $0x8] sm:$0xff] }
  0x1a   : > { %v222_v2 = vld [vmem:[%s1584_s17 + $0x40] sm:$0xff]  ;;  %219 = vst [vmem:[%s1589_s27] sm:$0xff] %v218_v0  ;;  %221 = vst [vmem:[%s1589_s27 + $0x8] sm:$0xff] %v220_v1  ;;  %v224_v3 = vld [vmem:[%s1584_s17 + $0x48] sm:$0xff] }
  0x1b   : > { %223 = vst [vmem:[%s1589_s27 + $0x10] sm:$0xff] %v222_v2  ;;  %v226_v4 = vld [vmem:[%s1584_s17 + $0x80] sm:$0xff]  ;;  %v228_v5 = vld [vmem:[%s1584_s17 + $0x88] sm:$0xff]  ;;  %225 = vst [vmem:[%s1589_s27 + $0x18] sm:$0xff] %v224_v3 }
  0x1c   : > { %227 = vst [vmem:[%s1589_s27 + $0x20] sm:$0xff] %v226_v4  ;;  %229 = vst [vmem:[%s1589_s27 + $0x28] sm:$0xff] %v228_v5  ;;  %v230_v6 = vld [vmem:[%s1584_s17 + $0xc0] sm:$0xff]  ;;  %v232_v7 = vld [vmem:[%s1584_s17 + $0xc8] sm:$0xff] }
  0x1d   : > { %v234_v8 = vld [vmem:[%s1584_s17 + $0x100] sm:$0xff]  ;;  %231 = vst [vmem:[%s1589_s27 + $0x30] sm:$0xff] %v230_v6  ;;  %233 = vst [vmem:[%s1589_s27 + $0x38] sm:$0xff] %v232_v7  ;;  %v236_v9 = vld [vmem:[%s1584_s17 + $0x108] sm:$0xff] }
  0x1e   : > { %235 = vst [vmem:[%s1589_s27 + $0x40] sm:$0xff] %v234_v8  ;;  %v238_v10 = vld [vmem:[%s1584_s17 + $0x140] sm:$0xff]  ;;  %v240_v11 = vld [vmem:[%s1584_s17 + $0x148] sm:$0xff]  ;;  %237 = vst [vmem:[%s1589_s27 + $0x48] sm:$0xff] %v236_v9 }
  0x1f   : > { %239 = vst [vmem:[%s1589_s27 + $0x50] sm:$0xff] %v238_v10  ;;  %241 = vst [vmem:[%s1589_s27 + $0x58] sm:$0xff] %v240_v11  ;;  %v242_v12 = vld [vmem:[%s1584_s17 + $0x180] sm:$0xff]  ;;  %v244_v13 = vld [vmem:[%s1584_s17 + $0x188] sm:$0xff] }
  0x20   : > { %v246_v14 = vld [vmem:[%s1584_s17 + $0x1c0] sm:$0xff]  ;;  %243 = vst [vmem:[%s1589_s27 + $0x60] sm:$0xff] %v242_v12  ;;  %245 = vst [vmem:[%s1589_s27 + $0x68] sm:$0xff] %v244_v13  ;;  %v248_v15 = vld [vmem:[%s1584_s17 + $0x1c8] sm:$0xff] }
  0x21   : > { %247 = vst [vmem:[%s1589_s27 + $0x70] sm:$0xff] %v246_v14  ;;  %v250_v16 = vld [vmem:[%s1584_s17 + $0x200] sm:$0xff]  ;;  %v252_v17 = vld [vmem:[%s1584_s17 + $0x208] sm:$0xff]  ;;  %249 = vst [vmem:[%s1589_s27 + $0x78] sm:$0xff] %v248_v15 }
  0x22   : > { %251 = vst [vmem:[%s1589_s27 + $0x80] sm:$0xff] %v250_v16  ;;  %253 = vst [vmem:[%s1589_s27 + $0x88] sm:$0xff] %v252_v17  ;;  %v254_v18 = vld [vmem:[%s1584_s17 + $0x240] sm:$0xff]  ;;  %v256_v19 = vld [vmem:[%s1584_s17 + $0x248] sm:$0xff] }
  0x23   : > { %v258_v20 = vld [vmem:[%s1584_s17 + $0x280] sm:$0xff]  ;;  %255 = vst [vmem:[%s1589_s27 + $0x90] sm:$0xff] %v254_v18  ;;  %257 = vst [vmem:[%s1589_s27 + $0x98] sm:$0xff] %v256_v19  ;;  %v260_v21 = vld [vmem:[%s1584_s17 + $0x288] sm:$0xff] }
  0x24   : > { %259 = vst [vmem:[%s1589_s27 + $0xa0] sm:$0xff] %v258_v20  ;;  %v262_v22 = vld [vmem:[%s1584_s17 + $0x2c0] sm:$0xff]  ;;  %v264_v23 = vld [vmem:[%s1584_s17 + $0x2c8] sm:$0xff]  ;;  %261 = vst [vmem:[%s1589_s27 + $0xa8] sm:$0xff] %v260_v21 }
  0x25   : > { %263 = vst [vmem:[%s1589_s27 + $0xb0] sm:$0xff] %v262_v22  ;;  %265 = vst [vmem:[%s1589_s27 + $0xb8] sm:$0xff] %v264_v23  ;;  %v266_v24 = vld [vmem:[%s1584_s17 + $0x300] sm:$0xff]  ;;  %v268_v25 = vld [vmem:[%s1584_s17 + $0x308] sm:$0xff] }
  0x26   : > { %v270_v26 = vld [vmem:[%s1584_s17 + $0x340] sm:$0xff]  ;;  %267 = vst [vmem:[%s1589_s27 + $0xc0] sm:$0xff] %v266_v24  ;;  %269 = vst [vmem:[%s1589_s27 + $0xc8] sm:$0xff] %v268_v25  ;;  %v272_v27 = vld [vmem:[%s1584_s17 + $0x348] sm:$0xff] }
  0x27   : > { %271 = vst [vmem:[%s1589_s27 + $0xd0] sm:$0xff] %v270_v26  ;;  %v274_v28 = vld [vmem:[%s1584_s17 + $0x380] sm:$0xff]  ;;  %v276_v29 = vld [vmem:[%s1584_s17 + $0x388] sm:$0xff]  ;;  %273 = vst [vmem:[%s1589_s27 + $0xd8] sm:$0xff] %v272_v27 }
  0x28   : > { %275 = vst [vmem:[%s1589_s27 + $0xe0] sm:$0xff] %v274_v28  ;;  %277 = vst [vmem:[%s1589_s27 + $0xe8] sm:$0xff] %v276_v29  ;;  %v278_v30 = vld [vmem:[%s1584_s17 + $0x3c0] sm:$0xff]  ;;  %v280_v31 = vld [vmem:[%s1584_s17 + $0x3c8] sm:$0xff] }
  0x29   : > { %279 = vst [vmem:[%s1589_s27 + $0xf0] sm:$0xff] %v278_v30  ;;  %281 = vst [vmem:[%s1589_s27 + $0xf8] sm:$0xff] %v280_v31 }
  0x2a PF: > { %p1296_p9 = scmp.ge.s32.totalorder %s1484_s24, 1  ;;  %p286_p10 = scmp.lt.s32.totalorder %s1484_s24, 9 }
  0x2c   : > { %p287_p11 = pnand %p1296_p9, %p286_p10 }
  0x2d   : > { %s293_s28 = sand.u32 (!%p287_p11), 1, %s1460_s18  }
  0x2e   : > { %290 = sbr.rel (%p287_p11) target bundleno = 645 (0x285), region = 59  ;;  %s1655_s30 = sshll.u32 (!%p287_p11), %s293_s28, 8 }
  0x2f   : > { %s1660_s6 = scalar_lea.vmem (!%p287_p11), [#allocation2], %s1655_s30  ;;  %s2000_s10 = scalar_lea.vmem (!%p287_p11), [#allocation3], %s1655_s30 }
  0x33   : > { %v1486_v32 = vmov 0.0   ;;  %v1487_v33 = vmov 0   ;;  %v352_v34 = vld [vmem:[%s1660_s6 + $0xf8] sm:$0xff]  ;;  %v351_v35 = vld [vmem:[%s1660_s6 + $0xf0] sm:$0xff]  ;;  %v350_v36 = vld [vmem:[%s1660_s6 + $0xe8] sm:$0xff]  ;;  %s1364_s30 = sshll.u32 (%p1567_p6), %s1468_s20, 1 }
  0x34   : > { %529 = vmatprep.mubr.f32.mxu0 %v1486_v32  ;;  %1429 = vset.pattern.permute.xlu1 %v1487_v33  ;;  %v349_v37 = vld [vmem:[%s1660_s6 + $0xe0] sm:$0xff]  ;;  %v348_v38 = vld [vmem:[%s1660_s6 + $0xd8] sm:$0xff]  ;;  %v347_v39 = vld [vmem:[%s1660_s6 + $0xd0] sm:$0xff]  ;;  %s1365_s11 = sshll.u32 (%p1567_p6), %s1472_s21, 7 }
  0x35   : > { %1428 = vset.pattern.permute.xlu0 %v1487_v33  ;;  %898 = vmatprep.mubr.f32.mxu1 %v1486_v32  ;;  %v346_v40 = vld [vmem:[%s1660_s6 + $0xc8] sm:$0xff]  ;;  %v345_v41 = vld [vmem:[%s1660_s6 + $0xc0] sm:$0xff]  ;;  %v344_v42 = vld [vmem:[%s1660_s6 + $0xb8] sm:$0xff]  ;;  %s1132_s29 = sadd.s32 (%p1567_p6), %s1365_s11, %s1364_s30 }
  0x36   : > { %465 = vmatprep.subr.mxu0 %v352_v34  ;;  %v343_v43 = vld [vmem:[%s1660_s6 + $0xb0] sm:$0xff]  ;;  %v342_v44 = vld [vmem:[%s1660_s6 + $0xa8] sm:$0xff]  ;;  %v341_v45 = vld [vmem:[%s1660_s6 + $0xa0] sm:$0xff]  ;;  %s1366_s12 = sshll.u32 (%p1567_p6), %s1132_s29, 3 }
  0x37   : > { %466 = vmatpush1.msra.mxu0 %v351_v35  ;;  %v340_v46 = vld [vmem:[%s1660_s6 + $0x98] sm:$0xff]  ;;  %v339_v47 = vld [vmem:[%s1660_s6 + $0x90] sm:$0xff]  ;;  %v382_v48 = vld [vmem:[%s2130_s2 + $0x68] sm:$0xff]  ;;  %s2050_s15 = scalar_lea.vmem (%p1567_p6), %s2133_s5, %s1366_s12 }
  0x38   : > { %467 = vmatprep.subr.mxu0 %v350_v36  ;;  %v338_v49 = vld [vmem:[%s1660_s6 + $0x88] sm:$0xff]  ;;  %452 = vperm.xlu1 %1429, %v382_v48   ;;  %v384_v50 = vld [vmem:[%s2130_s2 + $0x78] sm:$0xff]  ;;  %v337_v51 = vld [vmem:[%s1660_s6 + $0x80] sm:$0xff] }
  0x39   : > { %468 = vmatpush1.msra.mxu0 %v349_v37  ;;  %462 = vperm.xlu0 %1428, %v384_v50   ;;  %v381_v52 = vld [vmem:[%s2130_s2 + $0x60] sm:$0xff]  ;;  %v336_v53 = vld [vmem:[%s1660_s6 + $0x78] sm:$0xff]  ;;  %v383_v54 = vld [vmem:[%s2130_s2 + $0x70] sm:$0xff] }
  0x3a   : > { %469 = vmatprep.subr.mxu0 %v348_v38  ;;  %v335_v55 = vld [vmem:[%s1660_s6 + $0x70] sm:$0xff]  ;;  %v334_v56 = vld [vmem:[%s1660_s6 + $0x68] sm:$0xff]  ;;  %v333_v57 = vld [vmem:[%s1660_s6 + $0x60] sm:$0xff] }
  0x3b   : > { %470 = vmatpush1.msra.mxu0 %v347_v39  ;;  %v379_v58 = vld [vmem:[%s2130_s2 + $0x50] sm:$0xff]  ;;  %v332_v59 = vld [vmem:[%s1660_s6 + $0x58] sm:$0xff]  ;;  %v330_v62 = vld [vmem:[%s1660_s6 + $0x48] sm:$0xff] }
  0x3c   : > { %471 = vmatprep.subr.mxu0 %v346_v40  ;;  %447 = vperm.xlu1 %1429, %v381_v52   ;;  %v380_v60 = vld [vmem:[%s2130_s2 + $0x58] sm:$0xff]  ;;  %v331_v61 = vld [vmem:[%s1660_s6 + $0x50] sm:$0xff]  ;;  %v329_v63 = vld [vmem:[%s1660_s6 + $0x40] sm:$0xff] }
  0x3d   : > { %472 = vmatpush1.msra.mxu0 %v345_v41  ;;  %457 = vperm.xlu0 %1428, %v383_v54   ;;  %v377_v0 = vld [vmem:[%s2130_s2 + $0x40] sm:$0xff]  ;;  %v328_v1 = vld [vmem:[%s1660_s6 + $0x38] sm:$0xff]  ;;  %v378_v2 = vld [vmem:[%s2130_s2 + $0x48] sm:$0xff] }
  0x3e   : > { %473 = vmatprep.subr.mxu0 %v344_v42  ;;  %v327_v3 = vld [vmem:[%s1660_s6 + $0x30] sm:$0xff]  ;;  %v326_v4 = vld [vmem:[%s1660_s6 + $0x28] sm:$0xff]  ;;  %v325_v5 = vld [vmem:[%s1660_s6 + $0x20] sm:$0xff] }
  0x3f   : > { %474 = vmatpush1.msra.mxu0 %v343_v43  ;;  %v375_v6 = vld [vmem:[%s2130_s2 + $0x30] sm:$0xff]  ;;  %v324_v7 = vld [vmem:[%s1660_s6 + $0x18] sm:$0xff]  ;;  %v322_v10 = vld [vmem:[%s1660_s6 + $0x8] sm:$0xff] }
  0x40   : > { %475 = vmatprep.subr.mxu0 %v342_v44  ;;  %437 = vperm.xlu1 %1429, %v379_v58   ;;  %v376_v8 = vld [vmem:[%s2130_s2 + $0x38] sm:$0xff]  ;;  %v323_v9 = vld [vmem:[%s1660_s6 + $0x10] sm:$0xff]  ;;  %v321_v11 = vld [vmem:[%s1660_s6] sm:$0xff] }
  0x41   : > { %476 = vmatpush1.msra.mxu0 %v341_v45  ;;  %442 = vperm.xlu0 %1428, %v380_v60   ;;  %v373_v12 = vld [vmem:[%s2130_s2 + $0x20] sm:$0xff]  ;;  %v374_v14 = vld [vmem:[%s2130_s2 + $0x28] sm:$0xff]  ;;  %v371_v15 = vld [vmem:[%s2130_s2 + $0x10] sm:$0xff] }
  0x42   : > { %477 = vmatprep.subr.mxu0 %v340_v46  ;;  %v353_v13 = vld [vmem:[%s2129_s1] sm:$0xff]  ;;  %v354_v16 = vld [vmem:[%s2129_s1 + $0x8] sm:$0xff]  ;;  %v372_v17 = vld [vmem:[%s2130_s2 + $0x18] sm:$0xff] }
  0x43   : > { %478 = vmatpush1.msra.mxu0 %v339_v47  ;;  %v369_v18 = vld [vmem:[%s2130_s2] sm:$0xff]  ;;  %v355_v19 = vld [vmem:[%s2129_s1 + $0x10] sm:$0xff]  ;;  %v370_v20 = vld [vmem:[%s2130_s2 + $0x8] sm:$0xff] }
  0x44   : > { %479 = vmatprep.subr.mxu0 %v338_v49  ;;  %427 = vperm.xlu1 %1429, %v377_v0   ;;  %v739_v21 = vld [vmem:[%s2132_s4 + $0x8] sm:$0xff]  ;;  %v356_v22 = vld [vmem:[%s2129_s1 + $0x18] sm:$0xff]  ;;  %v738_v23 = vld [vmem:[%s2132_s4] sm:$0xff] }
  0x45   : > { %480 = vmatpush1.msra.mxu0 %v337_v51  ;;  %432 = vperm.xlu0 %1428, %v378_v2   ;;  %v741_v24 = vld [vmem:[%s2132_s4 + $0x18] sm:$0xff]  ;;  %v357_v25 = vld [vmem:[%s2129_s1 + $0x20] sm:$0xff]  ;;  %v740_v26 = vld [vmem:[%s2132_s4 + $0x10] sm:$0xff] }
  0x46   : > { %481 = vmatprep.subr.mxu0 %v336_v53  ;;  %v743_v27 = vld [vmem:[%s2132_s4 + $0x28] sm:$0xff]  ;;  %v742_v29 = vld [vmem:[%s2132_s4 + $0x20] sm:$0xff]  ;;  %v745_v30 = vld [vmem:[%s2132_s4 + $0x38] sm:$0xff] }
  0x47   : > { %482 = vmatpush1.msra.mxu0 %v335_v55  ;;  %v358_v28 = vld [vmem:[%s2129_s1 + $0x28] sm:$0xff]  ;;  %v359_v31 = vld [vmem:[%s2129_s1 + $0x30] sm:$0xff]  ;;  %v360_v35 = vld [vmem:[%s2129_s1 + $0x38] sm:$0xff] }
  0x48   : > { %483 = vmatprep.subr.mxu0 %v334_v56  ;;  %417 = vperm.xlu1 %1429, %v375_v6   ;;  %v744_v33 = vld [vmem:[%s2132_s4 + $0x30] sm:$0xff]  ;;  %v747_v34 = vld [vmem:[%s2132_s4 + $0x48] sm:$0xff]  ;;  %v746_v36 = vld [vmem:[%s2132_s4 + $0x40] sm:$0xff] }
  0x49   : > { %484 = vmatpush1.msra.mxu0 %v333_v57  ;;  %422 = vperm.xlu0 %1428, %v376_v8   ;;  %v749_v37 = vld [vmem:[%s2132_s4 + $0x58] sm:$0xff]  ;;  %v361_v38 = vld [vmem:[%s2129_s1 + $0x40] sm:$0xff]  ;;  %v748_v39 = vld [vmem:[%s2132_s4 + $0x50] sm:$0xff] }
  0x4a   : > { %485 = vmatprep.subr.mxu0 %v332_v59  ;;  %v751_v40 = vld [vmem:[%s2132_s4 + $0x68] sm:$0xff]  ;;  %v750_v42 = vld [vmem:[%s2132_s4 + $0x60] sm:$0xff]  ;;  %v753_v43 = vld [vmem:[%s2132_s4 + $0x78] sm:$0xff] }
  0x4b   : > { %486 = vmatpush1.msra.mxu0 %v331_v61  ;;  %v362_v41 = vld [vmem:[%s2129_s1 + $0x48] sm:$0xff]  ;;  %v363_v44 = vld [vmem:[%s2129_s1 + $0x50] sm:$0xff]  ;;  %v364_v46 = vld [vmem:[%s2129_s1 + $0x58] sm:$0xff] }
  0x4c   : > { %487 = vmatprep.subr.mxu0 %v330_v62  ;;  %407 = vperm.xlu1 %1429, %v373_v12   ;;  %v752_v45 = vld [vmem:[%s2132_s4 + $0x70] sm:$0xff]  ;;  %v365_v47 = vld [vmem:[%s2129_s1 + $0x60] sm:$0xff]  ;;  %v366_v48 = vld [vmem:[%s2129_s1 + $0x68] sm:$0xff] }
  0x4d   : > { %488 = vmatpush1.msra.mxu0 %v329_v63  ;;  %412 = vperm.xlu0 %1428, %v374_v14   ;;  %v367_v49 = vld [vmem:[%s2129_s1 + $0x70] sm:$0xff]  ;;  %v368_v50 = vld [vmem:[%s2129_s1 + $0x78] sm:$0xff] }
  0x4e   : > { %489 = vmatprep.subr.mxu0 %v328_v1 }
  0x4f   : > { %490 = vmatpush1.msra.mxu0 %v327_v3 }
  0x50   : > { %491 = vmatprep.subr.mxu0 %v326_v4  ;;  %397 = vperm.xlu1 %1429, %v371_v15  }
  0x51   : > { %492 = vmatpush1.msra.mxu0 %v325_v5  ;;  %402 = vperm.xlu0 %1428, %v372_v17  }
  0x52   : > { %493 = vmatprep.subr.mxu0 %v324_v7 }
  0x53   : > { %494 = vmatpush1.msra.mxu0 %v323_v9 }
  0x54   : > { %495 = vmatprep.subr.mxu0 %v322_v10  ;;  %387 = vperm.xlu1 %1429, %v369_v18  }
  0x55   : > { %496 = vmatpush1.msra.mxu0 %v321_v11  ;;  %392 = vperm.xlu0 %1428, %v370_v20  }
  0x56   : > { %530 = vmatmul.mubr.f32.vlgmr.msra.gmra.mxu0 %v353_v13 }
  0x57   : > { %535 = vmatprep.mubr.f32.mxu0 %v1486_v32 }
  0x58   : > { %761 = vperm.xlu1 %1429, %v739_v21  }
  0x59   : > { %756 = vperm.xlu0 %1428, %v738_v23  }
  0x5a   : > { %536 = vmatmul.mubr.f32.gmra.mxu0 %v354_v16 }
  0x5b   : > { %541 = vmatprep.mubr.f32.mxu0 %v1486_v32 }
  0x5c   : > { %771 = vperm.xlu1 %1429, %v741_v24  }
  0x5d   : > { %766 = vperm.xlu0 %1428, %v740_v26  }
  0x5e   : > { %542 = vmatmul.mubr.f32.gmra.mxu0 %v355_v19 }
  0x5f   : > { %547 = vmatprep.mubr.f32.mxu0 %v1486_v32 }
  0x60   : > { %781 = vperm.xlu1 %1429, %v743_v27  }
  0x61   : > { %776 = vperm.xlu0 %1428, %v742_v29  }
  0x62   : > { %548 = vmatmul.mubr.f32.gmra.mxu0 %v356_v22 }
  0x63   : > { %553 = vmatprep.mubr.f32.mxu0 %v1486_v32 }
  0x64   : > { %791 = vperm.xlu1 %1429, %v745_v30  }
  0x65   : > { %786 = vperm.xlu0 %1428, %v744_v33  }
  0x66   : > { %554 = vmatmul.mubr.f32.gmra.mxu0 %v357_v25 }
  0x67   : > { %559 = vmatprep.mubr.f32.mxu0 %v1486_v32 }
  0x68   : > { %801 = vperm.xlu1 %1429, %v747_v34   ;;  %v1488_v34 = vmov 1.0  }
  0x69   : > { %796 = vperm.xlu0 %1428, %v746_v36  }
  0x6a   : > { %560 = vmatmul.mubr.f32.gmra.mxu0 %v358_v28 }
  0x6b   : > { %565 = vmatprep.mubr.f32.mxu0 %v1486_v32 }
  0x6c   : > { %811 = vperm.xlu1 %1429, %v749_v37  }
  0x6d   : > { %806 = vperm.xlu0 %1428, %v748_v39  }
  0x6e   : > { %566 = vmatmul.mubr.f32.gmra.mxu0 %v359_v31 }
  0x6f   : > { %571 = vmatprep.mubr.f32.mxu0 %v1486_v32 }
  0x70   : > { %821 = vperm.xlu1 %1429, %v751_v40  }
  0x71   : > { %816 = vperm.xlu0 %1428, %v750_v42  }
  0x72   : > { %572 = vmatmul.mubr.f32.gmra.mxu0 %v360_v35 }
  0x73   : > { %577 = vmatprep.mubr.f32.mxu0 %v1486_v32 }
  0x74   : > { %831 = vperm.xlu1 %1429, %v753_v43  }
  0x75   : > { %826 = vperm.xlu0 %1428, %v752_v45  }
  0x76   : > { %578 = vmatmul.mubr.f32.gmra.mxu0 %v361_v38 }
  0x77   : > { %583 = vmatprep.mubr.f32.mxu0 %v1486_v32 }
  0x7a   : > { %584 = vmatmul.mubr.f32.gmra.mxu0 %v362_v41 }
  0x7b   : > { %589 = vmatprep.mubr.f32.mxu0 %v1486_v32 }
  0x7e   : > { %590 = vmatmul.mubr.f32.gmra.mxu0 %v363_v44 }
  0x7f   : > { %595 = vmatprep.mubr.f32.mxu0 %v1486_v32 }
  0x82   : > { %596 = vmatmul.mubr.f32.gmra.mxu0 %v364_v46 }
  0x83   : > { %601 = vmatprep.mubr.f32.mxu0 %v1486_v32 }
  0x86   : > { %602 = vmatmul.mubr.f32.gmra.mxu0 %v365_v47 }
  0x87   : > { %607 = vmatprep.mubr.f32.mxu0 %v1486_v32 }
  0x8a   : > { %608 = vmatmul.mubr.f32.gmra.mxu0 %v366_v48 }
  0x8b   : > { %613 = vmatprep.mubr.f32.mxu0 %v1486_v32 }
  0x8e   : > { %614 = vmatmul.mubr.f32.gmra.mxu0 %v367_v49 }
  0x8f   : > { %619 = vmatprep.mubr.f32.mxu0 %v1486_v32 }
  0x92   : > { %620 = vmatmul.mubr.f32.gmra.mxu0 %v368_v50 }
  0xb3   : > { %v453_v12 = vpop.permute.xlu1 %452 }
  0xb4   : > { %v463_v10 = vpop.permute.xlu0 %462 }
  0xb7   : > { %v448_v17 = vpop.permute.xlu1 %447 }
  0xb8   : > { %v458_v15 = vpop.permute.xlu0 %457 }
  0xbb   : > { %v438_v22 = vpop.permute.xlu1 %437 }
  0xbc   : > { %v443_v20 = vpop.permute.xlu0 %442 }
  0xbf   : > { %v428_v30 = vpop.permute.xlu1 %427 }
  0xc0   : > { %v433_v26 = vpop.permute.xlu0 %432 }
  0xc3   : > { %v418_v40 = vpop.permute.xlu1 %417 }
  0xc4   : > { %v423_v37 = vpop.permute.xlu0 %422 }
  0xc7   : > { %v408_v48 = vpop.permute.xlu1 %407 }
  0xc8   : > { %v413_v45 = vpop.permute.xlu0 %412 }
 0x116   : > { %v1853_v51 = vpop.f32.mrf.mxu0 }
 0x118   : > { %v1855_v52 = vpop.f32.mrf.mxu0 }
 0x11a   : > { %v1857_v53 = vpop.f32.mrf.mxu0 }
 0x11c   : > { %v1859_v54 = vpop.f32.mrf.mxu0 }
 0x11e   : > { %v1861_v55 = vpop.f32.mrf.mxu0 }
 0x120   : > { %v1863_v56 = vpop.f32.mrf.mxu0 }
 0x122   : > { %v1865_v57 = vpop.f32.mrf.mxu0 }
 0x124   : > { %v1867_v58 = vpop.f32.mrf.mxu0 }
 0x126   : > { %v1869_v59 = vpop.f32.mrf.mxu0 }
 0x128   : > { %v1871_v60 = vpop.f32.mrf.mxu0 }
 0x12a   : > { %v1873_v61 = vpop.f32.mrf.mxu0 }
 0x12c   : > { %v1875_v62 = vpop.f32.mrf.mxu0 }
 0x12e   : > { %v1877_v63 = vpop.f32.mrf.mxu0 }
 0x130   : > { %v1879_v0 = vpop.f32.mrf.mxu0 }
 0x132   : > { %v1881_v1 = vpop.f32.mrf.mxu0 }
 0x133   : > { %v574_v50 = vadd.f32 %v1881_v1, %v423_v37  ;;  %v562_v1 = vadd.f32 %v1873_v61, %v413_v45 }
 0x134   : > { %v1883_v2 = vpop.f32.mrf.mxu0 }
 0x135   : > { %v576_v49 = vadd.f32 %v1883_v2, %v423_v37  ;;  %v564_v2 = vadd.f32 %v1875_v62, %v413_v45 }
 0x136   : > { %v1885_v3 = vpop.f32.mrf.mxu0 }
 0x137   : > { %v580_v47 = vadd.f32 %v1885_v3, %v428_v30  ;;  %v568_v3 = vadd.f32 %v1877_v63, %v418_v40  ;;  %v556_v63 = vadd.f32 %v1869_v59, %v408_v48 }
 0x138   : > { %v581_v4 = vpop.f32.mrf.mxu0 }
 0x139   : > { %v582_v46 = vadd.f32 %v581_v4, %v428_v30  ;;  %v570_v4 = vadd.f32 %v1879_v0, %v418_v40  ;;  %vm642_vm15 = vcmp.gt.f32.partialorder %v580_v47, 0.0  ;;  %v398_v0 = vpop.permute.xlu1 %397 }
 0x13a   : > { %v585_v5 = vpop.f32.mrf.mxu0  ;;  %v544_v59 = vadd.f32 %v1861_v55, %v398_v0 }
 0x13b   : > { %v586_v44 = vadd.f32 %v585_v5, %v433_v26  ;;  %vm643_vm14 = vcmp.gt.f32.partialorder %v582_v46, 0.0  ;;  %v403_v5 = vpop.permute.xlu0 %402 }
 0x13c   : > { %v587_v6 = vpop.f32.mrf.mxu0  ;;  %v552_v62 = vadd.f32 %v1867_v58, %v403_v5  ;;  %v550_v61 = vadd.f32 %v1865_v57, %v403_v5 }
 0x13d   : > { %v588_v43 = vadd.f32 %v587_v6, %v433_v26  ;;  %vm644_vm13 = vcmp.gt.f32.partialorder %v586_v44, 0.0  ;;  %v558_v6 = vadd.f32 %v1871_v60, %v408_v48  ;;  %v546_v60 = vadd.f32 %v1863_v56, %v398_v0  ;;  %v388_v58 = vpop.permute.xlu1 %387 }
 0x13e   : > { %v591_v7 = vpop.f32.mrf.mxu0  ;;  %v534_v56 = vadd.f32 %v1855_v52, %v388_v58  ;;  %v532_v55 = vadd.f32 %v1853_v51, %v388_v58  ;;  %v722_v52 = vld [vmem:[%s2131_s3] sm:$0xff]  ;;  %v723_v51 = vld [vmem:[%s2131_s3 + $0x8] sm:$0xff] }
 0x13f   : > { %v592_v42 = vadd.f32 %v591_v7, %v438_v22  ;;  %vm645_vm12 = vcmp.gt.f32.partialorder %v588_v43, 0.0  ;;  %v393_v7 = vpop.permute.xlu0 %392 }
 0x140   : > { %v593_v8 = vpop.f32.mrf.mxu0  ;;  %v538_v57 = vadd.f32 %v1857_v53, %v393_v7  ;;  %v724_v53 = vld [vmem:[%s2131_s3 + $0x10] sm:$0xff] }
 0x141   : > { %v594_v41 = vadd.f32 %v593_v8, %v438_v22  ;;  %vm646_vm11 = vcmp.gt.f32.partialorder %v592_v42, 0.0  ;;  %v540_v8 = vadd.f32 %v1859_v54, %v393_v7  ;;  %v725_v54 = vld [vmem:[%s2131_s3 + $0x18] sm:$0xff] }
 0x142   : > { %v597_v9 = vpop.f32.mrf.mxu0 }
 0x143   : > { %v598_v39 = vadd.f32 %v597_v9, %v443_v20  ;;  %vm647_vm10 = vcmp.gt.f32.partialorder %v594_v41, 0.0  ;;  %v726_v9 = vld [vmem:[%s2131_s3 + $0x20] sm:$0xff] }
 0x144   : > { %v599_v11 = vpop.f32.mrf.mxu0 }
 0x145   : > { %v600_v38 = vadd.f32 %v599_v11, %v443_v20  ;;  %vm648_vm9 = vcmp.gt.f32.partialorder %v598_v39, 0.0  ;;  %v728_v11 = vld [vmem:[%s2131_s3 + $0x30] sm:$0xff]  ;;  %v737_v20 = vld [vmem:[%s2131_s3 + $0x78] sm:$0xff] }
 0x146   : > { %v603_v13 = vpop.f32.mrf.mxu0 }
 0x147   : > { %v604_v36 = vadd.f32 %v603_v13, %v448_v17  ;;  %vm649_vm8 = vcmp.gt.f32.partialorder %v600_v38, 0.0  ;;  %v730_v13 = vld [vmem:[%s2131_s3 + $0x40] sm:$0xff] }
 0x148   : > { %v605_v14 = vpop.f32.mrf.mxu0 }
 0x149   : > { %v606_v35 = vadd.f32 %v605_v14, %v448_v17  ;;  %vm650_vm7 = vcmp.gt.f32.partialorder %v604_v36, 0.0  ;;  %v731_v14 = vld [vmem:[%s2131_s3 + $0x48] sm:$0xff]  ;;  %v734_v17 = vld [vmem:[%s2131_s3 + $0x60] sm:$0xff] }
 0x14a   : > { %v609_v16 = vpop.f32.mrf.mxu0 }
 0x14b   : > { %v610_v33 = vadd.f32 %v609_v16, %v453_v12  ;;  %vm651_vm6 = vcmp.gt.f32.partialorder %v606_v35, 0.0  ;;  %v733_v16 = vld [vmem:[%s2131_s3 + $0x58] sm:$0xff] }
 0x14c   : > { %v611_v18 = vpop.f32.mrf.mxu0 }
 0x14d   : > { %v612_v31 = vadd.f32 %v611_v18, %v453_v12  ;;  %vm652_vm5 = vcmp.gt.f32.partialorder %v610_v33, 0.0  ;;  %v729_v12 = vld [vmem:[%s2131_s3 + $0x38] sm:$0xff]  ;;  %v735_v18 = vld [vmem:[%s2131_s3 + $0x68] sm:$0xff] }
 0x14e   : > { %v615_v19 = vpop.f32.mrf.mxu0 }
 0x14f   : > { %v616_v29 = vadd.f32 %v615_v19, %v458_v15  ;;  %vm653_vm4 = vcmp.gt.f32.partialorder %v612_v31, 0.0  ;;  %v736_v19 = vld [vmem:[%s2131_s3 + $0x70] sm:$0xff] }
 0x150   : > { %v617_v21 = vpop.f32.mrf.mxu0 }
 0x151   : > { %v618_v27 = vadd.f32 %v617_v21, %v458_v15  ;;  %vm654_vm3 = vcmp.gt.f32.partialorder %v616_v29, 0.0  ;;  %v732_v15 = vld [vmem:[%s2131_s3 + $0x50] sm:$0xff]  ;;  %v757_v21 = vpop.permute.xlu0 %756 }
 0x152   : > { %v621_v23 = vpop.f32.mrf.mxu0 }
 0x153   : > { %v622_v24 = vadd.f32 %v621_v23, %v463_v10  ;;  %vm655_vm2 = vcmp.gt.f32.partialorder %v618_v27, 0.0  ;;  %v762_v27 = vpop.permute.xlu1 %761 }
 0x154   : > { %v623_v25 = vpop.f32.mrf.mxu0 }
 0x155   : > { %v624_v28 = vadd.f32 %v623_v25, %v463_v10  ;;  %vm656_vm1 = vcmp.gt.f32.partialorder %v622_v24, 0.0  ;;  %v727_v10 = vld [vmem:[%s2131_s3 + $0x28] sm:$0xff]  ;;  %v767_v36 = vpop.permute.xlu0 %766 }
 0x157   : > { %vm657_vm0 = vcmp.gt.f32.partialorder %v624_v28, 0.0  ;;  %v772_v45 = vpop.permute.xlu1 %771 }
 0x158   : > { %1331 = vmatprep.subr.msk.mxu1 %vm657_vm0, %v1488_v34  ;;  %vm641_vm0 = vcmp.gt.f32.partialorder %v576_v49, 0.0 }
 0x159   : > { %1332 = vmatpush1.msk.msra.mxu1 %vm656_vm1, %v1488_v34  ;;  %vm640_vm1 = vcmp.gt.f32.partialorder %v574_v50, 0.0 }
 0x15a   : > { %1333 = vmatprep.subr.msk.mxu1 %vm655_vm2, %v1488_v34  ;;  %vm639_vm2 = vcmp.gt.f32.partialorder %v570_v4, 0.0 }
 0x15b   : > { %1334 = vmatpush1.msk.msra.mxu1 %vm654_vm3, %v1488_v34  ;;  %vm638_vm3 = vcmp.gt.f32.partialorder %v568_v3, 0.0 }
 0x15c   : > { %1335 = vmatprep.subr.msk.mxu1 %vm653_vm4, %v1488_v34  ;;  %vm637_vm4 = vcmp.gt.f32.partialorder %v564_v2, 0.0  ;;  %v777_v2 = vpop.permute.xlu0 %776 }
 0x15d   : > { %1336 = vmatpush1.msk.msra.mxu1 %vm652_vm5, %v1488_v34  ;;  %vm636_vm5 = vcmp.gt.f32.partialorder %v562_v1, 0.0 }
 0x15e   : > { %1337 = vmatprep.subr.msk.mxu1 %vm651_vm6, %v1488_v34  ;;  %vm635_vm6 = vcmp.gt.f32.partialorder %v558_v6, 0.0 }
 0x15f   : > { %1338 = vmatpush1.msk.msra.mxu1 %vm650_vm7, %v1488_v34  ;;  %vm634_vm7 = vcmp.gt.f32.partialorder %v556_v63, 0.0 }
 0x160   : > { %1339 = vmatprep.subr.msk.mxu1 %vm649_vm8, %v1488_v34  ;;  %vm633_vm8 = vcmp.gt.f32.partialorder %v552_v62, 0.0 }
 0x161   : > { %1340 = vmatpush1.msk.msra.mxu1 %vm648_vm9, %v1488_v34  ;;  %vm632_vm9 = vcmp.gt.f32.partialorder %v550_v61, 0.0 }
 0x162   : > { %1341 = vmatprep.subr.msk.mxu1 %vm647_vm10, %v1488_v34  ;;  %vm631_vm10 = vcmp.gt.f32.partialorder %v546_v60, 0.0 }
 0x163   : > { %1342 = vmatpush1.msk.msra.mxu1 %vm646_vm11, %v1488_v34  ;;  %vm630_vm11 = vcmp.gt.f32.partialorder %v544_v59, 0.0  ;;  %v782_v59 = vpop.permute.xlu1 %781 }
 0x164   : > { %1343 = vmatprep.subr.msk.mxu1 %vm645_vm12, %v1488_v34  ;;  %vm629_vm12 = vcmp.gt.f32.partialorder %v540_v8, 0.0 }
 0x165   : > { %1344 = vmatpush1.msk.msra.mxu1 %vm644_vm13, %v1488_v34  ;;  %vm628_vm13 = vcmp.gt.f32.partialorder %v538_v57, 0.0 }
 0x166   : > { %1345 = vmatprep.subr.msk.mxu1 %vm643_vm14, %v1488_v34  ;;  %vm627_vm14 = vcmp.gt.f32.partialorder %v534_v56, 0.0 }
 0x167   : > { %1346 = vmatpush1.msk.msra.mxu1 %vm642_vm15, %v1488_v34  ;;  %vm626_vm15 = vcmp.gt.f32.partialorder %v532_v55, 0.0 }
 0x168   : > { %1347 = vmatprep.subr.msk.mxu1 %vm641_vm0, %v1488_v34 }
 0x169   : > { %1348 = vmatpush1.msk.msra.mxu1 %vm640_vm1, %v1488_v34 }
 0x16a   : > { %1349 = vmatprep.subr.msk.mxu1 %vm639_vm2, %v1488_v34 }
 0x16b   : > { %1350 = vmatpush1.msk.msra.mxu1 %vm638_vm3, %v1488_v34 }
 0x16c   : > { %1351 = vmatprep.subr.msk.mxu1 %vm637_vm4, %v1488_v34 }
 0x16d   : > { %1352 = vmatpush1.msk.msra.mxu1 %vm636_vm5, %v1488_v34 }
 0x16e   : > { %1353 = vmatprep.subr.msk.mxu1 %vm635_vm6, %v1488_v34 }
 0x16f   : > { %1354 = vmatpush1.msk.msra.mxu1 %vm634_vm7, %v1488_v34 }
 0x170   : > { %1355 = vmatprep.subr.msk.mxu1 %vm633_vm8, %v1488_v34 }
 0x171   : > { %1356 = vmatpush1.msk.msra.mxu1 %vm632_vm9, %v1488_v34 }
 0x172   : > { %1357 = vmatprep.subr.msk.mxu1 %vm631_vm10, %v1488_v34 }
 0x173   : > { %1358 = vmatpush1.msk.msra.mxu1 %vm630_vm11, %v1488_v34 }
 0x174   : > { %1359 = vmatprep.subr.msk.mxu1 %vm629_vm12, %v1488_v34 }
 0x175   : > { %1360 = vmatpush1.msk.msra.mxu1 %vm628_vm13, %v1488_v34 }
 0x176   : > { %1361 = vmatprep.subr.msk.mxu1 %vm627_vm14, %v1488_v34 }
 0x177   : > { %1362 = vmatpush1.msk.msra.mxu1 %vm626_vm15, %v1488_v34 }
 0x178   : > { %899 = vmatmul.mubr.f32.vlgmr.msra.gmra.mxu1 %v722_v52 }
 0x179   : > { %904 = vmatprep.mubr.f32.mxu1 %v1486_v32 }
 0x17c   : > { %905 = vmatmul.mubr.f32.gmra.mxu1 %v723_v51 }
 0x17d   : > { %910 = vmatprep.mubr.f32.mxu1 %v1486_v32 }
 0x180   : > { %911 = vmatmul.mubr.f32.gmra.mxu1 %v724_v53 }
 0x181   : > { %916 = vmatprep.mubr.f32.mxu1 %v1486_v32 }
 0x184   : > { %917 = vmatmul.mubr.f32.gmra.mxu1 %v725_v54  ;;  %v787_v54 = vpop.permute.xlu0 %786 }
 0x185   : > { %922 = vmatprep.mubr.f32.mxu1 %v1486_v32 }
 0x188   : > { %923 = vmatmul.mubr.f32.gmra.mxu1 %v726_v9 }
 0x189   : > { %928 = vmatprep.mubr.f32.mxu1 %v1486_v32 }
 0x18c   : > { %929 = vmatmul.mubr.f32.gmra.mxu1 %v727_v10 }
 0x18d   : > { %934 = vmatprep.mubr.f32.mxu1 %v1486_v32 }
 0x190   : > { %935 = vmatmul.mubr.f32.gmra.mxu1 %v728_v11 }
 0x191   : > { %940 = vmatprep.mubr.f32.mxu1 %v1486_v32 }
 0x194   : > { %941 = vmatmul.mubr.f32.gmra.mxu1 %v729_v12 }
 0x195   : > { %946 = vmatprep.mubr.f32.mxu1 %v1486_v32 }
 0x198   : > { %947 = vmatmul.mubr.f32.gmra.mxu1 %v730_v13 }
 0x199   : > { %952 = vmatprep.mubr.f32.mxu1 %v1486_v32 }
 0x19c   : > { %953 = vmatmul.mubr.f32.gmra.mxu1 %v731_v14 }
 0x19d   : > { %958 = vmatprep.mubr.f32.mxu1 %v1486_v32 }
 0x1a0   : > { %959 = vmatmul.mubr.f32.gmra.mxu1 %v732_v15 }
 0x1a1   : > { %964 = vmatprep.mubr.f32.mxu1 %v1486_v32 }
 0x1a4   : > { %965 = vmatmul.mubr.f32.gmra.mxu1 %v733_v16 }
 0x1a5   : > { %970 = vmatprep.mubr.f32.mxu1 %v1486_v32 }
 0x1a8   : > { %971 = vmatmul.mubr.f32.gmra.mxu1 %v734_v17  ;;  %v792_v17 = vpop.permute.xlu1 %791 }
 0x1a9   : > { %976 = vmatprep.mubr.f32.mxu1 %v1486_v32 }
 0x1ac   : > { %977 = vmatmul.mubr.f32.gmra.mxu1 %v735_v18 }
 0x1ad   : > { %982 = vmatprep.mubr.f32.mxu1 %v1486_v32 }
 0x1b0   : > { %983 = vmatmul.mubr.f32.gmra.mxu1 %v736_v19 }
 0x1b1   : > { %988 = vmatprep.mubr.f32.mxu1 %v1486_v32 }
 0x1b4   : > { %989 = vmatmul.mubr.f32.gmra.mxu1 %v737_v20 }
 0x238   : > { %v900_v22 = vpop.f32.mrf.mxu1 }
 0x239   : > { %v901_v23 = vadd.f32 %v900_v22, %v757_v21 }
 0x23a   : > { %v902_v24 = vpop.f32.mrf.mxu1 }
 0x23b   : > { %vm995_vm0 = vcmp.gt.f32.partialorder %v901_v23, 0.0  ;;  %v1027_v25 = vmul.f32 0.2, %v901_v23  ;;  %v903_v26 = vadd.f32 %v902_v24, %v757_v21 }
 0x23c   : > { %v906_v28 = vpop.f32.mrf.mxu1 }
 0x23d   : > { %v1059_v29 = vsel %vm995_vm0, %v901_v23, %v1027_v25  ;;  %vm996_vm1 = vcmp.gt.f32.partialorder %v903_v26, 0.0  ;;  %v1028_v30 = vmul.f32 0.2, %v903_v26  ;;  %v907_v31 = vadd.f32 %v906_v28, %v762_v27 }
 0x23e   : > { %1091 = vst [vmem:[%s2000_s10] sm:$0xff] %v1059_v29  ;;  %v908_v32 = vpop.f32.mrf.mxu1 }
 0x23f   : > { %v1060_v33 = vsel %vm996_vm1, %v903_v26, %v1028_v30  ;;  %vm997_vm2 = vcmp.gt.f32.partialorder %v907_v31, 0.0  ;;  %v1029_v34 = vmul.f32 0.2, %v907_v31  ;;  %v909_v35 = vadd.f32 %v908_v32, %v762_v27  ;;  %v797_v26 = vpop.permute.xlu0 %796 }
 0x240   : > { %1092 = vst [vmem:[%s2000_s10 + $0x8] sm:$0xff] %v1060_v33  ;;  %v912_v37 = vpop.f32.mrf.mxu1 }
 0x241   : > { %v1061_v38 = vsel %vm997_vm2, %v907_v31, %v1029_v34  ;;  %vm998_vm3 = vcmp.gt.f32.partialorder %v909_v35, 0.0  ;;  %v1030_v39 = vmul.f32 0.2, %v909_v35  ;;  %v913_v40 = vadd.f32 %v912_v37, %v767_v36 }
 0x242   : > { %1093 = vst [vmem:[%s2000_s10 + $0x10] sm:$0xff] %v1061_v38  ;;  %v914_v41 = vpop.f32.mrf.mxu1 }
 0x243   : > { %v1062_v42 = vsel %vm998_vm3, %v909_v35, %v1030_v39  ;;  %vm999_vm4 = vcmp.gt.f32.partialorder %v913_v40, 0.0  ;;  %v1031_v43 = vmul.f32 0.2, %v913_v40  ;;  %v915_v44 = vadd.f32 %v914_v41, %v767_v36  ;;  %v802_v35 = vpop.permute.xlu1 %801 }
 0x244   : > { %1094 = vst [vmem:[%s2000_s10 + $0x18] sm:$0xff] %v1062_v42  ;;  %v918_v46 = vpop.f32.mrf.mxu1 }
 0x245   : > { %v1063_v47 = vsel %vm999_vm4, %v913_v40, %v1031_v43  ;;  %vm1000_vm5 = vcmp.gt.f32.partialorder %v915_v44, 0.0  ;;  %v1032_v48 = vmul.f32 0.2, %v915_v44  ;;  %v919_v49 = vadd.f32 %v918_v46, %v772_v45 }
 0x246   : > { %1095 = vst [vmem:[%s2000_s10 + $0x20] sm:$0xff] %v1063_v47  ;;  %v920_v50 = vpop.f32.mrf.mxu1 }
 0x247   : > { %v1064_v4 = vsel %vm1000_vm5, %v915_v44, %v1032_v48  ;;  %vm1001_vm6 = vcmp.gt.f32.partialorder %v919_v49, 0.0  ;;  %v1033_v3 = vmul.f32 0.2, %v919_v49  ;;  %v921_v5 = vadd.f32 %v920_v50, %v772_v45  ;;  %v807_v44 = vpop.permute.xlu0 %806 }
 0x248   : > { %1096 = vst [vmem:[%s2000_s10 + $0x28] sm:$0xff] %v1064_v4  ;;  %v924_v1 = vpop.f32.mrf.mxu1 }
 0x249   : > { %v1065_v0 = vsel %vm1001_vm6, %v919_v49, %v1033_v3  ;;  %vm1002_vm7 = vcmp.gt.f32.partialorder %v921_v5, 0.0  ;;  %v1034_v6 = vmul.f32 0.2, %v921_v5  ;;  %v925_v63 = vadd.f32 %v924_v1, %v777_v2 }
 0x24a   : > { %1097 = vst [vmem:[%s2000_s10 + $0x30] sm:$0xff] %v1065_v0  ;;  %v926_v62 = vpop.f32.mrf.mxu1 }
 0x24b   : > { %v1066_v61 = vsel %vm1002_vm7, %v921_v5, %v1034_v6  ;;  %vm1003_vm8 = vcmp.gt.f32.partialorder %v925_v63, 0.0  ;;  %v1035_v7 = vmul.f32 0.2, %v925_v63  ;;  %v927_v60 = vadd.f32 %v926_v62, %v777_v2  ;;  %v812_v5 = vpop.permute.xlu1 %811 }
 0x24c   : > { %1098 = vst [vmem:[%s2000_s10 + $0x38] sm:$0xff] %v1066_v61  ;;  %v930_v58 = vpop.f32.mrf.mxu1 }
 0x24d   : > { %v1067_v8 = vsel %vm1003_vm8, %v925_v63, %v1035_v7  ;;  %vm1004_vm9 = vcmp.gt.f32.partialorder %v927_v60, 0.0  ;;  %v1036_v57 = vmul.f32 0.2, %v927_v60  ;;  %v931_v56 = vadd.f32 %v930_v58, %v782_v59 }
 0x24e   : > { %1099 = vst [vmem:[%s2000_s10 + $0x40] sm:$0xff] %v1067_v8  ;;  %v932_v55 = vpop.f32.mrf.mxu1 }
 0x24f   : > { %v1068_v52 = vsel %vm1004_vm9, %v927_v60, %v1036_v57  ;;  %vm1005_vm10 = vcmp.gt.f32.partialorder %v931_v56, 0.0  ;;  %v1037_v51 = vmul.f32 0.2, %v931_v56  ;;  %v933_v53 = vadd.f32 %v932_v55, %v782_v59  ;;  %v817_v60 = vpop.permute.xlu0 %816 }
 0x250   : > { %1100 = vst [vmem:[%s2000_s10 + $0x48] sm:$0xff] %v1068_v52  ;;  %v936_v9 = vpop.f32.mrf.mxu1 }
 0x251   : > { %v1069_v10 = vsel %vm1005_vm10, %v931_v56, %v1037_v51  ;;  %vm1006_vm11 = vcmp.gt.f32.partialorder %v933_v53, 0.0  ;;  %v1038_v11 = vmul.f32 0.2, %v933_v53  ;;  %v937_v12 = vadd.f32 %v936_v9, %v787_v54 }
 0x252   : > { %1101 = vst [vmem:[%s2000_s10 + $0x50] sm:$0xff] %v1069_v10  ;;  %v938_v13 = vpop.f32.mrf.mxu1 }
 0x253   : > { %v1070_v14 = vsel %vm1006_vm11, %v933_v53, %v1038_v11  ;;  %vm1007_vm12 = vcmp.gt.f32.partialorder %v937_v12, 0.0  ;;  %v1039_v15 = vmul.f32 0.2, %v937_v12  ;;  %v939_v16 = vadd.f32 %v938_v13, %v787_v54  ;;  %v822_v53 = vpop.permute.xlu1 %821 }
 0x254   : > { %1102 = vst [vmem:[%s2000_s10 + $0x58] sm:$0xff] %v1070_v14  ;;  %v942_v18 = vpop.f32.mrf.mxu1 }
 0x255   : > { %v1071_v19 = vsel %vm1007_vm12, %v937_v12, %v1039_v15  ;;  %vm1008_vm13 = vcmp.gt.f32.partialorder %v939_v16, 0.0  ;;  %v1040_v20 = vmul.f32 0.2, %v939_v16  ;;  %v943_v21 = vadd.f32 %v942_v18, %v792_v17 }
 0x256   : > { %1103 = vst [vmem:[%s2000_s10 + $0x60] sm:$0xff] %v1071_v19  ;;  %v944_v22 = vpop.f32.mrf.mxu1 }
 0x257   : > { %v1072_v23 = vsel %vm1008_vm13, %v939_v16, %v1040_v20  ;;  %vm1009_vm14 = vcmp.gt.f32.partialorder %v943_v21, 0.0  ;;  %v1041_v24 = vmul.f32 0.2, %v943_v21  ;;  %v945_v25 = vadd.f32 %v944_v22, %v792_v17  ;;  %v827_v16 = vpop.permute.xlu0 %826 }
 0x258   : > { %1104 = vst [vmem:[%s2000_s10 + $0x68] sm:$0xff] %v1072_v23  ;;  %v948_v27 = vpop.f32.mrf.mxu1 }
 0x259   : > { %v1073_v28 = vsel %vm1009_vm14, %v943_v21, %v1041_v24  ;;  %vm1010_vm15 = vcmp.gt.f32.partialorder %v945_v25, 0.0  ;;  %v1042_v29 = vmul.f32 0.2, %v945_v25  ;;  %v949_v30 = vadd.f32 %v948_v27, %v797_v26 }
 0x25a   : > { %1105 = vst [vmem:[%s2000_s10 + $0x70] sm:$0xff] %v1073_v28  ;;  %v950_v31 = vpop.f32.mrf.mxu1 }
 0x25b   : > { %v1074_v32 = vsel %vm1010_vm15, %v945_v25, %v1042_v29  ;;  %vm1011_vm0 = vcmp.gt.f32.partialorder %v949_v30, 0.0  ;;  %v1043_v33 = vmul.f32 0.2, %v949_v30  ;;  %v951_v34 = vadd.f32 %v950_v31, %v797_v26  ;;  %v832_v25 = vpop.permute.xlu1 %831 }
 0x25c   : > { %1106 = vst [vmem:[%s2000_s10 + $0x78] sm:$0xff] %v1074_v32  ;;  %v954_v36 = vpop.f32.mrf.mxu1 }
 0x25d   : > { %v1075_v37 = vsel %vm1011_vm0, %v949_v30, %v1043_v33  ;;  %vm1012_vm1 = vcmp.gt.f32.partialorder %v951_v34, 0.0  ;;  %v1044_v38 = vmul.f32 0.2, %v951_v34  ;;  %v955_v39 = vadd.f32 %v954_v36, %v802_v35 }
 0x25e   : > { %1107 = vst [vmem:[%s2000_s10 + $0x80] sm:$0xff] %v1075_v37  ;;  %v956_v40 = vpop.f32.mrf.mxu1  ;;  %v1147_v37 = vld [vmem:[%s2000_s10] sm:$0xff] (%p1567_p6) }
 0x25f   : > { %v1076_v41 = vsel %vm1012_vm1, %v951_v34, %v1044_v38  ;;  %vm1013_vm2 = vcmp.gt.f32.partialorder %v955_v39, 0.0  ;;  %v1045_v42 = vmul.f32 0.2, %v955_v39  ;;  %v957_v43 = vadd.f32 %v956_v40, %v802_v35  ;;  %v1149_v38 = vld [vmem:[%s2000_s10 + $0x8] sm:$0xff] (%p1567_p6)  ;;  %v1153_v40 = vld [vmem:[%s2000_s10 + $0x18] sm:$0xff] (%p1567_p6)  ;;  %1148 = vst [vmem:[%s2050_s15] sm:$0xff] (%p1567_p6), %v1147_v37 }
 0x260   : > { %1108 = vst [vmem:[%s2000_s10 + $0x88] sm:$0xff] %v1076_v41  ;;  %v960_v45 = vpop.f32.mrf.mxu1  ;;  %v1155_v41 = vld [vmem:[%s2000_s10 + $0x20] sm:$0xff] (%p1567_p6)  ;;  %1150 = vst [vmem:[%s2050_s15 + $0x8] sm:$0xff] (%p1567_p6), %v1149_v38 }
 0x261   : > { %v1077_v46 = vsel %vm1013_vm2, %v955_v39, %v1045_v42  ;;  %vm1014_vm3 = vcmp.gt.f32.partialorder %v957_v43, 0.0  ;;  %v1046_v47 = vmul.f32 0.2, %v957_v43  ;;  %v961_v48 = vadd.f32 %v960_v45, %v807_v44  ;;  %v1151_v39 = vld [vmem:[%s2000_s10 + $0x10] sm:$0xff] (%p1567_p6)  ;;  %v1157_v42 = vld [vmem:[%s2000_s10 + $0x28] sm:$0xff] (%p1567_p6)  ;;  %v1163_v45 = vld [vmem:[%s2000_s10 + $0x40] sm:$0xff] (%p1567_p6) }
 0x262   : > { %1109 = vst [vmem:[%s2000_s10 + $0x90] sm:$0xff] %v1077_v46  ;;  %v962_v49 = vpop.f32.mrf.mxu1  ;;  %v1165_v46 = vld [vmem:[%s2000_s10 + $0x48] sm:$0xff] (%p1567_p6)  ;;  %1152 = vst [vmem:[%s2050_s15 + $0x40] sm:$0xff] (%p1567_p6), %v1151_v39 }
 0x263   : > { %v1078_v50 = vsel %vm1014_vm3, %v957_v43, %v1046_v47  ;;  %vm1015_vm4 = vcmp.gt.f32.partialorder %v961_v48, 0.0  ;;  %v1047_v4 = vmul.f32 0.2, %v961_v48  ;;  %v963_v3 = vadd.f32 %v962_v49, %v807_v44  ;;  %v1159_v43 = vld [vmem:[%s2000_s10 + $0x30] sm:$0xff] (%p1567_p6)  ;;  %v1161_v44 = vld [vmem:[%s2000_s10 + $0x38] sm:$0xff] (%p1567_p6)  ;;  %1154 = vst [vmem:[%s2050_s15 + $0x48] sm:$0xff] (%p1567_p6), %v1153_v40 }
 0x264   : > { %1110 = vst [vmem:[%s2000_s10 + $0x98] sm:$0xff] %v1078_v50  ;;  %v966_v2 = vpop.f32.mrf.mxu1  ;;  %v1167_v47 = vld [vmem:[%s2000_s10 + $0x50] sm:$0xff] (%p1567_p6)  ;;  %1156 = vst [vmem:[%s2050_s15 + $0x80] sm:$0xff] (%p1567_p6), %v1155_v41  ;;  %v1171_v49 = vld [vmem:[%s2000_s10 + $0x60] sm:$0xff] (%p1567_p6) }
 0x265   : > { %v1079_v1 = vsel %vm1015_vm4, %v961_v48, %v1047_v4  ;;  %vm1016_vm5 = vcmp.gt.f32.partialorder %v963_v3, 0.0  ;;  %v1048_v0 = vmul.f32 0.2, %v963_v3  ;;  %v967_v6 = vadd.f32 %v966_v2, %v812_v5  ;;  %v1169_v48 = vld [vmem:[%s2000_s10 + $0x58] sm:$0xff] (%p1567_p6)  ;;  %1158 = vst [vmem:[%s2050_s15 + $0x88] sm:$0xff] (%p1567_p6), %v1157_v42  ;;  %1160 = vst [vmem:[%s2050_s15 + $0xc0] sm:$0xff] (%p1567_p6), %v1159_v43 }
 0x266   : > { %1111 = vst [vmem:[%s2000_s10 + $0xa0] sm:$0xff] %v1079_v1  ;;  %v968_v63 = vpop.f32.mrf.mxu1  ;;  %1162 = vst [vmem:[%s2050_s15 + $0xc8] sm:$0xff] (%p1567_p6), %v1161_v44  ;;  %v1173_v50 = vld [vmem:[%s2000_s10 + $0x68] sm:$0xff] (%p1567_p6)  ;;  %v1175_v4 = vld [vmem:[%s2000_s10 + $0x70] sm:$0xff] (%p1567_p6) }
 0x267   : > { %v1080_v62 = vsel %vm1016_vm5, %v963_v3, %v1048_v0  ;;  %vm1017_vm6 = vcmp.gt.f32.partialorder %v967_v6, 0.0  ;;  %v1049_v61 = vmul.f32 0.2, %v967_v6  ;;  %v969_v7 = vadd.f32 %v968_v63, %v812_v5  ;;  %1164 = vst [vmem:[%s2050_s15 + $0x100] sm:$0xff] (%p1567_p6), %v1163_v45  ;;  %1166 = vst [vmem:[%s2050_s15 + $0x108] sm:$0xff] (%p1567_p6), %v1165_v46  ;;  %v1177_v3 = vld [vmem:[%s2000_s10 + $0x78] sm:$0xff] (%p1567_p6) }
 0x268   : > { %1112 = vst [vmem:[%s2000_s10 + $0xa8] sm:$0xff] %v1080_v62  ;;  %v972_v59 = vpop.f32.mrf.mxu1  ;;  %1168 = vst [vmem:[%s2050_s15 + $0x140] sm:$0xff] (%p1567_p6), %v1167_v47  ;;  %v1179_v5 = vld [vmem:[%s2000_s10 + $0x80] sm:$0xff] (%p1567_p6)  ;;  %v1181_v2 = vld [vmem:[%s2000_s10 + $0x88] sm:$0xff] (%p1567_p6) }
 0x269   : > { %v1081_v58 = vsel %vm1017_vm6, %v967_v6, %v1049_v61  ;;  %vm1018_vm7 = vcmp.gt.f32.partialorder %v969_v7, 0.0  ;;  %v1050_v8 = vmul.f32 0.2, %v969_v7  ;;  %v973_v57 = vadd.f32 %v972_v59, %v817_v60  ;;  %1170 = vst [vmem:[%s2050_s15 + $0x148] sm:$0xff] (%p1567_p6), %v1169_v48  ;;  %1172 = vst [vmem:[%s2050_s15 + $0x180] sm:$0xff] (%p1567_p6), %v1171_v49  ;;  %v1183_v1 = vld [vmem:[%s2000_s10 + $0x90] sm:$0xff] (%p1567_p6) }
 0x26a   : > { %1113 = vst [vmem:[%s2000_s10 + $0xb0] sm:$0xff] %v1081_v58  ;;  %v974_v56 = vpop.f32.mrf.mxu1  ;;  %1174 = vst [vmem:[%s2050_s15 + $0x188] sm:$0xff] (%p1567_p6), %v1173_v50 }
 0x26b   : > { %v1082_v55 = vsel %vm1018_vm7, %v969_v7, %v1050_v8  ;;  %vm1019_vm8 = vcmp.gt.f32.partialorder %v973_v57, 0.0  ;;  %v1051_v52 = vmul.f32 0.2, %v973_v57  ;;  %v975_v51 = vadd.f32 %v974_v56, %v817_v60  ;;  %1176 = vst [vmem:[%s2050_s15 + $0x1c0] sm:$0xff] (%p1567_p6), %v1175_v4  ;;  %1178 = vst [vmem:[%s2050_s15 + $0x1c8] sm:$0xff] (%p1567_p6), %v1177_v3  ;;  %v1185_v0 = vld [vmem:[%s2000_s10 + $0x98] sm:$0xff] (%p1567_p6) }
 0x26c   : > { %1114 = vst [vmem:[%s2000_s10 + $0xb8] sm:$0xff] %v1082_v55  ;;  %v978_v54 = vpop.f32.mrf.mxu1  ;;  %1180 = vst [vmem:[%s2050_s15 + $0x200] sm:$0xff] (%p1567_p6), %v1179_v5 }
 0x26d   : > { %v1083_v9 = vsel %vm1019_vm8, %v973_v57, %v1051_v52  ;;  %vm1020_vm9 = vcmp.gt.f32.partialorder %v975_v51, 0.0  ;;  %v1052_v10 = vmul.f32 0.2, %v975_v51  ;;  %v979_v11 = vadd.f32 %v978_v54, %v822_v53  ;;  %1182 = vst [vmem:[%s2050_s15 + $0x208] sm:$0xff] (%p1567_p6), %v1181_v2  ;;  %v1187_v6 = vld [vmem:[%s2000_s10 + $0xa0] sm:$0xff] (%p1567_p6)  ;;  %1184 = vst [vmem:[%s2050_s15 + $0x240] sm:$0xff] (%p1567_p6), %v1183_v1 }
 0x26e   : > { %1115 = vst [vmem:[%s2000_s10 + $0xc0] sm:$0xff] %v1083_v9  ;;  %v980_v12 = vpop.f32.mrf.mxu1  ;;  %1186 = vst [vmem:[%s2050_s15 + $0x248] sm:$0xff] (%p1567_p6), %v1185_v0 }
 0x26f   : > { %v1084_v13 = vsel %vm1020_vm9, %v975_v51, %v1052_v10  ;;  %vm1021_vm10 = vcmp.gt.f32.partialorder %v979_v11, 0.0  ;;  %v1053_v14 = vmul.f32 0.2, %v979_v11  ;;  %v981_v15 = vadd.f32 %v980_v12, %v822_v53  ;;  %1188 = vst [vmem:[%s2050_s15 + $0x280] sm:$0xff] (%p1567_p6), %v1187_v6  ;;  %v1189_v63 = vld [vmem:[%s2000_s10 + $0xa8] sm:$0xff] (%p1567_p6) }
 0x270   : > { %1116 = vst [vmem:[%s2000_s10 + $0xc8] sm:$0xff] %v1084_v13  ;;  %v984_v17 = vpop.f32.mrf.mxu1  ;;  %1190 = vst [vmem:[%s2050_s15 + $0x288] sm:$0xff] (%p1567_p6), %v1189_v63 }
 0x271   : > { %v1085_v18 = vsel %vm1021_vm10, %v979_v11, %v1053_v14  ;;  %vm1022_vm11 = vcmp.gt.f32.partialorder %v981_v15, 0.0  ;;  %v1054_v19 = vmul.f32 0.2, %v981_v15  ;;  %v985_v20 = vadd.f32 %v984_v17, %v827_v16  ;;  %v1191_v62 = vld [vmem:[%s2000_s10 + $0xb0] sm:$0xff] (%p1567_p6) }
 0x272   : > { %1117 = vst [vmem:[%s2000_s10 + $0xd0] sm:$0xff] %v1085_v18  ;;  %v986_v21 = vpop.f32.mrf.mxu1  ;;  %1192 = vst [vmem:[%s2050_s15 + $0x2c0] sm:$0xff] (%p1567_p6), %v1191_v62 }
 0x273   : > { %v1086_v22 = vsel %vm1022_vm11, %v981_v15, %v1054_v19  ;;  %vm1023_vm12 = vcmp.gt.f32.partialorder %v985_v20, 0.0  ;;  %v1055_v23 = vmul.f32 0.2, %v985_v20  ;;  %v987_v24 = vadd.f32 %v986_v21, %v827_v16  ;;  %v1193_v61 = vld [vmem:[%s2000_s10 + $0xb8] sm:$0xff] (%p1567_p6) }
 0x274   : > { %1118 = vst [vmem:[%s2000_s10 + $0xd8] sm:$0xff] %v1086_v22  ;;  %v990_v26 = vpop.f32.mrf.mxu1  ;;  %1194 = vst [vmem:[%s2050_s15 + $0x2c8] sm:$0xff] (%p1567_p6), %v1193_v61 }
 0x275   : > { %v1087_v27 = vsel %vm1023_vm12, %v985_v20, %v1055_v23  ;;  %vm1024_vm13 = vcmp.gt.f32.partialorder %v987_v24, 0.0  ;;  %v1056_v28 = vmul.f32 0.2, %v987_v24  ;;  %v991_v29 = vadd.f32 %v990_v26, %v832_v25  ;;  %v1195_v7 = vld [vmem:[%s2000_s10 + $0xc0] sm:$0xff] (%p1567_p6) }
 0x276   : > { %1119 = vst [vmem:[%s2000_s10 + $0xe0] sm:$0xff] %v1087_v27  ;;  %v992_v30 = vpop.f32.mrf.mxu1  ;;  %1196 = vst [vmem:[%s2050_s15 + $0x300] sm:$0xff] (%p1567_p6), %v1195_v7 }
 0x277   : > { %v1088_v31 = vsel %vm1024_vm13, %v987_v24, %v1056_v28  ;;  %vm1025_vm14 = vcmp.gt.f32.partialorder %v991_v29, 0.0  ;;  %v1057_v32 = vmul.f32 0.2, %v991_v29  ;;  %v993_v33 = vadd.f32 %v992_v30, %v832_v25  ;;  %v1197_v60 = vld [vmem:[%s2000_s10 + $0xc8] sm:$0xff] (%p1567_p6) }
 0x278   : > { %1120 = vst [vmem:[%s2000_s10 + $0xe8] sm:$0xff] %v1088_v31  ;;  %1129 = sbr.rel (!%p1567_p6) target bundleno = 645 (0x285), region = 67  ;;  %1198 = vst [vmem:[%s2050_s15 + $0x308] sm:$0xff] (%p1567_p6), %v1197_v60 }
 0x279   : > { %v1089_v34 = vsel %vm1025_vm14, %v991_v29, %v1057_v32  ;;  %vm1026_vm15 = vcmp.gt.f32.partialorder %v993_v33, 0.0  ;;  %v1058_v35 = vmul.f32 0.2, %v993_v33  ;;  %v1199_v59 = vld [vmem:[%s2000_s10 + $0xd0] sm:$0xff] (%p1567_p6) }
 0x27a   : > { %1121 = vst [vmem:[%s2000_s10 + $0xf0] sm:$0xff] %v1089_v34  ;;  %1200 = vst [vmem:[%s2050_s15 + $0x340] sm:$0xff] (%p1567_p6), %v1199_v59 }
 0x27b   : > { %v1090_v36 = vsel %vm1026_vm15, %v993_v33, %v1058_v35  ;;  %v1201_v58 = vld [vmem:[%s2000_s10 + $0xd8] sm:$0xff] (%p1567_p6) }
 0x27c   : > { %1122 = vst [vmem:[%s2000_s10 + $0xf8] sm:$0xff] %v1090_v36  ;;  %1202 = vst [vmem:[%s2050_s15 + $0x348] sm:$0xff] (%p1567_p6), %v1201_v58 }
 0x27d   : > { %v1203_v8 = vld [vmem:[%s2000_s10 + $0xe0] sm:$0xff] }
 0x27e   : > { %1204 = vst [vmem:[%s2050_s15 + $0x380] sm:$0xff] %v1203_v8 }
 0x27f   : > { %v1205_v57 = vld [vmem:[%s2000_s10 + $0xe8] sm:$0xff] }
 0x280   : > { %1206 = vst [vmem:[%s2050_s15 + $0x388] sm:$0xff] %v1205_v57 }
 0x281   : > { %v1207_v56 = vld [vmem:[%s2000_s10 + $0xf0] sm:$0xff] }
 0x282   : > { %1208 = vst [vmem:[%s2050_s15 + $0x3c0] sm:$0xff] %v1207_v56 }
 0x283   : > { %v1209_v55 = vld [vmem:[%s2000_s10 + $0xf8] sm:$0xff] }
 0x284   : > { %1210 = vst [vmem:[%s2050_s15 + $0x3c8] sm:$0xff] %v1209_v55 }
 0x285 PF: > { %s15_s24 = sadd.s32 1, %s1484_s24   ;;  %s2135_s18 = smov %s1464_s19 }
 0x286   : > { %p12_p12 = scmp.ge.s32.totalorder %s15_s24, 10   ;;  %s2136_s19 = smov %s1575_s8 }
 0x287   : > { %s2137_s20 = smov %s1476_s22  ;;  %s2138_s21 = smov %s1480_s23 }
 0x288   : > { %s2139_s22 = smov %s2142_s25  ;;  %s2140_s23 = smov %s2146_s26 }
 0x289   :  { %14 = sbr.rel (!%p12_p12) target bundleno = 4 (0x4), region = 121 }

// kernel: node_attention_forward.4
= control target key start
LH: loop header
LB: loop body
LE: loop exit
PB: predicated region body
PF: predicated region fallthrough
CT: control target
= control target key end

     0   :  { %s1469_s15 = smov 0   ;;  %s1471_s16 = smov 0   ;;  %s2264_s0 = inlined_call_operand.vmem [shape: f32[2,128,1024], index: 0, kind: input, shape index: {}]   ;;  %s2265_s1 = inlined_call_operand.vmem [shape: f32[128,128], index: 1, kind: input, shape index: {}]   ;;  %s2266_s2 = inlined_call_operand.vmem [shape: f32[128,1], index: 2, kind: input, shape index: {}]   ;;  %s2267_s3 = inlined_call_operand.vmem [shape: f32[2,128,1], index: 3, kind: output, shape index: {0}]   ;;  %s2268_s4 = inlined_call_operand.vmem [shape: f32[2,128,128], index: 4, kind: output, shape index: {1}]  }
   0x1   :  { %s1473_s17 = smov 0   ;;  %s1475_s18 = smov 0  }
   0x2   :  { %s1477_s19 = smov 0   ;;  %s1479_s20 = smov 0  }
   0x3   :  { %s1481_s21 = smov 0  }
   0x4 LB: > { %s24_s22 = sadd.s32 1, %s1431_s19  ;;  %s27_s23 = sadd.s32 1, %s1435_s20  ;;  %s1439_s21 = sphi %s1481_s21, %s15_s21   ;;  %s1435_s20 = sphi %s1479_s20, %s2278_s20   ;;  %s1431_s19 = sphi %s1477_s19, %s2277_s19   ;;  %s1427_s18 = sphi %s1475_s18, %s2276_s18   ;;  %s1423_s17 = sphi %s1473_s17, %s2275_s17   ;;  %s1419_s16 = sphi %s1471_s16, %s2274_s16   ;;  %s1415_s15 = sphi %s1469_s15, %s2273_s15  }
   0x5   : > { %p25_p0 = scmp.ge.s32.totalorder %s24_s22, 4  ;;  %p43_p1 = scmp.ne.s32.totalorder %s1419_s16, %s1415_s15 }
   0x6   : > { %p44_p2 = scmp.eq.s32.totalorder %s1439_s21, 0  ;;  %s36_s27 = sadd.s32 1, %s1419_s16 }
   0x7   : > { %s2280_s22 = smov (%p25_p0, %s24_s22), 0  ;;  %s2282_s23 = smov (!%p25_p0, %s27_s23), %s1435_s20 }
   0x8   : > { %p45_p3 = por %p44_p2, %p43_p1  ;;  %p29_p4 = scmp.ge.s32.totalorder %s2282_s23, 2 }
   0x9   : > { %s32_s24 = ssub.s32 %s1431_s19, %s2280_s22  ;;  %p1163_p6 = scmp.ge.s32.totalorder %s1439_s21, 8 }
   0xa   : > { %s2284_s23 = smov (%p29_p4, %s2282_s23), 0 }
   0xb   : > { %s31_s25 = ssub.s32 %s1435_s20, %s2284_s23  ;;  %169 = sbr.rel (%p1163_p6) target bundleno = 39 (0x27), region = 24 }
   0xc   : > { %s33_s26 = sor.u32 %s32_s24, %s31_s25 }
   0xd   : > { %p34_p5 = scmp.eq.s32.totalorder %s33_s26, 0 }
   0xf   : > { %s1520_s28 = scalar_select %p34_p5, %s1419_s16, %s36_s27  }
  0x10   : > { %172 = sbr.rel (!%p45_p3) target bundleno = 39 (0x27), region = 28  ;;  %s174_s29 = sand.u32 (%p45_p3), 1, %s1419_s16  }
  0x11   : > { %s1165_s30 = sshll.u32 (%p45_p3), %s1431_s19, 1  ;;  %s1164_s5 = sshll.u32 (%p45_p3), %s174_s29, 8 }
  0x12   : > { %s1166_s6 = sshll.u32 (%p45_p3), %s1435_s20, 7  ;;  %s1534_s12 = scalar_lea.vmem (%p45_p3), [#allocation2], %s1164_s5 }
  0x13   : > { %s179_s7 = sadd.s32 (%p45_p3), %s1166_s6, %s1165_s30 }
  0x14   : > { %s1167_s8 = sshll.u32 (%p45_p3), %s179_s7, 3 }
  0x15   : > { %s1529_s11 = scalar_lea.vmem %s2264_s0, %s1167_s8 }
  0x16   : > { %v194_v0 = vld [vmem:[%s1529_s11] sm:$0xff]  ;;  %v196_v1 = vld [vmem:[%s1529_s11 + $0x8] sm:$0xff] }
  0x17   : > { %v198_v2 = vld [vmem:[%s1529_s11 + $0x40] sm:$0xff]  ;;  %195 = vst [vmem:[%s1534_s12] sm:$0xff] %v194_v0  ;;  %197 = vst [vmem:[%s1534_s12 + $0x8] sm:$0xff] %v196_v1  ;;  %v200_v3 = vld [vmem:[%s1529_s11 + $0x48] sm:$0xff] }
  0x18   : > { %199 = vst [vmem:[%s1534_s12 + $0x10] sm:$0xff] %v198_v2  ;;  %v202_v4 = vld [vmem:[%s1529_s11 + $0x80] sm:$0xff]  ;;  %v204_v5 = vld [vmem:[%s1529_s11 + $0x88] sm:$0xff]  ;;  %201 = vst [vmem:[%s1534_s12 + $0x18] sm:$0xff] %v200_v3 }
  0x19   : > { %203 = vst [vmem:[%s1534_s12 + $0x20] sm:$0xff] %v202_v4  ;;  %205 = vst [vmem:[%s1534_s12 + $0x28] sm:$0xff] %v204_v5  ;;  %v206_v6 = vld [vmem:[%s1529_s11 + $0xc0] sm:$0xff]  ;;  %v208_v7 = vld [vmem:[%s1529_s11 + $0xc8] sm:$0xff] }
  0x1a   : > { %v210_v8 = vld [vmem:[%s1529_s11 + $0x100] sm:$0xff]  ;;  %207 = vst [vmem:[%s1534_s12 + $0x30] sm:$0xff] %v206_v6  ;;  %209 = vst [vmem:[%s1534_s12 + $0x38] sm:$0xff] %v208_v7  ;;  %v212_v9 = vld [vmem:[%s1529_s11 + $0x108] sm:$0xff] }
  0x1b   : > { %211 = vst [vmem:[%s1534_s12 + $0x40] sm:$0xff] %v210_v8  ;;  %v214_v10 = vld [vmem:[%s1529_s11 + $0x140] sm:$0xff]  ;;  %v216_v11 = vld [vmem:[%s1529_s11 + $0x148] sm:$0xff]  ;;  %213 = vst [vmem:[%s1534_s12 + $0x48] sm:$0xff] %v212_v9 }
  0x1c   : > { %215 = vst [vmem:[%s1534_s12 + $0x50] sm:$0xff] %v214_v10  ;;  %217 = vst [vmem:[%s1534_s12 + $0x58] sm:$0xff] %v216_v11  ;;  %v218_v12 = vld [vmem:[%s1529_s11 + $0x180] sm:$0xff]  ;;  %v220_v13 = vld [vmem:[%s1529_s11 + $0x188] sm:$0xff] }
  0x1d   : > { %v222_v14 = vld [vmem:[%s1529_s11 + $0x1c0] sm:$0xff]  ;;  %219 = vst [vmem:[%s1534_s12 + $0x60] sm:$0xff] %v218_v12  ;;  %221 = vst [vmem:[%s1534_s12 + $0x68] sm:$0xff] %v220_v13  ;;  %v224_v15 = vld [vmem:[%s1529_s11 + $0x1c8] sm:$0xff] }
  0x1e   : > { %223 = vst [vmem:[%s1534_s12 + $0x70] sm:$0xff] %v222_v14  ;;  %v226_v16 = vld [vmem:[%s1529_s11 + $0x200] sm:$0xff]  ;;  %v228_v17 = vld [vmem:[%s1529_s11 + $0x208] sm:$0xff]  ;;  %225 = vst [vmem:[%s1534_s12 + $0x78] sm:$0xff] %v224_v15 }
  0x1f   : > { %227 = vst [vmem:[%s1534_s12 + $0x80] sm:$0xff] %v226_v16  ;;  %229 = vst [vmem:[%s1534_s12 + $0x88] sm:$0xff] %v228_v17  ;;  %v230_v18 = vld [vmem:[%s1529_s11 + $0x240] sm:$0xff]  ;;  %v232_v19 = vld [vmem:[%s1529_s11 + $0x248] sm:$0xff] }
  0x20   : > { %v234_v20 = vld [vmem:[%s1529_s11 + $0x280] sm:$0xff]  ;;  %231 = vst [vmem:[%s1534_s12 + $0x90] sm:$0xff] %v230_v18  ;;  %233 = vst [vmem:[%s1534_s12 + $0x98] sm:$0xff] %v232_v19  ;;  %v236_v21 = vld [vmem:[%s1529_s11 + $0x288] sm:$0xff] }
  0x21   : > { %235 = vst [vmem:[%s1534_s12 + $0xa0] sm:$0xff] %v234_v20  ;;  %v238_v22 = vld [vmem:[%s1529_s11 + $0x2c0] sm:$0xff]  ;;  %v240_v23 = vld [vmem:[%s1529_s11 + $0x2c8] sm:$0xff]  ;;  %237 = vst [vmem:[%s1534_s12 + $0xa8] sm:$0xff] %v236_v21 }
  0x22   : > { %239 = vst [vmem:[%s1534_s12 + $0xb0] sm:$0xff] %v238_v22  ;;  %241 = vst [vmem:[%s1534_s12 + $0xb8] sm:$0xff] %v240_v23  ;;  %v242_v24 = vld [vmem:[%s1529_s11 + $0x300] sm:$0xff]  ;;  %v244_v25 = vld [vmem:[%s1529_s11 + $0x308] sm:$0xff] }
  0x23   : > { %v246_v26 = vld [vmem:[%s1529_s11 + $0x340] sm:$0xff]  ;;  %243 = vst [vmem:[%s1534_s12 + $0xc0] sm:$0xff] %v242_v24  ;;  %245 = vst [vmem:[%s1534_s12 + $0xc8] sm:$0xff] %v244_v25  ;;  %v248_v27 = vld [vmem:[%s1529_s11 + $0x348] sm:$0xff] }
  0x24   : > { %247 = vst [vmem:[%s1534_s12 + $0xd0] sm:$0xff] %v246_v26  ;;  %v250_v28 = vld [vmem:[%s1529_s11 + $0x380] sm:$0xff]  ;;  %v252_v29 = vld [vmem:[%s1529_s11 + $0x388] sm:$0xff]  ;;  %249 = vst [vmem:[%s1534_s12 + $0xd8] sm:$0xff] %v248_v27 }
  0x25   : > { %251 = vst [vmem:[%s1534_s12 + $0xe0] sm:$0xff] %v250_v28  ;;  %253 = vst [vmem:[%s1534_s12 + $0xe8] sm:$0xff] %v252_v29  ;;  %v254_v30 = vld [vmem:[%s1529_s11 + $0x3c0] sm:$0xff]  ;;  %v256_v31 = vld [vmem:[%s1529_s11 + $0x3c8] sm:$0xff] }
  0x26   : > { %255 = vst [vmem:[%s1534_s12 + $0xf0] sm:$0xff] %v254_v30  ;;  %257 = vst [vmem:[%s1534_s12 + $0xf8] sm:$0xff] %v256_v31 }
  0x27 PF: > { %p1168_p7 = scmp.ge.s32.totalorder %s1439_s21, 1  ;;  %p262_p8 = scmp.lt.s32.totalorder %s1439_s21, 9 }
  0x29   : > { %p263_p9 = pnand %p1168_p7, %p262_p8 }
  0x2a   : > { %s269_s13 = sand.u32 (!%p263_p9), 1, %s1415_s15   ;;  %p300_p10 = scmp.lt.s32.totalorder (!%p263_p9), %s1427_s18, 1 }
  0x2b   : > { %266 = sbr.rel (%p263_p9) target bundleno = 668 (0x29c), region = 51  ;;  %s1169_s14 = sshll.u32 (!%p263_p9), %s269_s13, 8 }
  0x2c   : > { %s1612_s6 = scalar_lea.vmem (!%p263_p9), [#allocation2], %s1169_s14  ;;  %p1174_p11 = scmp.ne.s32.totalorder (!%p263_p9), %s1423_s17, 0 }
  0x30   : > { %s2286_s18 = smov (!%p300_p10, %s1427_s18), 1  ;;  %314 = sbr.rel (%p1174_p11) target bundleno = 70 (0x46), region = 59 }
  0x31   : > { %s1306_s24 = sshll.u32 %s2286_s18, 7 }
  0x32   : > { %s1605_s27 = scalar_lea.vmem %s2267_s3, %s1306_s24  ;;  %s1610_s5 = scalar_lea.vmem %s2268_s4, %s1306_s24 }
  0x35   : > { %vm315_vm0 = vcmask 7168   ;;  %v1441_v32 = vmov 0.0  }
  0x36   : > { %316 = vst.msk [vmem:[%s1605_s27] sm:$0xff] %vm315_vm0, %v1441_v32  ;;  %317 = vst.msk [vmem:[%s1605_s27 + $0x8] sm:$0xff] %vm315_vm0, %v1441_v32 }
  0x37   : > { %318 = vst.msk [vmem:[%s1605_s27 + $0x10] sm:$0xff] %vm315_vm0, %v1441_v32  ;;  %319 = vst.msk [vmem:[%s1605_s27 + $0x18] sm:$0xff] %vm315_vm0, %v1441_v32 }
  0x38   : > { %320 = vst.msk [vmem:[%s1605_s27 + $0x20] sm:$0xff] %vm315_vm0, %v1441_v32  ;;  %321 = vst.msk [vmem:[%s1605_s27 + $0x28] sm:$0xff] %vm315_vm0, %v1441_v32 }
  0x39   : > { %322 = vst.msk [vmem:[%s1605_s27 + $0x30] sm:$0xff] %vm315_vm0, %v1441_v32  ;;  %323 = vst.msk [vmem:[%s1605_s27 + $0x38] sm:$0xff] %vm315_vm0, %v1441_v32 }
  0x3a   : > { %324 = vst.msk [vmem:[%s1605_s27 + $0x40] sm:$0xff] %vm315_vm0, %v1441_v32  ;;  %325 = vst.msk [vmem:[%s1605_s27 + $0x48] sm:$0xff] %vm315_vm0, %v1441_v32 }
  0x3b   : > { %326 = vst.msk [vmem:[%s1605_s27 + $0x50] sm:$0xff] %vm315_vm0, %v1441_v32  ;;  %327 = vst.msk [vmem:[%s1605_s27 + $0x58] sm:$0xff] %vm315_vm0, %v1441_v32 }
  0x3c   : > { %328 = vst.msk [vmem:[%s1605_s27 + $0x60] sm:$0xff] %vm315_vm0, %v1441_v32  ;;  %329 = vst.msk [vmem:[%s1605_s27 + $0x68] sm:$0xff] %vm315_vm0, %v1441_v32 }
  0x3d   : > { %330 = vst.msk [vmem:[%s1605_s27 + $0x70] sm:$0xff] %vm315_vm0, %v1441_v32  ;;  %331 = vst.msk [vmem:[%s1605_s27 + $0x78] sm:$0xff] %vm315_vm0, %v1441_v32 }
  0x3e   : > { %332 = vst [vmem:[%s1610_s5] sm:$0xff] %v1441_v32  ;;  %333 = vst [vmem:[%s1610_s5 + $0x8] sm:$0xff] %v1441_v32 }
  0x3f   : > { %334 = vst [vmem:[%s1610_s5 + $0x10] sm:$0xff] %v1441_v32  ;;  %335 = vst [vmem:[%s1610_s5 + $0x18] sm:$0xff] %v1441_v32 }
  0x40   : > { %336 = vst [vmem:[%s1610_s5 + $0x20] sm:$0xff] %v1441_v32  ;;  %337 = vst [vmem:[%s1610_s5 + $0x28] sm:$0xff] %v1441_v32 }
  0x41   : > { %338 = vst [vmem:[%s1610_s5 + $0x30] sm:$0xff] %v1441_v32  ;;  %339 = vst [vmem:[%s1610_s5 + $0x38] sm:$0xff] %v1441_v32 }
  0x42   : > { %340 = vst [vmem:[%s1610_s5 + $0x40] sm:$0xff] %v1441_v32  ;;  %341 = vst [vmem:[%s1610_s5 + $0x48] sm:$0xff] %v1441_v32 }
  0x43   : > { %342 = vst [vmem:[%s1610_s5 + $0x50] sm:$0xff] %v1441_v32  ;;  %343 = vst [vmem:[%s1610_s5 + $0x58] sm:$0xff] %v1441_v32 }
  0x44   : > { %344 = vst [vmem:[%s1610_s5 + $0x60] sm:$0xff] %v1441_v32  ;;  %345 = vst [vmem:[%s1610_s5 + $0x68] sm:$0xff] %v1441_v32 }
  0x45   : > { %346 = vst [vmem:[%s1610_s5 + $0x70] sm:$0xff] %v1441_v32  ;;  %347 = vst [vmem:[%s1610_s5 + $0x78] sm:$0xff] %v1441_v32 }
  0x46 PF: > { %v379_v33 = vld [vmem:[%s1612_s6 + $0xf8] sm:$0xff]  ;;  %v378_v34 = vld [vmem:[%s1612_s6 + $0xf0] sm:$0xff]  ;;  %v377_v35 = vld [vmem:[%s1612_s6 + $0xe8] sm:$0xff]  ;;  %v1442_v37 = vmov 0.0   ;;  %v1443_v39 = vmov 0   ;;  %s1207_s18 = sshll.u32 %s1423_s17, 8 }
  0x47   : > { %492 = vmatprep.subr.mxu0 %v379_v33  ;;  %v376_v36 = vld [vmem:[%s1612_s6 + $0xe0] sm:$0xff]  ;;  %556 = vmatprep.mubr.f32.mxu0 %v1442_v37  ;;  %v375_v38 = vld [vmem:[%s1612_s6 + $0xd8] sm:$0xff]  ;;  %v374_v40 = vld [vmem:[%s1612_s6 + $0xd0] sm:$0xff] }
  0x48   : > { %493 = vmatpush1.msra.mxu0 %v378_v34  ;;  %1383 = vset.pattern.permute.xlu0 %v1443_v39  ;;  %v373_v41 = vld [vmem:[%s1612_s6 + $0xc8] sm:$0xff]  ;;  %v372_v42 = vld [vmem:[%s1612_s6 + $0xc0] sm:$0xff]  ;;  %v371_v43 = vld [vmem:[%s1612_s6 + $0xb8] sm:$0xff] }
  0x49   : > { %494 = vmatprep.subr.mxu0 %v377_v35  ;;  %1384 = vset.pattern.permute.xlu1 %v1443_v39  ;;  %v370_v44 = vld [vmem:[%s1612_s6 + $0xb0] sm:$0xff]  ;;  %v369_v45 = vld [vmem:[%s1612_s6 + $0xa8] sm:$0xff]  ;;  %v368_v46 = vld [vmem:[%s1612_s6 + $0xa0] sm:$0xff] }
  0x4a   : > { %495 = vmatpush1.msra.mxu0 %v376_v36  ;;  %v367_v47 = vld [vmem:[%s1612_s6 + $0x98] sm:$0xff]  ;;  %v366_v48 = vld [vmem:[%s1612_s6 + $0x90] sm:$0xff]  ;;  %v365_v49 = vld [vmem:[%s1612_s6 + $0x88] sm:$0xff] }
  0x4b   : > { %496 = vmatprep.subr.mxu0 %v375_v38  ;;  %v364_v50 = vld [vmem:[%s1612_s6 + $0x80] sm:$0xff]  ;;  %v363_v51 = vld [vmem:[%s1612_s6 + $0x78] sm:$0xff]  ;;  %v410_v52 = vld [vmem:[%s2266_s2 + $0x70] sm:$0xff] }
  0x4c   : > { %497 = vmatpush1.msra.mxu0 %v374_v40  ;;  %v362_v53 = vld [vmem:[%s1612_s6 + $0x70] sm:$0xff]  ;;  %484 = vperm.xlu0 %1383, %v410_v52   ;;  %v408_v54 = vld [vmem:[%s2266_s2 + $0x60] sm:$0xff]  ;;  %v361_v55 = vld [vmem:[%s1612_s6 + $0x68] sm:$0xff] }
  0x4d   : > { %498 = vmatprep.subr.mxu0 %v373_v41  ;;  %v411_v56 = vld [vmem:[%s2266_s2 + $0x78] sm:$0xff]  ;;  %474 = vperm.xlu1 %1384, %v408_v54   ;;  %v360_v57 = vld [vmem:[%s1612_s6 + $0x60] sm:$0xff]  ;;  %v409_v58 = vld [vmem:[%s2266_s2 + $0x68] sm:$0xff] }
  0x4e   : > { %499 = vmatpush1.msra.mxu0 %v372_v42  ;;  %v359_v59 = vld [vmem:[%s1612_s6 + $0x58] sm:$0xff]  ;;  %v358_v60 = vld [vmem:[%s1612_s6 + $0x50] sm:$0xff]  ;;  %v357_v61 = vld [vmem:[%s1612_s6 + $0x48] sm:$0xff] }
  0x4f   : > { %500 = vmatprep.subr.mxu0 %v371_v43  ;;  %v406_v62 = vld [vmem:[%s2266_s2 + $0x50] sm:$0xff]  ;;  %v356_v63 = vld [vmem:[%s1612_s6 + $0x40] sm:$0xff]  ;;  %v407_v0 = vld [vmem:[%s2266_s2 + $0x58] sm:$0xff] }
  0x50   : > { %501 = vmatpush1.msra.mxu0 %v370_v44  ;;  %489 = vperm.xlu0 %1383, %v411_v56   ;;  %v355_v1 = vld [vmem:[%s1612_s6 + $0x38] sm:$0xff]  ;;  %v354_v2 = vld [vmem:[%s1612_s6 + $0x30] sm:$0xff]  ;;  %v353_v3 = vld [vmem:[%s1612_s6 + $0x28] sm:$0xff] }
  0x51   : > { %502 = vmatprep.subr.mxu0 %v369_v45  ;;  %479 = vperm.xlu1 %1384, %v409_v58   ;;  %v404_v4 = vld [vmem:[%s2266_s2 + $0x40] sm:$0xff]  ;;  %v405_v6 = vld [vmem:[%s2266_s2 + $0x48] sm:$0xff]  ;;  %v351_v7 = vld [vmem:[%s1612_s6 + $0x18] sm:$0xff] }
  0x52   : > { %503 = vmatpush1.msra.mxu0 %v368_v46  ;;  %v352_v5 = vld [vmem:[%s1612_s6 + $0x20] sm:$0xff]  ;;  %v350_v8 = vld [vmem:[%s1612_s6 + $0x10] sm:$0xff]  ;;  %v349_v9 = vld [vmem:[%s1612_s6 + $0x8] sm:$0xff] }
  0x53   : > { %504 = vmatprep.subr.mxu0 %v367_v47  ;;  %v402_v10 = vld [vmem:[%s2266_s2 + $0x30] sm:$0xff]  ;;  %v348_v11 = vld [vmem:[%s1612_s6] sm:$0xff]  ;;  %v403_v12 = vld [vmem:[%s2266_s2 + $0x38] sm:$0xff]  ;;  %v750_v47 = vlaneseq }
  0x54   : > { %505 = vmatpush1.msra.mxu0 %v366_v48  ;;  %464 = vperm.xlu0 %1383, %v406_v62   ;;  %v380_v13 = vld [vmem:[%s2265_s1] sm:$0xff]  ;;  %v401_v15 = vld [vmem:[%s2266_s2 + $0x28] sm:$0xff]  ;;  %v398_v17 = vld [vmem:[%s2266_s2 + $0x10] sm:$0xff] }
  0x55   : > { %506 = vmatprep.subr.mxu0 %v365_v49  ;;  %469 = vperm.xlu1 %1384, %v407_v0   ;;  %v400_v14 = vld [vmem:[%s2266_s2 + $0x20] sm:$0xff]  ;;  %v381_v16 = vld [vmem:[%s2265_s1 + $0x8] sm:$0xff]  ;;  %v399_v18 = vld [vmem:[%s2266_s2 + $0x18] sm:$0xff] }
  0x56   : > { %507 = vmatpush1.msra.mxu0 %v364_v50  ;;  %v382_v19 = vld [vmem:[%s2265_s1 + $0x10] sm:$0xff]  ;;  %v396_v20 = vld [vmem:[%s2266_s2] sm:$0xff]  ;;  %v397_v21 = vld [vmem:[%s2266_s2 + $0x8] sm:$0xff]  ;;  %v751_v50 = vand.u32 127, %v750_v47 }
  0x57   : > { %508 = vmatprep.subr.mxu0 %v363_v51  ;;  %v383_v22 = vld [vmem:[%s2265_s1 + $0x18] sm:$0xff]  ;;  %v384_v23 = vld [vmem:[%s2265_s1 + $0x20] sm:$0xff]  ;;  %v385_v24 = vld [vmem:[%s2265_s1 + $0x28] sm:$0xff] }
  0x58   : > { %509 = vmatpush1.msra.mxu0 %v362_v53  ;;  %454 = vperm.xlu0 %1383, %v404_v4   ;;  %v386_v25 = vld [vmem:[%s2265_s1 + $0x30] sm:$0xff]  ;;  %v387_v26 = vld [vmem:[%s2265_s1 + $0x38] sm:$0xff]  ;;  %v388_v27 = vld [vmem:[%s2265_s1 + $0x40] sm:$0xff]  ;;  %v752_v52 = vadd.s32 128, %v751_v50  ;;  %v753_v53 = vstv %s1207_s18 }
  0x59   : > { %510 = vmatprep.subr.mxu0 %v361_v55  ;;  %459 = vperm.xlu1 %1384, %v405_v6   ;;  %v389_v28 = vld [vmem:[%s2265_s1 + $0x48] sm:$0xff]  ;;  %v390_v29 = vld [vmem:[%s2265_s1 + $0x50] sm:$0xff]  ;;  %v391_v30 = vld [vmem:[%s2265_s1 + $0x58] sm:$0xff]  ;;  %v1832_v56 = vadd.s32 %v753_v53, %v751_v50 }
  0x5a   : > { %511 = vmatpush1.msra.mxu0 %v360_v57  ;;  %v392_v31 = vld [vmem:[%s2265_s1 + $0x60] sm:$0xff]  ;;  %v393_v32 = vld [vmem:[%s2265_s1 + $0x68] sm:$0xff]  ;;  %v394_v33 = vld [vmem:[%s2265_s1 + $0x70] sm:$0xff]  ;;  %v1834_v57 = vadd.s32 %v753_v53, %v752_v52 }
  0x5b   : > { %512 = vmatprep.subr.mxu0 %v359_v59  ;;  %v395_v34 = vld [vmem:[%s2265_s1 + $0x78] sm:$0xff]  ;;  %vm756_vm2 = vcmp.lt.s32.totalorder %v1832_v56, 960 }
  0x5c   : > { %513 = vmatpush1.msra.mxu0 %v358_v60  ;;  %444 = vperm.xlu0 %1383, %v402_v10   ;;  %vm757_vm3 = vcmp.lt.s32.totalorder %v1834_v57, 960 }
  0x5d   : > { %514 = vmatprep.subr.mxu0 %v357_v61  ;;  %449 = vperm.xlu1 %1384, %v403_v12   ;;  %vm1851_vm7 = vmpackc.low %vm757_vm3, %vm757_vm3 }
  0x5e   : > { %515 = vmatpush1.msra.mxu0 %v356_v63 }
  0x5f   : > { %516 = vmatprep.subr.mxu0 %v355_v1 }
  0x60   : > { %517 = vmatpush1.msra.mxu0 %v354_v2  ;;  %434 = vperm.xlu0 %1383, %v400_v14  }
  0x61   : > { %518 = vmatprep.subr.mxu0 %v353_v3  ;;  %439 = vperm.xlu1 %1384, %v401_v15  }
  0x62   : > { %519 = vmatpush1.msra.mxu0 %v352_v5 }
  0x63   : > { %520 = vmatprep.subr.mxu0 %v351_v7 }
  0x64   : > { %521 = vmatpush1.msra.mxu0 %v350_v8  ;;  %424 = vperm.xlu0 %1383, %v398_v17  }
  0x65   : > { %522 = vmatprep.subr.mxu0 %v349_v9  ;;  %429 = vperm.xlu1 %1384, %v399_v18  }
  0x66   : > { %523 = vmatpush1.msra.mxu0 %v348_v11 }
  0x67   : > { %557 = vmatmul.mubr.f32.vlgmr.msra.gmra.mxu0 %v380_v13 }
  0x68   : > { %562 = vmatprep.mubr.f32.mxu0 %v1442_v37  ;;  %414 = vperm.xlu0 %1383, %v396_v20  }
  0x69   : > { %419 = vperm.xlu1 %1384, %v397_v21  }
  0x6b   : > { %563 = vmatmul.mubr.f32.gmra.mxu0 %v381_v16 }
  0x6c   : > { %568 = vmatprep.mubr.f32.mxu0 %v1442_v37 }
  0x6f   : > { %569 = vmatmul.mubr.f32.gmra.mxu0 %v382_v19 }
  0x70   : > { %574 = vmatprep.mubr.f32.mxu0 %v1442_v37 }
  0x73   : > { %575 = vmatmul.mubr.f32.gmra.mxu0 %v383_v22 }
  0x74   : > { %580 = vmatprep.mubr.f32.mxu0 %v1442_v37 }
  0x77   : > { %581 = vmatmul.mubr.f32.gmra.mxu0 %v384_v23 }
  0x78   : > { %586 = vmatprep.mubr.f32.mxu0 %v1442_v37 }
  0x7b   : > { %587 = vmatmul.mubr.f32.gmra.mxu0 %v385_v24 }
  0x7c   : > { %592 = vmatprep.mubr.f32.mxu0 %v1442_v37 }
  0x7f   : > { %593 = vmatmul.mubr.f32.gmra.mxu0 %v386_v25 }
  0x80   : > { %598 = vmatprep.mubr.f32.mxu0 %v1442_v37 }
  0x83   : > { %599 = vmatmul.mubr.f32.gmra.mxu0 %v387_v26 }
  0x84   : > { %604 = vmatprep.mubr.f32.mxu0 %v1442_v37 }
  0x87   : > { %605 = vmatmul.mubr.f32.gmra.mxu0 %v388_v27 }
  0x88   : > { %610 = vmatprep.mubr.f32.mxu0 %v1442_v37 }
  0x8b   : > { %611 = vmatmul.mubr.f32.gmra.mxu0 %v389_v28 }
  0x8c   : > { %616 = vmatprep.mubr.f32.mxu0 %v1442_v37 }
  0x8f   : > { %617 = vmatmul.mubr.f32.gmra.mxu0 %v390_v29 }
  0x90   : > { %622 = vmatprep.mubr.f32.mxu0 %v1442_v37 }
  0x93   : > { %623 = vmatmul.mubr.f32.gmra.mxu0 %v391_v30 }
  0x94   : > { %628 = vmatprep.mubr.f32.mxu0 %v1442_v37 }
  0x97   : > { %629 = vmatmul.mubr.f32.gmra.mxu0 %v392_v31 }
  0x98   : > { %634 = vmatprep.mubr.f32.mxu0 %v1442_v37 }
  0x9b   : > { %635 = vmatmul.mubr.f32.gmra.mxu0 %v393_v32 }
  0x9c   : > { %640 = vmatprep.mubr.f32.mxu0 %v1442_v37 }
  0x9f   : > { %641 = vmatmul.mubr.f32.gmra.mxu0 %v394_v33 }
  0xa0   : > { %646 = vmatprep.mubr.f32.mxu0 %v1442_v37 }
  0xa3   : > { %647 = vmatmul.mubr.f32.gmra.mxu0 %v395_v34 }
  0xc7   : > { %v1807_v35 = vpop.permute.xlu0 %484 }
  0xc8   : > { %v1809_v36 = vpop.permute.xlu1 %474 }
  0xcb   : > { %v1811_v38 = vpop.permute.xlu0 %489 }
  0xcc   : > { %v1813_v39 = vpop.permute.xlu1 %479 }
  0xcf   : > { %v1815_v40 = vpop.permute.xlu0 %464 }
  0xd0   : > { %v1817_v41 = vpop.permute.xlu1 %469 }
  0xd3   : > { %v1819_v42 = vpop.permute.xlu0 %454 }
  0xd4   : > { %v1821_v43 = vpop.permute.xlu1 %459 }
  0xd7   : > { %v1823_v44 = vpop.permute.xlu0 %444 }
  0xd8   : > { %v1825_v45 = vpop.permute.xlu1 %449 }
  0xdb   : > { %v1827_v46 = vpop.permute.xlu0 %434 }
  0xdc   : > { %v1829_v48 = vpop.permute.xlu1 %439 }
  0xdf   : > { %v425_v49 = vpop.permute.xlu0 %424 }
  0xe0   : > { %v430_v51 = vpop.permute.xlu1 %429 }
  0xe3   : > { %v415_v54 = vpop.permute.xlu0 %414 }
  0xe4   : > { %v420_v60 = vpop.permute.xlu1 %419 }
 0x127   : > { %v558_v55 = vpop.f32.mrf.mxu0 }
 0x128   : > { %v559_v58 = vadd.f32 %v558_v55, %v415_v54 }
 0x129   : > { %v560_v59 = vpop.f32.mrf.mxu0 }
 0x12a   : > { %vm653_vm1 = vcmp.gt.f32.partialorder %v559_v58, 0.0  ;;  %v561_v61 = vadd.f32 %v560_v59, %v415_v54 }
 0x12b   : > { %v1175_v62 = vsel %vm653_vm1, 1.0, %v1442_v37  ;;  %v564_v63 = vpop.f32.mrf.mxu0 }
 0x12c   : > { %vm654_vm4 = vcmp.gt.f32.partialorder %v561_v61, 0.0  ;;  %v565_v0 = vadd.f32 %v564_v63, %v420_v60  ;;  %v762_v4 = vsel %vm756_vm2, %v1175_v62, 0.0 }
 0x12d   : > { %v1176_v1 = vsel %vm654_vm4, 1.0, %v1442_v37  ;;  %v566_v2 = vpop.f32.mrf.mxu0 }
 0x12e   : > { %vm655_vm5 = vcmp.gt.f32.partialorder %v565_v0, 0.0  ;;  %v567_v3 = vadd.f32 %v566_v2, %v420_v60  ;;  %v763_v5 = vsel %vm757_vm3, %v1176_v1, 0.0 }
 0x12f   : > { %v1177_v6 = vsel %vm655_vm5, 1.0, %v1442_v37  ;;  %v570_v7 = vpop.f32.mrf.mxu0  ;;  %v810_v8 = vadd.f32 %v763_v5, %v762_v4 }
 0x130   : > { %v1845_v9 = vpack.c.bf16 %v1177_v6, %v1175_v62  ;;  %vm656_vm6 = vcmp.gt.f32.partialorder %v567_v3, 0.0  ;;  %v571_v10 = vadd.f32 %v570_v7, %v425_v49  ;;  %v764_v14 = vsel %vm756_vm2, %v1177_v6, 0.0 }
 0x131   : > { %v1178_v11 = vsel %vm656_vm6, 1.0, %v1442_v37  ;;  %v572_v12 = vpop.f32.mrf.mxu0  ;;  %811 = vadd.xlane.f32.xlu0 %v810_v8 }
 0x132   : > { %v1857_v15 = vpack.c.bf16 %v1178_v11, %v1176_v1  ;;  %vm657_vm8 = vcmp.gt.f32.partialorder %v571_v10, 0.0  ;;  %v573_v16 = vadd.f32 %v572_v12, %v425_v49  ;;  %v765_v17 = vsel %vm757_vm3, %v1178_v11, 0.0 }
 0x133   : > { %v1179_v18 = vsel %vm657_vm8, 1.0, %v1442_v37  ;;  %v576_v19 = vpop.f32.mrf.mxu0  ;;  %v813_v20 = vadd.f32 %v765_v17, %v764_v14 }
 0x134   : > { %vm658_vm9 = vcmp.gt.f32.partialorder %v573_v16, 0.0  ;;  %v577_v21 = vadd.f32 %v576_v19, %v430_v51  ;;  %1258 = vmatprep.mubr.msk.bf16.mxu0 %vm1851_vm7, %v1857_v15  ;;  %v766_v25 = vsel %vm756_vm2, %v1179_v18, 0.0 }
 0x135   : > { %v1180_v22 = vsel %vm658_vm9, 1.0, %v1442_v37  ;;  %v578_v23 = vpop.f32.mrf.mxu0  ;;  %814 = vadd.xlane.f32.xlu1 %v813_v20 }
 0x136   : > { %vm659_vm10 = vcmp.gt.f32.partialorder %v577_v21, 0.0  ;;  %v579_v24 = vadd.f32 %v578_v23, %v430_v51  ;;  %v767_v26 = vsel %vm757_vm3, %v1180_v22, 0.0 }
 0x137   : > { %v1181_v27 = vsel %vm659_vm10, 1.0, %v1442_v37  ;;  %v582_v28 = vpop.f32.mrf.mxu0  ;;  %v816_v29 = vadd.f32 %v767_v26, %v766_v25 }
 0x138   : > { %v1871_v30 = vpack.c.bf16 %v1181_v27, %v1179_v18  ;;  %vm660_vm11 = vcmp.gt.f32.partialorder %v579_v24, 0.0  ;;  %v583_v31 = vadd.f32 %v582_v28, %v1827_v46  ;;  %v768_v34 = vsel %vm756_vm2, %v1181_v27, 0.0 }
 0x139   : > { %v1182_v32 = vsel %vm660_vm11, 1.0, %v1442_v37  ;;  %v584_v33 = vpop.f32.mrf.mxu0  ;;  %817 = vadd.xlane.f32.xlu0 %v816_v29 }
 0x13a   : > { %v1877_v47 = vpack.c.bf16 %v1182_v32, %v1180_v22  ;;  %vm661_vm12 = vcmp.gt.f32.partialorder %v583_v31, 0.0  ;;  %v585_v49 = vadd.f32 %v584_v33, %v1827_v46  ;;  %v769_v50 = vsel %vm757_vm3, %v1182_v32, 0.0 }
 0x13b   : > { %v1183_v51 = vsel %vm661_vm12, 1.0, %v1442_v37  ;;  %v588_v52 = vpop.f32.mrf.mxu0  ;;  %v819_v53 = vadd.f32 %v769_v50, %v768_v34 }
 0x13c   : > { %vm662_vm13 = vcmp.gt.f32.partialorder %v585_v49, 0.0  ;;  %v589_v54 = vadd.f32 %v588_v52, %v1829_v48  ;;  %v770_v46 = vsel %vm756_vm2, %v1183_v51, 0.0 }
 0x13d   : > { %v1184_v55 = vsel %vm662_vm13, 1.0, %v1442_v37  ;;  %v590_v58 = vpop.f32.mrf.mxu0  ;;  %820 = vadd.xlane.f32.xlu0 %v819_v53 }
 0x13e   : > { %vm663_vm14 = vcmp.gt.f32.partialorder %v589_v54, 0.0  ;;  %v591_v59 = vadd.f32 %v590_v58, %v1829_v48  ;;  %v771_v60 = vsel %vm757_vm3, %v1184_v55, 0.0 }
 0x13f   : > { %v1185_v61 = vsel %vm663_vm14, 1.0, %v1442_v37  ;;  %v594_v62 = vpop.f32.mrf.mxu0  ;;  %v822_v63 = vadd.f32 %v771_v60, %v770_v46 }
 0x140   : > { %v1891_v0 = vpack.c.bf16 %v1185_v61, %v1183_v51  ;;  %vm664_vm15 = vcmp.gt.f32.partialorder %v591_v59, 0.0  ;;  %v595_v1 = vadd.f32 %v594_v62, %v1823_v44  ;;  %v772_v48 = vsel %vm756_vm2, %v1185_v61, 0.0 }
 0x141   : > { %v1186_v2 = vsel %vm664_vm15, 1.0, %v1442_v37  ;;  %v596_v3 = vpop.f32.mrf.mxu0  ;;  %823 = vadd.xlane.f32.xlu1 %v822_v63 }
 0x142   : > { %v1897_v4 = vpack.c.bf16 %v1186_v2, %v1184_v55  ;;  %vm665_vm0 = vcmp.gt.f32.partialorder %v595_v1, 0.0  ;;  %v597_v5 = vadd.f32 %v596_v3, %v1823_v44  ;;  %v773_v6 = vsel %vm757_vm3, %v1186_v2, 0.0 }
 0x143   : > { %v1187_v7 = vsel %vm665_vm0, 1.0, %v1442_v37  ;;  %v600_v8 = vpop.f32.mrf.mxu0  ;;  %v825_v10 = vadd.f32 %v773_v6, %v772_v48 }
 0x144   : > { %vm666_vm1 = vcmp.gt.f32.partialorder %v597_v5, 0.0  ;;  %v601_v11 = vadd.f32 %v600_v8, %v1825_v45  ;;  %1270 = vmatprep.mubr.msk.bf16.mxu1 %vm1851_vm7, %v1897_v4  ;;  %v774_v16 = vsel %vm756_vm2, %v1187_v7, 0.0 }
 0x145   : > { %v1908_v12 = vsel %vm666_vm1, 1.0, %v1442_v37  ;;  %v602_v14 = vpop.f32.mrf.mxu0  ;;  %826 = vadd.xlane.f32.xlu0 %v825_v10 }
 0x146   : > { %vm667_vm4 = vcmp.gt.f32.partialorder %v601_v11, 0.0  ;;  %v603_v44 = vadd.f32 %v602_v14, %v1825_v45  ;;  %v775_v17 = vsel %vm757_vm3, %v1908_v12, 0.0 }
 0x147   : > { %v1189_v18 = vsel %vm667_vm4, 1.0, %v1442_v37  ;;  %v606_v19 = vpop.f32.mrf.mxu0  ;;  %v828_v20 = vadd.f32 %v775_v17, %v774_v16 }
 0x148   : > { %v1917_v21 = vpack.c.bf16 %v1189_v18, %v1187_v7  ;;  %vm668_vm5 = vcmp.gt.f32.partialorder %v603_v44, 0.0  ;;  %v607_v22 = vadd.f32 %v606_v19, %v1819_v42  ;;  %v776_v25 = vsel %vm756_vm2, %v1189_v18, 0.0 }
 0x149   : > { %v1921_v23 = vsel %vm668_vm5, 1.0, %v1442_v37  ;;  %v608_v45 = vpop.f32.mrf.mxu0  ;;  %829 = vadd.xlane.f32.xlu1 %v828_v20 }
 0x14a   : > { %vm669_vm6 = vcmp.gt.f32.partialorder %v607_v22, 0.0  ;;  %v609_v24 = vadd.f32 %v608_v45, %v1819_v42  ;;  %v777_v26 = vsel %vm757_vm3, %v1921_v23, 0.0 }
 0x14b   : > { %v1930_v27 = vsel %vm669_vm6, 1.0, %v1442_v37  ;;  %v612_v28 = vpop.f32.mrf.mxu0  ;;  %v831_v29 = vadd.f32 %v777_v26, %v776_v25 }
 0x14c   : > { %vm670_vm8 = vcmp.gt.f32.partialorder %v609_v24, 0.0  ;;  %v613_v31 = vadd.f32 %v612_v28, %v1821_v43  ;;  %v778_v34 = vsel %vm756_vm2, %v1930_v27, 0.0 }
 0x14d   : > { %v1934_v32 = vsel %vm670_vm8, 1.0, %v1442_v37  ;;  %v614_v33 = vpop.f32.mrf.mxu0  ;;  %832 = vadd.xlane.f32.xlu0 %v831_v29 }
 0x14e   : > { %vm671_vm9 = vcmp.gt.f32.partialorder %v613_v31, 0.0  ;;  %v615_v42 = vadd.f32 %v614_v33, %v1821_v43  ;;  %v779_v49 = vsel %vm757_vm3, %v1934_v32, 0.0 }
 0x14f   : > { %v1944_v50 = vsel %vm671_vm9, 1.0, %v1442_v37  ;;  %v618_v51 = vpop.f32.mrf.mxu0  ;;  %v834_v52 = vadd.f32 %v779_v49, %v778_v34 }
 0x150   : > { %vm672_vm10 = vcmp.gt.f32.partialorder %v615_v42, 0.0  ;;  %v619_v53 = vadd.f32 %v618_v51, %v1815_v40  ;;  %v780_v58 = vsel %vm756_vm2, %v1944_v50, 0.0 }
 0x151   : > { %v1948_v54 = vsel %vm672_vm10, 1.0, %v1442_v37  ;;  %v620_v43 = vpop.f32.mrf.mxu0  ;;  %835 = vadd.xlane.f32.xlu1 %v834_v52  ;;  %vm2016_vm10 = vmpackc.low %vm756_vm2, %vm756_vm2 }
 0x152   : > { %vm673_vm11 = vcmp.gt.f32.partialorder %v619_v53, 0.0  ;;  %v621_v55 = vadd.f32 %v620_v43, %v1815_v40  ;;  %v781_v59 = vsel %vm757_vm3, %v1948_v54, 0.0 }
 0x153   : > { %v1958_v46 = vsel %vm673_vm11, 1.0, %v1442_v37  ;;  %v624_v60 = vpop.f32.mrf.mxu0  ;;  %v837_v61 = vadd.f32 %v781_v59, %v780_v58 }
 0x154   : > { %vm674_vm12 = vcmp.gt.f32.partialorder %v621_v55, 0.0  ;;  %v625_v62 = vadd.f32 %v624_v60, %v1817_v41  ;;  %v782_v2 = vsel %vm756_vm2, %v1958_v46, 0.0 }
 0x155   : > { %v1962_v63 = vsel %vm674_vm12, 1.0, %v1442_v37  ;;  %v626_v40 = vpop.f32.mrf.mxu0  ;;  %838 = vadd.xlane.f32.xlu0 %v837_v61 }
 0x156   : > { %vm675_vm13 = vcmp.gt.f32.partialorder %v625_v62, 0.0  ;;  %v627_v1 = vadd.f32 %v626_v40, %v1817_v41  ;;  %v783_v3 = vsel %vm757_vm3, %v1962_v63, 0.0 }
 0x157   : > { %v1972_v48 = vsel %vm675_vm13, 1.0, %v1442_v37  ;;  %v630_v5 = vpop.f32.mrf.mxu0  ;;  %v840_v6 = vadd.f32 %v783_v3, %v782_v2 }
 0x158   : > { %vm676_vm14 = vcmp.gt.f32.partialorder %v627_v1, 0.0  ;;  %v631_v7 = vadd.f32 %v630_v5, %v1809_v36  ;;  %v784_v11 = vsel %vm756_vm2, %v1972_v48, 0.0  ;;  %v1224_v5 = vpack.c.bf16 %v1972_v48, %v1958_v46 }
 0x159   : > { %v1976_v8 = vsel %vm676_vm14, 1.0, %v1442_v37  ;;  %v632_v41 = vpop.f32.mrf.mxu0  ;;  %841 = vadd.xlane.f32.xlu1 %v840_v6  ;;  %v1230_v6 = vpack.c.bf16 %v1944_v50, %v1930_v27  ;;  %v1233_v46 = vpack.c.bf16 %v1921_v23, %v1908_v12  ;;  %v796_v12 = vld [vmem:[%s1605_s27 + $0x10] sm:$0xff]  ;;  %v797_v27 = vld [vmem:[%s1605_s27 + $0x18] sm:$0xff] }
 0x15a   : > { %vm677_vm15 = vcmp.gt.f32.partialorder %v631_v7, 0.0  ;;  %v633_v10 = vadd.f32 %v632_v41, %v1809_v36  ;;  %v785_v14 = vsel %vm757_vm3, %v1976_v8, 0.0  ;;  %v1221_v57 = vpack.c.bf16 %v1976_v8, %v1962_v63  ;;  %v799_v8 = vld [vmem:[%s1605_s27 + $0x28] sm:$0xff] }
 0x15b   : > { %v1199_v44 = vsel %vm677_vm15, 1.0, %v1442_v37  ;;  %v636_v16 = vpop.f32.mrf.mxu0  ;;  %v843_v17 = vadd.f32 %v785_v14, %v784_v11  ;;  %v1227_v63 = vpack.c.bf16 %v1948_v54, %v1934_v32  ;;  %v798_v54 = vld [vmem:[%s1605_s27 + $0x20] sm:$0xff]  ;;  %v800_v11 = vld [vmem:[%s1605_s27 + $0x30] sm:$0xff] }
 0x15c   : > { %vm678_vm0 = vcmp.gt.f32.partialorder %v633_v10, 0.0  ;;  %v637_v18 = vadd.f32 %v636_v16, %v1813_v39  ;;  %v786_v22 = vsel %vm756_vm2, %v1199_v44, 0.0  ;;  %v801_v16 = vld [vmem:[%s1605_s27 + $0x38] sm:$0xff] }
 0x15d   : > { %v1200_v19 = vsel %vm678_vm0, 1.0, %v1442_v37  ;;  %v638_v20 = vpop.f32.mrf.mxu0  ;;  %844 = vadd.xlane.f32.xlu0 %v843_v17 }
 0x15e   : > { %vm679_vm1 = vcmp.gt.f32.partialorder %v637_v18, 0.0  ;;  %v639_v36 = vadd.f32 %v638_v20, %v1813_v39  ;;  %v787_v45 = vsel %vm757_vm3, %v1200_v19, 0.0  ;;  %v802_v18 = vld [vmem:[%s1605_s27 + $0x40] sm:$0xff] }
 0x15f   : > { %v1201_v24 = vsel %vm679_vm1, 1.0, %v1442_v37  ;;  %v642_v25 = vpop.f32.mrf.mxu0  ;;  %v846_v26 = vadd.f32 %v787_v45, %v786_v22 }
 0x160   : > { %vm680_vm4 = vcmp.gt.f32.partialorder %v639_v36, 0.0  ;;  %v643_v28 = vadd.f32 %v642_v25, %v1807_v35  ;;  %v788_v33 = vsel %vm756_vm2, %v1201_v24, 0.0  ;;  %v2046_v56 = vpack.c.bf16 %v1201_v24, %v1199_v44  ;;  %v803_v36 = vld [vmem:[%s1605_s27 + $0x48] sm:$0xff]  ;;  %v804_v24 = vld [vmem:[%s1605_s27 + $0x50] sm:$0xff] }
 0x161   : > { %v1202_v29 = vsel %vm680_vm4, 1.0, %v1442_v37  ;;  %v644_v31 = vpop.f32.mrf.mxu0  ;;  %847 = vadd.xlane.f32.xlu1 %v846_v26 }
 0x162   : > { %vm681_vm5 = vcmp.gt.f32.partialorder %v643_v28, 0.0  ;;  %v645_v39 = vadd.f32 %v644_v31, %v1807_v35  ;;  %v789_v42 = vsel %vm757_vm3, %v1202_v29, 0.0  ;;  %v805_v28 = vld [vmem:[%s1605_s27 + $0x58] sm:$0xff] }
 0x163   : > { %v1203_v34 = vsel %vm681_vm5, 1.0, %v1442_v37  ;;  %v648_v49 = vpop.f32.mrf.mxu0  ;;  %v849_v51 = vadd.f32 %v789_v42, %v788_v33 }
 0x164   : > { %vm682_vm6 = vcmp.gt.f32.partialorder %v645_v39, 0.0  ;;  %v649_v52 = vadd.f32 %v648_v49, %v1811_v38  ;;  %v790_v55 = vsel %vm756_vm2, %v1203_v34, 0.0  ;;  %v806_v39 = vld [vmem:[%s1605_s27 + $0x60] sm:$0xff] }
 0x165   : > { %v1204_v53 = vsel %vm682_vm6, 1.0, %v1442_v37  ;;  %v650_v43 = vpop.f32.mrf.mxu0  ;;  %850 = vadd.xlane.f32.xlu0 %v849_v51 }
 0x166   : > { %vm683_vm8 = vcmp.gt.f32.partialorder %v649_v52, 0.0  ;;  %v651_v35 = vadd.f32 %v650_v43, %v1811_v38  ;;  %v791_v58 = vsel %vm757_vm3, %v1204_v53, 0.0  ;;  %v808_v52 = vld [vmem:[%s1605_s27 + $0x70] sm:$0xff] }
 0x167   : > { %v1205_v59 = vsel %vm683_vm8, 1.0, %v1442_v37  ;;  %v852_v60 = vadd.f32 %v791_v58, %v790_v55 }
 0x168   : > { %vm684_vm9 = vcmp.gt.f32.partialorder %v651_v35, 0.0  ;;  %v792_v40 = vsel %vm756_vm2, %v1205_v59, 0.0  ;;  %v2024_v2 = vpack.c.bf16 %v1205_v59, %v1203_v34  ;;  %vm874_vm2 = vcmask 7168   ;;  %v807_v34 = vld [vmem:[%s1605_s27 + $0x68] sm:$0xff]  ;;  %v809_v35 = vld [vmem:[%s1605_s27 + $0x78] sm:$0xff]  ;;  %v907_v59 = vld [vmem:[%s1610_s5] sm:$0xff] }
 0x169   : > { %v1206_v61 = vsel %vm684_vm9, 1.0, %v1442_v37  ;;  %853 = vadd.xlane.f32.xlu1 %v852_v60  ;;  %v2026_v37 = vpack.c.bf16 %v1202_v29, %v1200_v19  ;;  %v911_v60 = vld [vmem:[%s1610_s5 + $0x20] sm:$0xff] }
 0x16a   : > { %v2011_v62 = vpack.c.bf16 %v1206_v61, %v1204_v53  ;;  %v793_v1 = vsel %vm757_vm3, %v1206_v61, 0.0 }
 0x16b   : > { %v855_v3 = vadd.f32 %v793_v1, %v792_v40 }
 0x16c   : > { %1210 = vmatprep.subr.msk.bf16.mxu0 %vm1851_vm7, %v2011_v62  ;;  %1308 = vmatprep.subr.msk.bf16.mxu1 %vm1851_vm7, %v2011_v62 }
 0x16d   : > { %1213 = vmatpush1.bf16.xpose.msk.msra.mxu0 %vm2016_vm10, %v2024_v2  ;;  %1316 = vmatpush1.bf16.xpose.msk.msra.mxu1 %vm2016_vm10, %v2024_v2 }
 0x16e   : > { %856 = vadd.xlane.f32.xlu0 %v855_v3  ;;  %1216 = vmatprep.subr.msk.bf16.mxu0 %vm1851_vm7, %v2026_v37  ;;  %v908_v3 = vld [vmem:[%s1610_s5 + $0x8] sm:$0xff] }
 0x16f   : > { %1309 = vmatprep.subr.msk.bf16.mxu1 %vm1851_vm7, %v2026_v37 }
 0x175   : > { %1219 = vmatpush1.bf16.xpose.msk.msra.mxu0 %vm2016_vm10, %v2046_v56  ;;  %1317 = vmatpush1.bf16.xpose.msk.msra.mxu1 %vm2016_vm10, %v2046_v56 }
 0x176   : > { %1222 = vmatprep.subr.msk.bf16.mxu0 %vm1851_vm7, %v1221_v57  ;;  %1310 = vmatprep.subr.msk.bf16.mxu1 %vm1851_vm7, %v1221_v57 }
 0x17d   : > { %1225 = vmatpush1.bf16.xpose.msk.msra.mxu0 %vm2016_vm10, %v1224_v5  ;;  %1318 = vmatpush1.bf16.xpose.msk.msra.mxu1 %vm2016_vm10, %v1224_v5 }
 0x17e   : > { %1228 = vmatprep.subr.msk.bf16.mxu0 %vm1851_vm7, %v1227_v63  ;;  %1311 = vmatprep.subr.msk.bf16.mxu1 %vm1851_vm7, %v1227_v63 }
 0x185   : > { %1231 = vmatpush1.bf16.xpose.msk.msra.mxu0 %vm2016_vm10, %v1230_v6  ;;  %1319 = vmatpush1.bf16.xpose.msk.msra.mxu1 %vm2016_vm10, %v1230_v6 }
 0x186   : > { %1234 = vmatprep.subr.msk.bf16.mxu0 %vm1851_vm7, %v1233_v46  ;;  %1312 = vmatprep.subr.msk.bf16.mxu1 %vm1851_vm7, %v1233_v46 }
 0x18d   : > { %1237 = vmatpush1.bf16.xpose.msk.msra.mxu0 %vm2016_vm10, %v1917_v21  ;;  %1320 = vmatpush1.bf16.xpose.msk.msra.mxu1 %vm2016_vm10, %v1917_v21 }
 0x18e   : > { %1240 = vmatprep.subr.msk.bf16.mxu0 %vm1851_vm7, %v1897_v4  ;;  %1313 = vmatprep.subr.msk.bf16.mxu1 %vm1851_vm7, %v1897_v4 }
 0x195   : > { %1243 = vmatpush1.bf16.xpose.msk.msra.mxu0 %vm2016_vm10, %v1891_v0  ;;  %1321 = vmatpush1.bf16.xpose.msk.msra.mxu1 %vm2016_vm10, %v1891_v0 }
 0x196   : > { %1246 = vmatprep.subr.msk.bf16.mxu0 %vm1851_vm7, %v1877_v47  ;;  %1314 = vmatprep.subr.msk.bf16.mxu1 %vm1851_vm7, %v1877_v47 }
 0x19d   : > { %1249 = vmatpush1.bf16.xpose.msk.msra.mxu0 %vm2016_vm10, %v1871_v30  ;;  %1322 = vmatpush1.bf16.xpose.msk.msra.mxu1 %vm2016_vm10, %v1871_v30 }
 0x19e   : > { %1252 = vmatprep.subr.msk.bf16.mxu0 %vm1851_vm7, %v1857_v15  ;;  %1315 = vmatprep.subr.msk.bf16.mxu1 %vm1851_vm7, %v1857_v15 }
 0x1a5   : > { %1255 = vmatpush1.bf16.xpose.msk.msra.mxu0 %vm2016_vm10, %v1845_v9  ;;  %1323 = vmatpush1.bf16.xpose.msk.msra.mxu1 %vm2016_vm10, %v1845_v9 }
 0x1ac   : > { %1261 = vmatmul.mubr.msk.bf16.vlgmr.msra.gmra.mxu0 %vm2016_vm10, %v1845_v9  ;;  %1273 = vmatmul.mubr.msk.bf16.vlgmr.msra.gmra.mxu1 %vm2016_vm10, %v1891_v0  ;;  %v794_v9 = vld [vmem:[%s1605_s27] sm:$0xff]  ;;  %v795_v0 = vld [vmem:[%s1605_s27 + $0x8] sm:$0xff] }
 0x1ad   : > { %1264 = vmatprep.mubr.msk.bf16.mxu0 %vm1851_vm7, %v1877_v47  ;;  %1276 = vmatprep.mubr.msk.bf16.mxu1 %vm1851_vm7, %v1233_v46 }
 0x1b4   : > { %1267 = vmatmul.mubr.msk.bf16.gmra.mxu0 %vm2016_vm10, %v1871_v30  ;;  %1279 = vmatmul.mubr.msk.bf16.gmra.mxu1 %vm2016_vm10, %v1917_v21 }
 0x1b5   : > { %1282 = vmatprep.mubr.msk.bf16.mxu1 %vm1851_vm7, %v1227_v63 }
 0x1ba   : > { %v812_v15 = vpop.xlane.xlu0 %811 }
 0x1bb   : > { %v858_v47 = vadd.f32 %v812_v15, %v794_v9  ;;  %v909_v9 = vld [vmem:[%s1610_s5 + $0x10] sm:$0xff] }
 0x1bc   : > { %1285 = vmatmul.mubr.msk.bf16.gmra.mxu1 %vm2016_vm10, %v1230_v6  ;;  %v913_v15 = vld [vmem:[%s1610_s5 + $0x30] sm:$0xff] }
 0x1bd   : > { %875 = vst.msk [vmem:[%s1605_s27] sm:$0xff] %vm874_vm2, %v858_v47  ;;  %1288 = vmatprep.mubr.msk.bf16.mxu1 %vm1851_vm7, %v1221_v57 }
 0x1be   : > { %v815_v30 = vpop.xlane.xlu1 %814 }
 0x1bf   : > { %v859_v4 = vadd.f32 %v815_v30, %v795_v0 }
 0x1c1   : > { %876 = vst.msk [vmem:[%s1605_s27 + $0x8] sm:$0xff] %vm874_vm2, %v859_v4 }
 0x1c2   : > { %v818_v21 = vpop.xlane.xlu0 %817 }
 0x1c3   : > { %v860_v23 = vadd.f32 %v818_v21, %v796_v12 }
 0x1c4   : > { %1291 = vmatmul.mubr.msk.bf16.gmra.mxu1 %vm2016_vm10, %v1224_v5 }
 0x1c5   : > { %877 = vst.msk [vmem:[%s1605_s27 + $0x10] sm:$0xff] %vm874_vm2, %v860_v23  ;;  %1294 = vmatprep.mubr.msk.bf16.mxu1 %vm1851_vm7, %v2026_v37  ;;  %v912_v37 = vld [vmem:[%s1610_s5 + $0x28] sm:$0xff]  ;;  %v910_v23 = vld [vmem:[%s1610_s5 + $0x18] sm:$0xff] }
 0x1c6   : > { %v821_v32 = vpop.xlane.xlu0 %820 }
 0x1c7   : > { %v861_v50 = vadd.f32 %v821_v32, %v797_v27  ;;  %v914_v27 = vld [vmem:[%s1610_s5 + $0x38] sm:$0xff] }
 0x1c9   : > { %878 = vst.msk [vmem:[%s1605_s27 + $0x18] sm:$0xff] %vm874_vm2, %v861_v50 }
 0x1ca   : > { %v824_v48 = vpop.xlane.xlu1 %823 }
 0x1cb   : > { %v862_v7 = vadd.f32 %v824_v48, %v798_v54 }
 0x1cc   : > { %1297 = vmatmul.mubr.msk.bf16.gmra.mxu1 %vm2016_vm10, %v2046_v56 }
 0x1cd   : > { %879 = vst.msk [vmem:[%s1605_s27 + $0x20] sm:$0xff] %vm874_vm2, %v862_v7  ;;  %1300 = vmatprep.mubr.msk.bf16.mxu1 %vm1851_vm7, %v2011_v62 }
 0x1ce   : > { %v827_v41 = vpop.xlane.xlu0 %826 }
 0x1cf   : > { %v863_v10 = vadd.f32 %v827_v41, %v799_v8  ;;  %v915_v41 = vld [vmem:[%s1610_s5 + $0x40] sm:$0xff] }
 0x1d1   : > { %880 = vst.msk [vmem:[%s1605_s27 + $0x28] sm:$0xff] %vm874_vm2, %v863_v10 }
 0x1d2   : > { %v830_v14 = vpop.xlane.xlu1 %829 }
 0x1d3   : > { %v864_v44 = vadd.f32 %v830_v14, %v800_v11 }
 0x1d4   : > { %1303 = vmatmul.mubr.msk.bf16.gmra.mxu1 %vm2016_vm10, %v2024_v2 }
 0x1d5   : > { %881 = vst.msk [vmem:[%s1605_s27 + $0x30] sm:$0xff] %vm874_vm2, %v864_v44  ;;  %v916_v44 = vld [vmem:[%s1610_s5 + $0x48] sm:$0xff] }
 0x1d6   : > { %v833_v13 = vpop.xlane.xlu0 %832 }
 0x1d7   : > { %v865_v17 = vadd.f32 %v833_v13, %v801_v16 }
 0x1d9   : > { %882 = vst.msk [vmem:[%s1605_s27 + $0x38] sm:$0xff] %vm874_vm2, %v865_v17 }
 0x1da   : > { %v836_v19 = vpop.xlane.xlu1 %835 }
 0x1db   : > { %v866_v20 = vadd.f32 %v836_v19, %v802_v18  ;;  %v917_v18 = vld [vmem:[%s1610_s5 + $0x50] sm:$0xff] }
 0x1dd   : > { %883 = vst.msk [vmem:[%s1605_s27 + $0x40] sm:$0xff] %vm874_vm2, %v866_v20 }
 0x1de   : > { %v839_v22 = vpop.xlane.xlu0 %838 }
 0x1df   : > { %v867_v45 = vadd.f32 %v839_v22, %v803_v36  ;;  %v918_v22 = vld [vmem:[%s1610_s5 + $0x58] sm:$0xff] }
 0x1e1   : > { %884 = vst.msk [vmem:[%s1605_s27 + $0x48] sm:$0xff] %vm874_vm2, %v867_v45 }
 0x1e2   : > { %v842_v25 = vpop.xlane.xlu1 %841 }
 0x1e3   : > { %v868_v26 = vadd.f32 %v842_v25, %v804_v24 }
 0x1e5   : > { %885 = vst.msk [vmem:[%s1605_s27 + $0x50] sm:$0xff] %vm874_vm2, %v868_v26  ;;  %v919_v26 = vld [vmem:[%s1610_s5 + $0x60] sm:$0xff] }
 0x1e6   : > { %v845_v29 = vpop.xlane.xlu0 %844 }
 0x1e7   : > { %v869_v31 = vadd.f32 %v845_v29, %v805_v28 }
 0x1e9   : > { %886 = vst.msk [vmem:[%s1605_s27 + $0x58] sm:$0xff] %vm874_vm2, %v869_v31 }
 0x1ea   : > { %v848_v33 = vpop.xlane.xlu1 %847 }
 0x1eb   : > { %v870_v42 = vadd.f32 %v848_v33, %v806_v39  ;;  %v920_v39 = vld [vmem:[%s1610_s5 + $0x68] sm:$0xff] }
 0x1ed   : > { %887 = vst.msk [vmem:[%s1605_s27 + $0x60] sm:$0xff] %vm874_vm2, %v870_v42 }
 0x1ee   : > { %v851_v49 = vpop.xlane.xlu0 %850 }
 0x1ef   : > { %v871_v51 = vadd.f32 %v851_v49, %v807_v34  ;;  %v921_v49 = vld [vmem:[%s1610_s5 + $0x70] sm:$0xff] }
 0x1f1   : > { %888 = vst.msk [vmem:[%s1605_s27 + $0x68] sm:$0xff] %vm874_vm2, %v871_v51 }
 0x1f2   : > { %v854_v53 = vpop.xlane.xlu1 %853 }
 0x1f3   : > { %v872_v43 = vadd.f32 %v854_v53, %v808_v52 }
 0x1f5   : > { %889 = vst.msk [vmem:[%s1605_s27 + $0x70] sm:$0xff] %vm874_vm2, %v872_v43  ;;  %v922_v43 = vld [vmem:[%s1610_s5 + $0x78] sm:$0xff] }
 0x1f7   : > { %v857_v55 = vpop.xlane.xlu0 %856 }
 0x1f8   : > { %v873_v58 = vadd.f32 %v857_v55, %v809_v35 }
 0x1fa   : > { %890 = vst.msk [vmem:[%s1605_s27 + $0x78] sm:$0xff] %vm874_vm2, %v873_v58 }
 0x26c   : > { %v957_v61 = vpop.f32.mrf.mxu0  ;;  %v973_v62 = vpop.f32.mrf.mxu1 }
 0x26d   : > { %v1020_v38 = vadd.f32 %v957_v61, %v907_v59  ;;  %v1024_v40 = vadd.f32 %v973_v62, %v911_v60 }
 0x26e   : > { %v959_v1 = vpop.f32.mrf.mxu0  ;;  %v975_v2 = vpop.f32.mrf.mxu1 }
 0x26f   : > { %1036 = vst [vmem:[%s1610_s5] sm:$0xff] %v1020_v38  ;;  %1040 = vst [vmem:[%s1610_s5 + $0x20] sm:$0xff] %v1024_v40 }
 0x270   : > { %v960_v56 = vpop.f32.mrf.mxu0  ;;  %v976_v57 = vpop.f32.mrf.mxu1 }
 0x271   : > { %v1021_v5 = vadd.f32 %v960_v56, %v908_v3  ;;  %v1025_v63 = vadd.f32 %v976_v57, %v912_v37 }
 0x272   : > { %v962_v6 = vpop.f32.mrf.mxu0  ;;  %v978_v46 = vpop.f32.mrf.mxu1 }
 0x273   : > { %1037 = vst [vmem:[%s1610_s5 + $0x8] sm:$0xff] %v1021_v5  ;;  %1041 = vst [vmem:[%s1610_s5 + $0x28] sm:$0xff] %v1025_v63 }
 0x274   : > { %v965_v47 = vpop.f32.mrf.mxu0  ;;  %v981_v0 = vpop.f32.mrf.mxu1 }
 0x275   : > { %v1022_v30 = vadd.f32 %v965_v47, %v909_v9  ;;  %v1026_v4 = vadd.f32 %v981_v0, %v913_v15 }
 0x276   : > { %v967_v12 = vpop.f32.mrf.mxu0  ;;  %v983_v21 = vpop.f32.mrf.mxu1 }
 0x277   : > { %1038 = vst [vmem:[%s1610_s5 + $0x10] sm:$0xff] %v1022_v30  ;;  %1042 = vst [vmem:[%s1610_s5 + $0x30] sm:$0xff] %v1026_v4 }
 0x278   : > { %v968_v32 = vpop.f32.mrf.mxu0  ;;  %v984_v50 = vpop.f32.mrf.mxu1 }
 0x279   : > { %v1023_v54 = vadd.f32 %v968_v32, %v910_v23  ;;  %v1027_v48 = vadd.f32 %v984_v50, %v914_v27 }
 0x27a   : > { %v970_v7 = vpop.f32.mrf.mxu0  ;;  %v986_v8 = vpop.f32.mrf.mxu1 }
 0x27b   : > { %1039 = vst [vmem:[%s1610_s5 + $0x18] sm:$0xff] %v1023_v54  ;;  %1043 = vst [vmem:[%s1610_s5 + $0x38] sm:$0xff] %v1027_v48 }
 0x27c   : > { %v989_v10 = vpop.f32.mrf.mxu1 }
 0x27d   : > { %v1028_v11 = vadd.f32 %v989_v10, %v915_v41 }
 0x27e   : > { %v991_v14 = vpop.f32.mrf.mxu1 }
 0x27f   : > { %1044 = vst [vmem:[%s1610_s5 + $0x40] sm:$0xff] %v1028_v11 }
 0x280   : > { %v992_v16 = vpop.f32.mrf.mxu1 }
 0x281   : > { %v1029_v13 = vadd.f32 %v992_v16, %v916_v44 }
 0x282   : > { %v994_v17 = vpop.f32.mrf.mxu1 }
 0x283   : > { %1045 = vst [vmem:[%s1610_s5 + $0x48] sm:$0xff] %v1029_v13 }
 0x284   : > { %v997_v19 = vpop.f32.mrf.mxu1 }
 0x285   : > { %v1030_v20 = vadd.f32 %v997_v19, %v917_v18 }
 0x286   : > { %v999_v36 = vpop.f32.mrf.mxu1 }
 0x287   : > { %1046 = vst [vmem:[%s1610_s5 + $0x50] sm:$0xff] %v1030_v20 }
 0x288   : > { %v1000_v45 = vpop.f32.mrf.mxu1 }
 0x289   : > { %v1031_v24 = vadd.f32 %v1000_v45, %v918_v22 }
 0x28a   : > { %v1002_v25 = vpop.f32.mrf.mxu1 }
 0x28b   : > { %1047 = vst [vmem:[%s1610_s5 + $0x58] sm:$0xff] %v1031_v24 }
 0x28c   : > { %v1005_v28 = vpop.f32.mrf.mxu1 }
 0x28d   : > { %v1032_v29 = vadd.f32 %v1005_v28, %v919_v26 }
 0x28e   : > { %v1007_v31 = vpop.f32.mrf.mxu1 }
 0x28f   : > { %1048 = vst [vmem:[%s1610_s5 + $0x60] sm:$0xff] %v1032_v29 }
 0x290   : > { %v1008_v33 = vpop.f32.mrf.mxu1 }
 0x291   : > { %v1033_v42 = vadd.f32 %v1008_v33, %v920_v39 }
 0x292   : > { %v1010_v34 = vpop.f32.mrf.mxu1 }
 0x293   : > { %1049 = vst [vmem:[%s1610_s5 + $0x68] sm:$0xff] %v1033_v42 }
 0x294   : > { %v1013_v51 = vpop.f32.mrf.mxu1 }
 0x295   : > { %v1034_v52 = vadd.f32 %v1013_v51, %v921_v49 }
 0x296   : > { %v1015_v53 = vpop.f32.mrf.mxu1 }
 0x297   : > { %1050 = vst [vmem:[%s1610_s5 + $0x70] sm:$0xff] %v1034_v52 }
 0x298   : > { %v1016_v35 = vpop.f32.mrf.mxu1 }
 0x299   : > { %v1035_v55 = vadd.f32 %v1016_v35, %v922_v43 }
 0x29a   : > { %v1018_v58 = vpop.f32.mrf.mxu1 }
 0x29b   : > { %1051 = vst [vmem:[%s1610_s5 + $0x78] sm:$0xff] %v1035_v55 }
 0x29c PF: > { %s15_s21 = sadd.s32 1, %s1439_s21   ;;  %s2273_s15 = smov %s1419_s16 }
 0x29d   : > { %p12_p12 = scmp.ge.s32.totalorder %s15_s21, 10   ;;  %s2274_s16 = smov %s1520_s28 }
 0x29e   : > { %s2275_s17 = smov %s1431_s19  ;;  %s2276_s18 = smov %s1435_s20 }
 0x29f   : > { %s2277_s19 = smov %s2280_s22  ;;  %s2278_s20 = smov %s2284_s23 }
 0x2a0   :  { %14 = sbr.rel (!%p12_p12) target bundleno = 4 (0x4), region = 106 }

</bundles_post_ra>
